<compile_context>
chip_gen: v7x
topology: tpu7x:2x2x1
jax: 0.10.0
libtpu: 0.0.40
codegen_flags: <defaults>
</compile_context>

<pallas_src>
import functools

import jax
import jax.numpy as jnp
from jax import lax
from jax.experimental import pallas as pl
from jax.experimental.pallas import tpu as pltpu

CM_P = 128   # padded width of the bottleneck's internal channels (lane-dense)
CO_P = 128   # padded width of the output channels (lane-dense)


def _round_up(x, m):
    return ((x + m - 1) // m) * m


def _vmem_limit_bytes():
    """Scoped-VMEM cap: raised where the chip has headroom (v5e/v6e: 128 MiB
    physical -> 64 MiB), conservative on v7x (64 MiB physical -> 32 MiB)."""
    try:
        cap = pltpu.get_tpu_info().vmem_capacity_bytes
    except Exception:
        return 32 * 1024 * 1024
    return max(32 * 1024 * 1024, min(96 * 1024 * 1024, cap // 2))


# ------------------------------ fused kernel --------------------------------

def _bottleneck_gap_kernel(x_ref, w1d_ref, b1d_ref, w2_ref, b2_ref,
                           w3_ref, b3_ref, o_ref, hpad_ref, res_ref,
                           *, H, W, Cm, Co, PAD):
    HW = H * W

    # ---- fused 1x1 conv (main path) + 1x1 downsample projection ------------
    x = x_ref[0]                                             # (HW, Cin_p) bf16
    y = jnp.dot(x, w1d_ref[...], preferred_element_type=jnp.float32)
    y = y + b1d_ref[...]                                     # (HW, Cm+Co) f32
    # Park the residual as bf16 in VMEM so no (HW, Co) f32 temp stays live
    # across the 3x3-conv section.
    res_ref[...] = y[:, Cm:].astype(jnp.bfloat16)            # BN only
    h1 = jnp.maximum(y[:, :Cm], 0.0).astype(jnp.bfloat16)    # BN+ReLU, bf16 once

    # ---- stage the three dx-variants of h1 side-by-side along lanes --------
    # Column wrap-kill masks are applied ONCE here (bf16 operand) and the
    # +/-1 dx shift is folded into the staged copies, so every scratch store
    # lands at PAD and every tap read starts at PAD + dy*W (sublane-aligned
    # when W is a multiple of 8).
    col = lax.broadcasted_iota(jnp.int32, (HW, 1), 0) % W
    h1_l = jnp.where(col < W - 1, h1, 0)          # feeds the dx = -1 taps
    h1_r = jnp.where(col > 0, h1, 0)              # feeds the dx = +1 taps
    zrow = jnp.zeros((1, Cm), jnp.bfloat16)
    v_l = jnp.concatenate([zrow, h1_l[:-1]], axis=0)   # h1_l shifted down by 1
    v_r = jnp.concatenate([h1_r[1:], zrow], axis=0)    # h1_r shifted up by 1

    # Halo bands zeroed every iteration (NOT program_id-gated: under a
    # "parallel" batch axis a second core never runs iteration 0).  bf16,
    # 2*PAD rows -> negligible store traffic.
    zband = jnp.zeros((PAD, 3 * Cm), jnp.bfloat16)
    hpad_ref[pl.ds(0, PAD), :] = zband                       # top halo
    hpad_ref[pl.ds(PAD + HW, PAD), :] = zband                # bottom halo
    hpad_ref[pl.ds(PAD, HW), :] = jnp.concatenate([v_l, h1, v_r], axis=1)

    # ---- 3x3 "same" conv as 3 accumulated K=3*Cm MXU matmuls (one per dy) --
    acc = None
    for ky in range(3):                                      # dy = ky - 1
        tap3 = hpad_ref[pl.ds(PAD + (ky - 1) * W, HW), :]    # (HW, 3*Cm) bf16
        d = jnp.dot(tap3, w2_ref[ky], preferred_element_type=jnp.float32)
        acc = d if acc is None else acc + d
    h2 = jnp.maximum(acc + b2_ref[...], 0.0)                 # (HW, Cm) f32

    # ---- final 1x1 conv + residual add + ReLU -------------------------------
    h3 = jnp.dot(h2.astype(jnp.bfloat16), w3_ref[...],
                 preferred_element_type=jnp.float32)
    h3 = jnp.maximum(h3 + b3_ref[...] + res_ref[...], 0.0)   # (HW, Co) f32

    # ---- fused global average pool (per-image) ------------------------------
    o_ref[0] = jnp.sum(h3, axis=0, keepdims=True) * (1.0 / HW)


# ---------------------------- pallas_call wrapper ----------------------------

def _fused_bottleneck_gap(x3d, folded, *, H, W):
    N, HW, cin_p = x3d.shape
    Cm = folded["b2"].shape[1]
    Co = folded["b3"].shape[1]
    PAD = _round_up(max(W, 8), 8)     # halo rows; multiple of 8 keeps access aligned

    kernel = functools.partial(_bottleneck_gap_kernel,
                               H=H, W=W, Cm=Cm, Co=Co, PAD=PAD)
    out = pl.pallas_call(
        kernel,
        out_shape=jax.ShapeDtypeStruct((N, 1, Co), jnp.float32),
        grid=(N,),
        in_specs=[
            pl.BlockSpec((1, HW, cin_p), lambda n: (n, 0, 0)),       # x (bf16)
            pl.BlockSpec(folded["w1d"].shape, lambda n: (0, 0)),     # [w1|wd]
            pl.BlockSpec(folded["b1d"].shape, lambda n: (0, 0)),     # [b1|bd]
            pl.BlockSpec(folded["w2"].shape, lambda n: (0, 0, 0)),   # packed 3x3
            pl.BlockSpec(folded["b2"].shape, lambda n: (0, 0)),
            pl.BlockSpec(folded["w3"].shape, lambda n: (0, 0)),
            pl.BlockSpec(folded["b3"].shape, lambda n: (0, 0)),
        ],
        out_specs=pl.BlockSpec((1, 1, Co), lambda n: (n, 0, 0)),
        scratch_shapes=[
            pltpu.VMEM((2 * PAD + HW, 3 * Cm), jnp.bfloat16),   # staged dx-taps
            pltpu.VMEM((HW, Co), jnp.bfloat16),                 # parked residual
        ],
        compiler_params=pltpu.CompilerParams(
            dimension_semantics=("parallel",),      # batch axis -> both TCs (v7x)
            vmem_limit_bytes=_vmem_limit_bytes(),
        ),
    )(x3d, folded["w1d"], folded["b1d"], folded["w2"], folded["b2"],
      folded["w3"], folded["b3"])
    return out.reshape(N, Co)


# ------------------------------- parameters ----------------------------------

def init_params(key, c_in, c_mid, c_out):
    """Deterministic synthetic weights; BN given as per-channel (scale, bias)."""
    ks = jax.random.split(key, 8)

    def w(k, shape):
        return 0.1 * jax.random.normal(k, shape, jnp.float32)

    def sb(k, c):
        k1, k2 = jax.random.split(k)
        return (1.0 + 0.05 * jax.random.normal(k1, (c,), jnp.float32),
                0.05 * jax.random.normal(k2, (c,), jnp.float32))

    s1, b1 = sb(ks[1], c_mid)
    s2, b2 = sb(ks[3], c_mid)
    s3, b3 = sb(ks[5], c_out)
    sd, bd = sb(ks[7], c_out)
    return {
        "w1": w(ks[0], (c_in, c_mid)), "s1": s1, "b1": b1,            # 1x1 conv
        "w2": w(ks[2], (3, 3, c_mid, c_mid)), "s2": s2, "b2": b2,     # 3x3 conv
        "w3": w(ks[4], (c_mid, c_out)), "s3": s3, "b3": b3,           # 1x1 conv
        "wd": w(ks[6], (c_in, c_out)), "sd": sd, "bd": bd,            # downsample
    }


def fold_and_pad_params(p, c_in_p, cm_p, co_p):
    """Fold inference-mode BN scale into the weights, zero-pad channels to
    lane-dense widths, merge [w1 | wd], repack w2 for K-stacked taps, and cast
    matmul operands to bf16."""
    c_in, c_mid = p["w1"].shape
    c_out = p["w3"].shape[1]

    def pad2(a, r, c):
        return jnp.pad(a, ((0, r - a.shape[0]), (0, c - a.shape[1])))

    w1 = pad2(p["w1"] * p["s1"][None, :], c_in_p, cm_p)
    wd = pad2(p["wd"] * p["sd"][None, :], c_in_p, co_p)
    w1d = jnp.concatenate([w1, wd], axis=1).astype(jnp.bfloat16)
    b1d = jnp.concatenate([jnp.pad(p["b1"], (0, cm_p - c_mid)),
                           jnp.pad(p["bd"], (0, co_p - c_out))])[None, :]

    # 3x3 weights: fold BN scale, pad channels, repack as (3_dy, 3*Cm, Cm) so
    # each dy is one K = 3*Cm matmul over the lane-stacked
    # [dx=-1 | dx=0 | dx=+1] copies of h1 (kx-major along K matches the
    # lane-block order used in the kernel's staging scratch).
    w2 = p["w2"] * p["s2"][None, None, None, :]
    w2 = jnp.pad(w2, ((0, 0), (0, 0), (0, cm_p - c_mid), (0, cm_p - c_mid)))
    w2 = w2.reshape(3, 3 * cm_p, cm_p).astype(jnp.bfloat16)
    b2 = jnp.pad(p["b2"], (0, cm_p - c_mid))[None, :]

    w3 = pad2(p["w3"] * p["s3"][None, :], cm_p, co_p).astype(jnp.bfloat16)
    b3 = jnp.pad(p["b3"], (0, co_p - c_out))[None, :]

    return {"w1d": w1d, "b1d": b1d, "w2": w2, "b2": b2, "w3": w3, "b3": b3}


# --------------------------------- forward -----------------------------------

@jax.jit
def base_net_forward(x_nchw, params):
    """Feature-extractor path of BaseNet: bottleneck block + global avg pool."""
    x = jnp.transpose(x_nchw, (0, 2, 3, 1)).astype(jnp.float32)   # NCHW -> NHWC
    N, H, W, c_in = x.shape
    c_mid = params["w1"].shape[1]
    c_out = params["w3"].shape[1]
    assert c_mid <= CM_P and c_out <= CO_P

    # NOTE: c_in_p can be as small as 8 here (demo shapes); the first matmul is
    # then K=8 / lane-sparse.  Real bottleneck blocks have c_in >= 256.
    c_in_p = _round_up(max(c_in, 8), 8)
    folded = fold_and_pad_params(params, c_in_p, CM_P, CO_P)

    xb = jnp.pad(x, ((0, 0), (0, 0), (0, 0), (0, c_in_p - c_in)))
    xb = xb.astype(jnp.bfloat16).reshape(N, H * W, c_in_p)

    pooled = _fused_bottleneck_gap(xb, folded, H=H, W=W)           # (N, CO_P)
    return pooled[:, :c_out]                                       # (N, out_dim)


# ------------------------- pure-JAX f32 reference -----------------------------

def _reference_forward(x_nchw, params):
    x = jnp.transpose(x_nchw, (0, 2, 3, 1)).astype(jnp.float32)
    N, H, W, _ = x.shape
    c_mid = params["w1"].shape[1]
    h1 = jax.nn.relu(jnp.einsum("nhwc,cm->nhwm", x, params["w1"] * params["s1"])
                     + params["b1"])
    h1p = jnp.pad(h1, ((0, 0), (1, 1), (1, 1), (0, 0)))
    w2 = params["w2"] * params["s2"]
    acc = jnp.zeros((N, H, W, c_mid), jnp.float32)
    for ky in range(3):
        for kx in range(3):
            acc = acc + jnp.einsum("nhwc,cm->nhwm",
                                   h1p[:, ky:ky + H, kx:kx + W, :], w2[ky, kx])
    h2 = jax.nn.relu(acc + params["b2"])
    res = jnp.einsum("nhwc,cm->nhwm", x, params["wd"] * params["sd"]) + params["bd"]
    h3 = jax.nn.relu(jnp.einsum("nhwc,cm->nhwm", h2, params["w3"] * params["s3"])
                     + params["b3"] + res)
    return jnp.mean(h3, axis=(1, 2))


if __name__ == "__main__":
    key = jax.random.PRNGKey(0)
    k_x, k_p = jax.random.split(key)

    # small, consistent with an NCHW image batch
    batch, c_in, spatial = 2, 4, 16
    c_mid, out_dim = 8, 32     # scaled-down stand-ins for ResNet-50's 512 / 2048

    x = jax.random.normal(k_x, (batch, c_in, spatial, spatial), jnp.float32)
    params = init_params(k_p, c_in, c_mid, out_dim)

    feats = base_net_forward(x, params)
    jax.block_until_ready(feats)
    assert feats.shape == (batch, out_dim)
    assert bool(jnp.all(jnp.isfinite(feats)))

    ref = _reference_forward(x, params)
    err = float(jnp.max(jnp.abs(feats - ref)))
    assert err < 3e-2, f"kernel deviates from f32 reference by {err}"
    print("KERNEL_OK")
</pallas_src>

<mosaic_0001>
module attributes {stable_mosaic.version = 11 : i64} {
  func.func @_bottleneck_gap_kernel(%arg0: i32, %arg1: memref<1x256x8xbf16, #tpu.memory_space<vmem>>, %arg2: memref<8x256xbf16, #tpu.memory_space<vmem>>, %arg3: memref<1x256xf32, #tpu.memory_space<vmem>>, %arg4: memref<3x384x128xbf16, #tpu.memory_space<vmem>>, %arg5: memref<1x128xf32, #tpu.memory_space<vmem>>, %arg6: memref<128x128xbf16, #tpu.memory_space<vmem>>, %arg7: memref<1x128xf32, #tpu.memory_space<vmem>>, %arg8: memref<1x1x128xf32, #tpu.memory_space<vmem>>, %arg9: memref<288x384xbf16, #tpu.memory_space<vmem>>, %arg10: memref<256x128xbf16, #tpu.memory_space<vmem>>) attributes {dimension_semantics = [#tpu.dimension_semantics<parallel>], iteration_bounds = array<i64: 2>, scalar_prefetch = 0 : i64, scratch_operands = 2 : i64, tpu.core_type = #tpu.core_type<tc>, window_params = [{transform_indices = @transform_0, window_bounds = array<i64: 1, 256, 8>}, {pipeline_mode = #tpu.pipeline_mode<synchronous>, transform_indices = @transform_1, window_bounds = array<i64: 8, 256>}, {pipeline_mode = #tpu.pipeline_mode<synchronous>, transform_indices = @transform_2, window_bounds = array<i64: 1, 256>}, {pipeline_mode = #tpu.pipeline_mode<synchronous>, transform_indices = @transform_3, window_bounds = array<i64: 3, 384, 128>}, {pipeline_mode = #tpu.pipeline_mode<synchronous>, transform_indices = @transform_4, window_bounds = array<i64: 1, 128>}, {pipeline_mode = #tpu.pipeline_mode<synchronous>, transform_indices = @transform_5, window_bounds = array<i64: 128, 128>}, {pipeline_mode = #tpu.pipeline_mode<synchronous>, transform_indices = @transform_6, window_bounds = array<i64: 1, 128>}, {transform_indices = @transform_7, window_bounds = array<i64: 1, 1, 128>}]} {
    %c0 = arith.constant 0 : index
    %c0_0 = arith.constant 0 : index
    %c0_1 = arith.constant 0 : index
    %0 = vector.load %arg1[%c0, %c0_0, %c0_1] : memref<1x256x8xbf16, #tpu.memory_space<vmem>>, vector<1x256x8xbf16>
    %1 = vector.shape_cast %0 : vector<1x256x8xbf16> to vector<256x8xbf16>
    %c0_2 = arith.constant 0 : index
    %c0_3 = arith.constant 0 : index
    %2 = vector.load %arg2[%c0_2, %c0_3] : memref<8x256xbf16, #tpu.memory_space<vmem>>, vector<8x256xbf16>
    %cst = arith.constant dense<0.000000e+00> : vector<256x256xf32>
    %3 = tpu.matmul %1, %2, %cst {dimension_numbers = #tpu.dot_dimension_numbers<[1], [0], [0], [1], [0, 0, 1, 1], [], []>} : vector<256x8xbf16>, vector<8x256xbf16>, vector<256x256xf32> -> vector<256x256xf32>
    %c0_4 = arith.constant 0 : index
    %c0_5 = arith.constant 0 : index
    %4 = vector.load %arg3[%c0_4, %c0_5] : memref<1x256xf32, #tpu.memory_space<vmem>>, vector<1x256xf32>
    %5 = vector.broadcast %4 : vector<1x256xf32> to vector<256x256xf32>
    %6 = arith.addf %3, %5 : vector<256x256xf32>
    %7 = vector.extract_strided_slice %6 {offsets = [0, 128], sizes = [256, 128], strides = [1, 1]} : vector<256x256xf32> to vector<256x128xf32>
    %8 = arith.truncf %7 : vector<256x128xf32> to vector<256x128xbf16>
    %c0_6 = arith.constant 0 : index
    %c0_7 = arith.constant 0 : index
    %9 = vector.load %arg10[%c0_6, %c0_7] : memref<256x128xbf16, #tpu.memory_space<vmem>>, vector<256x128xbf16>
    tpu.vector_store %arg10[%c0_6, %c0_7], %8 {strides = array<i32>} : memref<256x128xbf16, #tpu.memory_space<vmem>>, vector<256x128xbf16>,
    %10 = vector.extract_strided_slice %6 {offsets = [0, 0], sizes = [256, 128], strides = [1, 1]} : vector<256x256xf32> to vector<256x128xf32>
    %cst_8 = arith.constant 0.000000e+00 : f32
    %11 = vector.broadcast %cst_8 : f32 to vector<256x128xf32>
    %12 = arith.maximumf %10, %11 : vector<256x128xf32>
    %13 = arith.truncf %12 : vector<256x128xf32> to vector<256x128xbf16>
    %14 = tpu.iota {dimensions = array<i32: 0>} : vector<256x1xi32>
    %c16_i32 = arith.constant 16 : i32
    %c0_i32 = arith.constant 0 : i32
    %15 = arith.cmpi eq, %c16_i32, %c0_i32 : i32
    %c1_i32 = arith.constant 1 : i32
    %16 = arith.select %15, %c1_i32, %c16_i32 : i32
    %17 = vector.broadcast %16 : i32 to vector<256x1xi32>
    %18 = arith.remsi %14, %17 : vector<256x1xi32>
    %c0_i32_9 = arith.constant 0 : i32
    %19 = vector.broadcast %c0_i32_9 : i32 to vector<256x1xi32>
    %20 = arith.cmpi ne, %18, %19 : vector<256x1xi32>
    %c0_i32_10 = arith.constant 0 : i32
    %21 = vector.broadcast %c0_i32_10 : i32 to vector<256x1xi32>
    %22 = arith.cmpi slt, %18, %21 : vector<256x1xi32>
    %c0_i32_11 = arith.constant 0 : i32
    %23 = arith.cmpi slt, %16, %c0_i32_11 : i32
    %24 = vector.broadcast %23 : i1 to vector<256x1xi1>
    %25 = vector.broadcast %24 : vector<256x1xi1> to vector<256x1xi1>
    %26 = arith.xori %22, %25 : vector<256x1xi1>
    %27 = arith.andi %26, %20 : vector<256x1xi1>
    %28 = vector.broadcast %16 : i32 to vector<256x1xi32>
    %29 = arith.addi %18, %28 : vector<256x1xi32>
    %30 = arith.select %27, %29, %18 : vector<256x1xi1>, vector<256x1xi32>
    %c15_i32 = arith.constant 15 : i32
    %31 = vector.broadcast %c15_i32 : i32 to vector<256x1xi32>
    %32 = arith.cmpi slt, %30, %31 : vector<256x1xi32>
    %c0_i32_12 = arith.constant 0 : i32
    %33 = arith.sitofp %c0_i32_12 : i32 to bf16
    %34 = vector.shape_cast %32 : vector<256x1xi1> to vector<256x1xi1>
    %35 = vector.broadcast %34 : vector<256x1xi1> to vector<256x128xi1>
    %36 = vector.broadcast %33 : bf16 to vector<256x128xbf16>
    %37 = arith.select %35, %13, %36 : vector<256x128xi1>, vector<256x128xbf16>
    %c0_i32_13 = arith.constant 0 : i32
    %38 = vector.broadcast %c0_i32_13 : i32 to vector<256x1xi32>
    %39 = arith.cmpi sgt, %30, %38 : vector<256x1xi32>
    %c0_i32_14 = arith.constant 0 : i32
    %40 = arith.sitofp %c0_i32_14 : i32 to bf16
    %41 = vector.shape_cast %39 : vector<256x1xi1> to vector<256x1xi1>
    %42 = vector.broadcast %41 : vector<256x1xi1> to vector<256x128xi1>
    %43 = vector.broadcast %40 : bf16 to vector<256x128xbf16>
    %44 = arith.select %42, %13, %43 : vector<256x128xi1>, vector<256x128xbf16>
    %cst_15 = arith.constant 0.000000e+00 : bf16
    %45 = vector.broadcast %cst_15 : bf16 to vector<1x128xbf16>
    %46 = vector.extract_strided_slice %37 {offsets = [0, 0], sizes = [255, 128], strides = [1, 1]} : vector<256x128xbf16> to vector<255x128xbf16>
    %47 = tpu.concatenate %45, %46 in 0 : vector<1x128xbf16>, vector<255x128xbf16> -> vector<256x128xbf16>
    %48 = vector.extract_strided_slice %44 {offsets = [1, 0], sizes = [255, 128], strides = [1, 1]} : vector<256x128xbf16> to vector<255x128xbf16>
    %49 = tpu.concatenate %48, %45 in 0 : vector<255x128xbf16>, vector<1x128xbf16> -> vector<256x128xbf16>
    %cst_16 = arith.constant 0.000000e+00 : bf16
    %50 = vector.broadcast %cst_16 : bf16 to vector<16x384xbf16>
    %c0_17 = arith.constant 0 : index
    %c0_18 = arith.constant 0 : index
    %51 = vector.load %arg9[%c0_17, %c0_18] : memref<288x384xbf16, #tpu.memory_space<vmem>>, vector<16x384xbf16>
    tpu.vector_store %arg9[%c0_17, %c0_18], %50 {strides = array<i32>} : memref<288x384xbf16, #tpu.memory_space<vmem>>, vector<16x384xbf16>,
    %c272 = arith.constant 272 : index
    %c0_19 = arith.constant 0 : index
    %52 = vector.load %arg9[%c272, %c0_19] : memref<288x384xbf16, #tpu.memory_space<vmem>>, vector<16x384xbf16>
    tpu.vector_store %arg9[%c272, %c0_19], %50 {strides = array<i32>} : memref<288x384xbf16, #tpu.memory_space<vmem>>, vector<16x384xbf16>,
    %53 = tpu.concatenate %47, %13, %49 in 1 : vector<256x128xbf16>, vector<256x128xbf16>, vector<256x128xbf16> -> vector<256x384xbf16>
    %c16 = arith.constant 16 : index
    %c0_20 = arith.constant 0 : index
    %54 = vector.load %arg9[%c16, %c0_20] : memref<288x384xbf16, #tpu.memory_space<vmem>>, vector<256x384xbf16>
    tpu.vector_store %arg9[%c16, %c0_20], %53 {strides = array<i32>} : memref<288x384xbf16, #tpu.memory_space<vmem>>, vector<256x384xbf16>,
    %c0_21 = arith.constant 0 : index
    %c0_22 = arith.constant 0 : index
    %55 = vector.load %arg9[%c0_21, %c0_22] : memref<288x384xbf16, #tpu.memory_space<vmem>>, vector<256x384xbf16>
    %c0_23 = arith.constant 0 : index
    %c0_24 = arith.constant 0 : index
    %c0_25 = arith.constant 0 : index
    %56 = vector.load %arg4[%c0_23, %c0_24, %c0_25] : memref<3x384x128xbf16, #tpu.memory_space<vmem>>, vector<1x384x128xbf16>
    %57 = vector.shape_cast %56 : vector<1x384x128xbf16> to vector<384x128xbf16>
    %cst_26 = arith.constant dense<0.000000e+00> : vector<256x128xf32>
    %58 = tpu.matmul %55, %57, %cst_26 {dimension_numbers = #tpu.dot_dimension_numbers<[1], [0], [0], [1], [0, 0, 1, 1], [], []>} : vector<256x384xbf16>, vector<384x128xbf16>, vector<256x128xf32> -> vector<256x128xf32>
    %c16_27 = arith.constant 16 : index
    %c0_28 = arith.constant 0 : index
    %59 = vector.load %arg9[%c16_27, %c0_28] : memref<288x384xbf16, #tpu.memory_space<vmem>>, vector<256x384xbf16>
    %c1 = arith.constant 1 : index
    %c0_29 = arith.constant 0 : index
    %c0_30 = arith.constant 0 : index
    %60 = vector.load %arg4[%c1, %c0_29, %c0_30] : memref<3x384x128xbf16, #tpu.memory_space<vmem>>, vector<1x384x128xbf16>
    %61 = vector.shape_cast %60 : vector<1x384x128xbf16> to vector<384x128xbf16>
    %cst_31 = arith.constant dense<0.000000e+00> : vector<256x128xf32>
    %62 = tpu.matmul %59, %61, %cst_31 {dimension_numbers = #tpu.dot_dimension_numbers<[1], [0], [0], [1], [0, 0, 1, 1], [], []>} : vector<256x384xbf16>, vector<384x128xbf16>, vector<256x128xf32> -> vector<256x128xf32>
    %63 = arith.addf %58, %62 : vector<256x128xf32>
    %c32 = arith.constant 32 : index
    %c0_32 = arith.constant 0 : index
    %64 = vector.load %arg9[%c32, %c0_32] : memref<288x384xbf16, #tpu.memory_space<vmem>>, vector<256x384xbf16>
    %c2 = arith.constant 2 : index
    %c0_33 = arith.constant 0 : index
    %c0_34 = arith.constant 0 : index
    %65 = vector.load %arg4[%c2, %c0_33, %c0_34] : memref<3x384x128xbf16, #tpu.memory_space<vmem>>, vector<1x384x128xbf16>
    %66 = vector.shape_cast %65 : vector<1x384x128xbf16> to vector<384x128xbf16>
    %cst_35 = arith.constant dense<0.000000e+00> : vector<256x128xf32>
    %67 = tpu.matmul %64, %66, %cst_35 {dimension_numbers = #tpu.dot_dimension_numbers<[1], [0], [0], [1], [0, 0, 1, 1], [], []>} : vector<256x384xbf16>, vector<384x128xbf16>, vector<256x128xf32> -> vector<256x128xf32>
    %68 = arith.addf %63, %67 : vector<256x128xf32>
    %c0_36 = arith.constant 0 : index
    %c0_37 = arith.constant 0 : index
    %69 = vector.load %arg5[%c0_36, %c0_37] : memref<1x128xf32, #tpu.memory_space<vmem>>, vector<1x128xf32>
    %70 = vector.broadcast %69 : vector<1x128xf32> to vector<256x128xf32>
    %71 = arith.addf %68, %70 : vector<256x128xf32>
    %cst_38 = arith.constant 0.000000e+00 : f32
    %72 = vector.broadcast %cst_38 : f32 to vector<256x128xf32>
    %73 = arith.maximumf %71, %72 : vector<256x128xf32>
    %74 = arith.truncf %73 : vector<256x128xf32> to vector<256x128xbf16>
    %c0_39 = arith.constant 0 : index
    %c0_40 = arith.constant 0 : index
    %75 = vector.load %arg6[%c0_39, %c0_40] : memref<128x128xbf16, #tpu.memory_space<vmem>>, vector<128x128xbf16>
    %cst_41 = arith.constant dense<0.000000e+00> : vector<256x128xf32>
    %76 = tpu.matmul %74, %75, %cst_41 {dimension_numbers = #tpu.dot_dimension_numbers<[1], [0], [0], [1], [0, 0, 1, 1], [], []>} : vector<256x128xbf16>, vector<128x128xbf16>, vector<256x128xf32> -> vector<256x128xf32>
    %c0_42 = arith.constant 0 : index
    %c0_43 = arith.constant 0 : index
    %77 = vector.load %arg7[%c0_42, %c0_43] : memref<1x128xf32, #tpu.memory_space<vmem>>, vector<1x128xf32>
    %78 = vector.broadcast %77 : vector<1x128xf32> to vector<256x128xf32>
    %79 = arith.addf %76, %78 : vector<256x128xf32>
    %c0_44 = arith.constant 0 : index
    %c0_45 = arith.constant 0 : index
    %80 = vector.load %arg10[%c0_44, %c0_45] : memref<256x128xbf16, #tpu.memory_space<vmem>>, vector<256x128xbf16>
    %81 = arith.extf %80 : vector<256x128xbf16> to vector<256x128xf32>
    %82 = arith.addf %79, %81 : vector<256x128xf32>
    %cst_46 = arith.constant 0.000000e+00 : f32
    %83 = vector.broadcast %cst_46 : f32 to vector<256x128xf32>
    %84 = arith.maximumf %82, %83 : vector<256x128xf32>
    %cst_47 = arith.constant dense<0.000000e+00> : vector<128xf32>
    %85 = vector.multi_reduction <add>, %84, %cst_47 [0] : vector<256x128xf32> to vector<128xf32>
    %86 = vector.shape_cast %85 : vector<128xf32> to vector<1x128xf32>
    %cst_48 = arith.constant 3.906250e-03 : f32
    %87 = vector.broadcast %cst_48 : f32 to vector<1x128xf32>
    %88 = arith.mulf %86, %87 : vector<1x128xf32>
    %c0_49 = arith.constant 0 : index
    %c0_50 = arith.constant 0 : index
    %c0_51 = arith.constant 0 : index
    %89 = vector.load %arg8[%c0_49, %c0_50, %c0_51] : memref<1x1x128xf32, #tpu.memory_space<vmem>>, vector<1x1x128xf32>
    %90 = vector.shape_cast %89 : vector<1x1x128xf32> to vector<1x128xf32>
    %91 = vector.shape_cast %88 : vector<1x128xf32> to vector<1x1x128xf32>
    tpu.vector_store %arg8[%c0_49, %c0_50, %c0_51], %91 {strides = array<i32>} : memref<1x1x128xf32, #tpu.memory_space<vmem>>, vector<1x1x128xf32>,
    return
  }
  func.func @transform_0(%arg0: i32) -> (i32, i32, i32) {
    %c0_i32 = arith.constant 0 : i32
    %c0_i32_0 = arith.constant 0 : i32
    %c0_i32_1 = arith.constant 0 : i32
    return %arg0, %c0_i32, %c0_i32_0 : i32, i32, i32
  }
  func.func @transform_1(%arg0: i32) -> (i32, i32) {
    %c0_i32 = arith.constant 0 : i32
    %c0_i32_0 = arith.constant 0 : i32
    %c0_i32_1 = arith.constant 0 : i32
    return %c0_i32, %c0_i32_0 : i32, i32
  }
  func.func @transform_2(%arg0: i32) -> (i32, i32) {
    %c0_i32 = arith.constant 0 : i32
    %c0_i32_0 = arith.constant 0 : i32
    %c0_i32_1 = arith.constant 0 : i32
    return %c0_i32, %c0_i32_0 : i32, i32
  }
  func.func @transform_3(%arg0: i32) -> (i32, i32, i32) {
    %c0_i32 = arith.constant 0 : i32
    %c0_i32_0 = arith.constant 0 : i32
    %c0_i32_1 = arith.constant 0 : i32
    %c0_i32_2 = arith.constant 0 : i32
    return %c0_i32, %c0_i32_0, %c0_i32_1 : i32, i32, i32
  }
  func.func @transform_4(%arg0: i32) -> (i32, i32) {
    %c0_i32 = arith.constant 0 : i32
    %c0_i32_0 = arith.constant 0 : i32
    %c0_i32_1 = arith.constant 0 : i32
    return %c0_i32, %c0_i32_0 : i32, i32
  }
  func.func @transform_5(%arg0: i32) -> (i32, i32) {
    %c0_i32 = arith.constant 0 : i32
    %c0_i32_0 = arith.constant 0 : i32
    %c0_i32_1 = arith.constant 0 : i32
    return %c0_i32, %c0_i32_0 : i32, i32
  }
  func.func @transform_6(%arg0: i32) -> (i32, i32) {
    %c0_i32 = arith.constant 0 : i32
    %c0_i32_0 = arith.constant 0 : i32
    %c0_i32_1 = arith.constant 0 : i32
    return %c0_i32, %c0_i32_0 : i32, i32
  }
  func.func @transform_7(%arg0: i32) -> (i32, i32, i32) {
    %c0_i32 = arith.constant 0 : i32
    %c0_i32_0 = arith.constant 0 : i32
    %c0_i32_1 = arith.constant 0 : i32
    return %arg0, %c0_i32, %c0_i32_0 : i32, i32, i32
  }
}

</mosaic_0001>

<bundles_post_ra>
// kernel: base_net_forward.1
= control target key start
LH: loop header
LB: loop body
LE: loop exit
PB: predicated region body
PF: predicated region fallthrough
CT: control target
= control target key end

     0   :  { %12 = vsyncpa [#allocation5], 0  ;;  %s7429_s0 = inlined_call_operand.vmem [shape: bf16[2,256,8], index: 0, kind: input, shape index: {}]   ;;  %s7430_s1 = inlined_call_operand.vmem [shape: bf16[8,256], index: 1, kind: input, shape index: {}]   ;;  %s7431_s2 = inlined_call_operand.vmem [shape: f32[1,256], index: 2, kind: input, shape index: {}]   ;;  %s7432_s3 = inlined_call_operand.vmem [shape: bf16[3,384,128], index: 3, kind: input, shape index: {}]   ;;  %s7433_s4 = inlined_call_operand.vmem [shape: f32[1,128], index: 4, kind: input, shape index: {}]   ;;  %s7434_s5 = inlined_call_operand.vmem [shape: bf16[128,128], index: 5, kind: input, shape index: {}]   ;;  %s7435_s6 = inlined_call_operand.vmem [shape: f32[1,128], index: 6, kind: input, shape index: {}]   ;;  %s7436_s7 = inlined_call_operand.hbm [shape: f32[2,1,128], index: 7, kind: output, shape index: {}]  }
   0x1   :  { %14 = vsyncpa [#allocation5 + $0x1], 0  ;;  %s5483_s24 = smov 0   ;;  %s5485_s25 = smov 0  }
   0x2   :  { %s5487_s26 = smov 0   ;;  %s5489_s27 = smov 0  }
   0x3 LB: > { %s5504_s28 = sadd.s32 4294967295, %s5438_s27   ;;  %s4196_s29 = sadd.s32 4294967294, %s5438_s27   ;;  %s5438_s27 = sphi %s5489_s27, %s7663_s27   ;;  %s5434_s26 = sphi %s5487_s26, %s7662_s26   ;;  %s5430_s25 = sphi %s5485_s25, %s7661_s25   ;;  %s5426_s24 = sphi %s5483_s24, %s7660_s24  }
   0x4   : > { %s5508_s30 = sadd.s32 1, %s5438_s27   ;;  %s179_s8 = sadd.s32 1, %s5434_s26 }
   0x5   : > { %s176_s9 = ssub.s32 %s5438_s27, %s5508_s30  ;;  %p189_p0 = scmp.ne.s32.totalorder %s5434_s26, %s5430_s25 }
   0x6   : > { %p177_p1 = scmp.eq.s32.totalorder %s176_s9, 0  ;;  %p190_p2 = scmp.eq.s32.totalorder %s5504_s28, 1 }
   0x7   : > { %p195_p3 = scmp.ne.s32.totalorder %s5430_s25, %s5426_s24  ;;  %p196_p4 = scmp.eq.s32.totalorder %s4196_s29, 1 }
   0x8   : > { %s5519_s10 = scalar_select %p177_p1, %s5434_s26, %s179_s8  }
   0x9   : > { %p5521_p5 = por %p190_p2, %p189_p0  ;;  %p5525_p6 = por %p196_p4, %p195_p3 }
   0xa   : > { %p4199_p7 = scmp.ge.s32.totalorder %s5438_s27, 1  ;;  %p240_p8 = scmp.lt.s32.totalorder %s5438_s27, 3 }
   0xc   : > { %p241_p9 = pnand %p4199_p7, %p240_p8 }
   0xe   : > { %244 = sbr.rel (%p241_p9) target bundleno = 1085 (0x43d), region = 48 }
  0x15   : > { %v311_v0 = vld [vmem:[%s7430_s1] sm:$0xff]  ;;  %vm458_vm0 = vcmask 1043456   ;;  %p271_p10 = scmp.lt.s32.totalorder %s5504_s28, 1  ;;  %v7437_v4 = vmov 0   ;;  %vm409_vm1 = vcmask 64512   ;;  %v5299_v9 = vld [vmem:[%s7432_s3 + $0x108] sm:$0xff]   ;;  %v314_v46 = vlaneseq }
  0x16   : > { %v5296_v1 = vld [vmem:[%s7432_s3 + $0x140] sm:$0xff]   ;;  %v4219_v2 = vcombine.high %v311_v0, %v311_v0  ;;  %v4218_v3 = vcombine.low %v311_v0, %v311_v0  ;;  %497 = vmatprep.mubr.bf16.mxu0 %v7437_v4  ;;  %577 = vmatprep.mubr.bf16.mxu1 %v7437_v4  ;;  %v5300_v11 = vld [vmem:[%s7432_s3 + $0xc8] sm:$0xff]   ;;  %v5302_v17 = vld [vmem:[%s7432_s3 + $0x110] sm:$0xff]   ;;  %vm5441_vm4 = vmmov 1   ;;  %s269_s19 = sand.u32 1, %s5430_s25  }
  0x17   : > { %s272_s17 = scalar_select %p271_p10, %s5504_s28, 1  ;;  %v5297_v5 = vld [vmem:[%s7432_s3 + $0x100] sm:$0xff]   ;;  %v5301_v16 = vld [vmem:[%s7432_s3 + $0x148] sm:$0xff]   ;;  %v5303_v18 = vld [vmem:[%s7432_s3 + $0xd0] sm:$0xff]   ;;  %v5667_v47 = vshrl.u32 %v314_v46, 7 }
  0x18   : > { %4220 = vmatprep.subr.msk.bf16.mxu0 %vm458_vm0, %v4219_v2  ;;  %v460_v6 = vsel %vm458_vm0, %v4218_v3, 0  ;;  %5075 = vmatprep.subr.msk.bf16.mxu1 %vm458_vm0, %v4219_v2  ;;  %v5298_v8 = vld [vmem:[%s7432_s3 + $0xc0] sm:$0xff]   ;;  %v5304_v19 = vld [vmem:[%s7432_s3 + $0x118] sm:$0xff]   ;;  %v5306_v33 = vld [vmem:[%s7432_s3 + $0x150] sm:$0xff]   ;;  %s4129_s9 = scalar_lea.sflag [#allocation5], %s269_s19 }
  0x19   : > { %466 = vmatpush1.bf16.msra.mxu0 %v460_v6  ;;  %s4450_s20 = sshll.u32 %s272_s17, 7  ;;  %5076 = vmatpush1.bf16.msra.mxu1 %v460_v6  ;;  %v5305_v21 = vld [vmem:[%s7432_s3 + $0xd8] sm:$0xff]   ;;  %v5307_v31 = vld [vmem:[%s7432_s3 + $0x120] sm:$0xff]   ;;  %v5309_v34 = vld [vmem:[%s7432_s3 + $0x128] sm:$0xff]   ;;  %v740_v48 = vadd.s32 8, %v5667_v47  ;;  %v741_v49 = vadd.s32 16, %v5667_v47 }
  0x1a   : > { %s5547_s23 = scalar_lea.vmem %s7429_s0, %s4450_s20  ;;  %4883 = vmatprep.subr.bf16.mxu0 %v5296_v1  ;;  %4451 = vmatprep.subr.bf16.mxu1 %v5297_v5  ;;  %v5308_v32 = vld [vmem:[%s7432_s3 + $0xe0] sm:$0xff]   ;;  %v5310_v35 = vld [vmem:[%s7432_s3 + $0xe8] sm:$0xff]   ;;  %v5312_v36 = vld [vmem:[%s7432_s3 + $0x130] sm:$0xff]   ;;  %v742_v50 = vadd.s32 24, %v5667_v47  ;;  %v743_v52 = vadd.s32 32, %v5667_v47  ;;  %v775_v53 = vand.u32 15, %v5667_v47 }
  0x1b   : > { %v5280_v7 = vld [vmem:[%s5547_s23] sm:$0xff]   ;;  %v5281_v12 = vld [vmem:[%s5547_s23 + $0x8] sm:$0xff]   ;;  %v5282_v14 = vld [vmem:[%s5547_s23 + $0x10] sm:$0xff]   ;;  %v782_v51 = vand.u32 15, %v740_v48  ;;  %v744_v54 = vadd.s32 40, %v5667_v47  ;;  %v789_v55 = vand.u32 15, %v741_v49 }
  0x1c   : > { %4221 = vmatmul.mubr.msk.bf16.vlgmr.msra.gmra.mrb[0].mxu0 %vm409_vm1, %v5280_v7  ;;  %v5283_v10 = vld [vmem:[%s5547_s23 + $0x40] sm:$0xff]   ;;  %v5285_v13 = vld [vmem:[%s5547_s23 + $0x48] sm:$0xff]   ;;  %v5287_v15 = vld [vmem:[%s5547_s23 + $0x50] sm:$0xff]   ;;  %v745_v56 = vadd.s32 48, %v5667_v47  ;;  %v796_v57 = vand.u32 15, %v742_v50  ;;  %v746_v58 = vadd.s32 56, %v5667_v47 }
  0x1d   : > { %507 = vmatprep.mubr.bf16.mxu0 %v7437_v4  ;;  %4884 = vmatpush3.bf16.msra.mxu0 %v5296_v1  ;;  %v5284_v20 = vld [vmem:[%s5547_s23 + $0x18] sm:$0xff]   ;;  %v5286_v23 = vld [vmem:[%s5547_s23 + $0x20] sm:$0xff]   ;;  %v5288_v25 = vld [vmem:[%s5547_s23 + $0x28] sm:$0xff]   ;;  %vm5677_vm2 = vcmp.lt.s32.totalorder %v782_v51, 15  ;;  %v803_v60 = vand.u32 15, %v743_v52  ;;  %v755_v61 = vadd.s32 128, %v5667_v47 }
  0x1e   : > { %4229 = vmatmul.mubr.msk.bf16.vlgmr.msra.gmra.mrb[0].mxu1 %vm409_vm1, %v5283_v10  ;;  %4885 = vmatprep.subr.bf16.mxu0 %v5301_v16  ;;  %v5289_v22 = vld [vmem:[%s5547_s23 + $0x58] sm:$0xff]   ;;  %v5291_v24 = vld [vmem:[%s5547_s23 + $0x60] sm:$0xff]   ;;  %v5293_v26 = vld [vmem:[%s5547_s23 + $0x68] sm:$0xff]   ;;  %vm5685_vm3 = vcmp.gt.s32.totalorder %v775_v53, 0  ;;  %v810_v0 = vand.u32 15, %v744_v54  ;;  %v756_v1 = vadd.s32 136, %v5667_v47 }
  0x1f   : > { %587 = vmatprep.mubr.bf16.mxu1 %v7437_v4  ;;  %4452 = vmatpush3.bf16.msra.mxu1 %v5298_v8  ;;  %v5290_v27 = vld [vmem:[%s5547_s23 + $0x30] sm:$0xff]   ;;  %v5292_v29 = vld [vmem:[%s5547_s23 + $0x38] sm:$0xff]   ;;  %v5316_v41 = vld [vmem:[%s7432_s3 + $0x160] sm:$0xff]   ;;  %vm5694_vm6 = vcmp.gt.s32.totalorder %v789_v55, 0  ;;  %v817_v5 = vand.u32 15, %v745_v56  ;;  %v757_v6 = vadd.s32 144, %v5667_v47 }
  0x20   : > { %4453 = vmatprep.subr.bf16.mxu1 %v5299_v9  ;;  %v5294_v28 = vld [vmem:[%s5547_s23 + $0x70] sm:$0xff]   ;;  %v5295_v30 = vld [vmem:[%s5547_s23 + $0x78] sm:$0xff]   ;;  %v5317_v42 = vld [vmem:[%s7432_s3 + $0x168] sm:$0xff]   ;;  %vm5702_vm8 = vcmp.lt.s32.totalorder %v796_v57, 15  ;;  %v824_v8 = vand.u32 15, %v746_v58  ;;  %v747_v9 = vadd.s32 64, %v5667_v47 }
  0x21   : > { %4886 = vmatpush3.bf16.msra.mxu0 %v5301_v16  ;;  %v5313_v37 = vld [vmem:[%s7432_s3 + $0xf0] sm:$0xff]   ;;  %v5311_v38 = vld [vmem:[%s7432_s3 + $0x158] sm:$0xff]   ;;  %v5664_v45 = vld [vmem:[%s7432_s3 + $0x80] sm:$0xff]   ;;  %vm5710_vm10 = vcmp.gt.s32.totalorder %v803_v60, 0  ;;  %vm5718_vm12 = vcmp.lt.s32.totalorder %v810_v0, 15  ;;  %vm5726_vm14 = vcmp.gt.s32.totalorder %v817_v5, 0 }
  0x22   : > { %4887 = vmatprep.subr.bf16.mxu0 %v5306_v33  ;;  %v5314_v39 = vld [vmem:[%s7432_s3 + $0x138] sm:$0xff]   ;;  %v5318_v43 = vld [vmem:[%s7432_s3 + $0x170] sm:$0xff]   ;;  %v5328_v62 = vld [vmem:[%s7432_s3 + $0x40] sm:$0xff]   ;;  %vm5734_vm0 = vcmp.lt.s32.totalorder %v824_v8, 15  ;;  %v761_v48 = vadd.s32 176, %v5667_v47  ;;  %s4447_s23 = sshll.u32 %s5504_s28, 4 }
  0x23   : > { %4454 = vmatpush3.bf16.msra.mxu1 %v5300_v11  ;;  %v5315_v40 = vld [vmem:[%s7432_s3 + $0xf8] sm:$0xff]   ;;  %vm5690_vm5 = vmpackc.low %vm5441_vm4, %vm5441_vm4  ;;  %v748_v11 = vadd.s32 72, %v5667_v47  ;;  %v5333_v52 = vld [vmem:[%s7432_s3 + $0x8] sm:$0xff]   ;;  %s270_s20 = scalar_lea.vmem [#allocation4], %s269_s19  ;;  %s7387_s8 = scalar_lea.hbm %s7436_s7, %s4447_s23 }
  0x24   : > { %4222 = vmatmul.mubr.msk.bf16.gmra.mrb[4].mxu0 %vm409_vm1, %v5281_v12  ;;  %4455 = vmatprep.subr.bf16.mxu1 %v5302_v17  ;;  %v5319_v44 = vld [vmem:[%s7432_s3 + $0x178] sm:$0xff]   ;;  %vm1252_vm7 = vmpackc.low %vm5677_vm2, %vm5677_vm2  ;;  %v887_v12 = vand.u32 15, %v755_v61  ;;  %v901_v17 = vand.u32 15, %v757_v6  ;;  %v929_v63 = vand.u32 15, %v761_v48  ;;  %s4141_s21 = sshll.u32 %s270_s20, 4  ;;  %s5442_s28 = smov [#allocation4]   ;;  %s7389_s21 = int_to_ptr.vmem [resolvable:$true] %s4141_s21 }
  0x25   : > { %517 = vmatprep.mubr.bf16.mxu0 %v7437_v4  ;;  %4888 = vmatpush3.bf16.msra.mxu0 %v5306_v33  ;;  %vm1491_vm9 = vmpackc.low %vm5685_vm3, %vm5685_vm3  ;;  %s5376_s13 = scalar_lea.vmem %s7389_s21, 16  ;;  %s5380_s14 = sshll.u32 %s5442_s28, 4  ;;  %s5381_s14 = int_to_ptr.vmem [resolvable:$false] %s5380_s14 }
  0x26   : > { %4230 = vmatmul.mubr.msk.bf16.gmra.mrb[4].mxu1 %vm409_vm1, %v5285_v13  ;;  %4889 = vmatprep.subr.bf16.mxu0 %v5311_v38  ;;  %vm1493_vm11 = vmpackc.low %vm5694_vm6, %vm5694_vm6  ;;  %vm5743_vm4 = vcmp.gt.s32.totalorder %v887_v12, 0  ;;  %p5377_p11 = scmp.ne.s32.totalorder %s7389_s21, %s5376_s13  ;;  %s5382_s15 = scalar_lea.vmem %s5381_s14, 32 }
  0x27   : > { %597 = vmatprep.mubr.bf16.mxu1 %v7437_v4  ;;  %4456 = vmatpush3.bf16.msra.mxu1 %v5303_v18  ;;  %v759_v18 = vadd.s32 160, %v5667_v47  ;;  %vm1258_vm15 = vmpackc.low %vm5734_vm0, %vm5734_vm0  ;;  %p5383_p0 = scmp.lt.s32.totalorder %s7389_s21, %s5381_s14  ;;  %p5384_p1 = scmp.lt.s32.totalorder %s5382_s15, %s5376_s13 }
  0x28   : > { %4457 = vmatprep.subr.bf16.mxu1 %v5304_v19  ;;  %vm7504_vm6 = vmpackc.low %vm5702_vm8, %vm5702_vm8  ;;  %v5869_v54 = vsel %vm1258_vm15, 65537, %v7437_v4  ;;  %p5378_p12 = pnand %p5377_p11, %p5521_p5 }
  0x29   : > { %4890 = vmatpush3.bf16.msra.mxu0 %v5311_v38  ;;  %v320_v38 = vsub.s32 1, %v5667_v47  ;;  %v5830_v49 = vsel %vm7504_vm6, 65537, %v7437_v4  ;;  %vm7506_vm3 = vmpackc.low %vm5718_vm12, %vm5718_vm12  ;;  %p5385_p2 = por %p5384_p1, %p5383_p0 }
  0x2a   : > { %4891 = vmatprep.subr.bf16.mxu0 %v5316_v41  ;;  %v5846_v51 = vsel %vm7506_vm3, 65537, %v7437_v4  ;;  %p5379_p13 = pneg %p5378_p12 }
  0x2b   : > { %4458 = vmatpush3.bf16.msra.mxu1 %v5305_v21  ;;  %v749_v21 = vadd.s32 80, %v5667_v47 }
  0x2c   : > { %4223 = vmatmul.mubr.msk.bf16.gmra.mrb[8].mxu0 %vm409_vm1, %v5282_v14  ;;  %4459 = vmatprep.subr.bf16.mxu1 %v5307_v31  ;;  %v894_v14 = vand.u32 15, %v756_v1  ;;  %v1523_v31 = vsel %vm1491_vm9, 65537, %v7437_v4  ;;  %p5386_p3 = pnand %p5385_p2, %p5379_p13 }
  0x2d   : > { %527 = vmatprep.mubr.bf16.mxu0 %v7437_v4  ;;  %4892 = vmatpush3.bf16.msra.mxu0 %v5316_v41  ;;  %v845_v33 = vand.u32 15, %v749_v21  ;;  %v754_v41 = vadd.s32 120, %v5667_v47 }
  0x2e   : > { %4231 = vmatmul.mubr.msk.bf16.gmra.mrb[8].mxu1 %vm409_vm1, %v5287_v15  ;;  %4893 = vmatprep.subr.bf16.mxu0 %v5317_v42  ;;  %v758_v15 = vadd.s32 152, %v5667_v47  ;;  %vm5750_vm13 = vcmp.lt.s32.totalorder %v894_v14, 15 }
  0x2f   : > { %607 = vmatprep.mubr.bf16.mxu1 %v7437_v4  ;;  %4460 = vmatpush3.bf16.msra.mxu1 %v5308_v32  ;;  %vm5851_vm6 = vcmp.gt.s32.totalorder %v845_v33, 0  ;;  %v880_v19 = vand.u32 15, %v754_v41  ;;  %v5335_v41 = vld [vmem:[%s7432_s3 + $0x50] sm:$0xff]  }
  0x30   : > { %4461 = vmatprep.subr.bf16.mxu1 %v5309_v34  ;;  %v316_v34 = vsub.s32 0, %v5667_v47 }
  0x31   : > { %4894 = vmatpush3.bf16.msra.mxu0 %v5317_v42  ;;  %v312_v42 = vld [vmem:[%s7431_s2] sm:$0x3] }
  0x32   : > { %4895 = vmatprep.subr.bf16.mxu0 %v5318_v43  ;;  %v5878_v57 = vrot.slane %v312_v42, %v316_v34  ;;  %v5880_v58 = vrot.slane %v312_v42, %v320_v38 }
  0x33   : > { %4462 = vmatpush3.bf16.msra.mxu1 %v5310_v35 }
  0x34   : > { %4224 = vmatmul.mubr.msk.bf16.gmra.mrb[12].mxu0 %vm409_vm1, %v5284_v20  ;;  %4463 = vmatprep.subr.bf16.mxu1 %v5312_v36  ;;  %v831_v20 = vand.u32 15, %v747_v9 }
  0x35   : > { %537 = vmatprep.mubr.bf16.mxu0 %v7437_v4  ;;  %4896 = vmatpush3.bf16.msra.mxu0 %v5318_v43  ;;  %v5813_v43 = vsel %vm1493_vm11, 65537, %v7437_v4  ;;  %vm7505_vm11 = vmpackc.low %vm5710_vm10, %vm5710_vm10 }
  0x36   : > { %4232 = vmatmul.mubr.msk.bf16.gmra.mrb[12].mxu1 %vm409_vm1, %v5289_v22  ;;  %4897 = vmatprep.subr.bf16.mxu0 %v5319_v44  ;;  %v838_v22 = vand.u32 15, %v748_v11  ;;  %v5838_v50 = vsel %vm7505_vm11, 65537, %v7437_v4  ;;  %vm7509_vm10 = vmpackc.low %vm5726_vm14, %vm5726_vm14 }
  0x37   : > { %617 = vmatprep.mubr.bf16.mxu1 %v7437_v4  ;;  %4464 = vmatpush3.bf16.msra.mxu1 %v5313_v37  ;;  %v751_v37 = vadd.s32 96, %v5667_v47  ;;  %v5861_v53 = vsel %vm7509_vm10, 65537, %v7437_v4  ;;  %vm7512_vm11 = vmpackc.low %vm5743_vm4, %vm5743_vm4 }
  0x38   : > { %4465 = vmatprep.subr.bf16.mxu1 %v5314_v39  ;;  %v5909_v3 = vsel %vm7512_vm11, 65537, %v7437_v4 }
  0x39   : > { %4898 = vmatpush3.bf16.msra.mxu0 %v5319_v44  ;;  %v859_v56 = vand.u32 15, %v751_v37 }
  0x3a   : > { %4931 = vmatprep.subr.bf16.mxu0 %v5664_v45 }
  0x3b   : > { %4466 = vmatpush3.bf16.msra.mxu1 %v5315_v40  ;;  %v752_v40 = vadd.s32 104, %v5667_v47  ;;  %vm5927_vm3 = vcmp.gt.s32.totalorder %v859_v56, 0 }
  0x3c   : > { %4225 = vmatmul.mubr.msk.bf16.gmra.mrb[16].mxu0 %vm409_vm1, %v5286_v23  ;;  %4587 = vmatprep.subr.bf16.mxu1 %v5328_v62  ;;  %v750_v23 = vadd.s32 88, %v5667_v47 }
  0x3d   : > { %547 = vmatprep.mubr.bf16.mxu0 %v7437_v4  ;;  %v866_v59 = vand.u32 15, %v752_v40 }
  0x3e   : > { %4233 = vmatmul.mubr.msk.bf16.gmra.mrb[16].mxu1 %vm409_vm1, %v5291_v24  ;;  %v852_v36 = vand.u32 15, %v750_v23 }
  0x3f   : > { %627 = vmatprep.mubr.bf16.mxu1 %v7437_v4  ;;  %vm5955_vm11 = vcmp.lt.s32.totalorder %v866_v59, 15 }
  0x40   : > { %vm5871_vm12 = vcmp.lt.s32.totalorder %v852_v36, 15 }
  0x41   : > { %vm1262_vm0 = vmpackc.low %vm5871_vm12, %vm5871_vm12 }
  0x44   : > { %4226 = vmatmul.mubr.msk.bf16.gmra.mrb[20].mxu0 %vm409_vm1, %v5288_v25 }
  0x45   : > { %557 = vmatprep.mubr.bf16.mxu0 %v7437_v4 }
  0x46   : > { %4234 = vmatmul.mubr.msk.bf16.gmra.mrb[20].mxu1 %vm409_vm1, %v5293_v26  ;;  %v908_v26 = vand.u32 15, %v758_v15 }
  0x47   : > { %637 = vmatprep.mubr.bf16.mxu1 %v7437_v4 }
  0x48   : > { %vm5800_vm2 = vcmp.lt.s32.totalorder %v908_v26, 15 }
  0x4c   : > { %4227 = vmatmul.mubr.msk.bf16.gmra.mrb[24].mxu0 %vm409_vm1, %v5290_v27  ;;  %v5757_v27 = vsel %vm5690_vm5, 65537, %v7437_v4  ;;  %vm5778_vm5 = vcmp.gt.s32.totalorder %v831_v20, 0 }
  0x4d   : > { %567 = vmatprep.mubr.bf16.mxu0 %v7437_v4  ;;  %v4253_v44 = vcombine.low %v1523_v31, %v5757_v27  ;;  %v4254_v60 = vcombine.low %v5813_v43, %v5757_v27  ;;  %v4238_v61 = vcombine.low %v5757_v27, %v5830_v49  ;;  %v4255_v62 = vcombine.low %v5838_v50, %v5757_v27  ;;  %vm7517_vm12 = vmpackc.low %vm5778_vm5, %vm5778_vm5  ;;  %v5329_v50 = vld [vmem:[%s7432_s3] sm:$0xff]  }
  0x4e   : > { %4235 = vmatmul.mubr.msk.bf16.gmra.mrb[24].mxu1 %vm409_vm1, %v5294_v28  ;;  %v1284_v28 = vsel %vm1252_vm7, 65537, %v7437_v4  ;;  %vm5786_vm7 = vcmp.lt.s32.totalorder %v838_v22, 15  ;;  %v4239_v0 = vcombine.low %v5757_v27, %v5846_v51  ;;  %v4256_v1 = vcombine.low %v5861_v53, %v5757_v27  ;;  %vm7521_vm5 = vmpackc.low %vm5750_vm13, %vm5750_vm13 }
  0x4f   : > { %647 = vmatprep.mubr.bf16.mxu1 %v7437_v4  ;;  %v4237_v39 = vcombine.low %v5757_v27, %v1284_v28  ;;  %vm1260_vm8 = vmpackc.low %vm5786_vm7, %vm5786_vm7  ;;  %v4240_v2 = vcombine.low %v5757_v27, %v5869_v54  ;;  %vm5915_vm15 = vcmp.ne.s16.totalorder %v4253_v44, 0  ;;  %v5925_v7 = vsel %vm7517_vm12, 65537, %v7437_v4 }
  0x50   : > { %v5945_v10 = vsel %vm7521_vm5, 65537, %v7437_v4  ;;  %v5953_v11 = vsel %vm1260_vm8, 65537, %v7437_v4  ;;  %vm7524_vm13 = vmpackc.low %vm5800_vm2, %vm5800_vm2  ;;  %vm5987_vm7 = vcmp.gt.s32.totalorder %v929_v63, 0  ;;  %vm1779_vm8 = vcmask 1040384  }
  0x51   : > { %vm5911_vm10 = vcmp.ne.s16.totalorder %v4237_v39, 0  ;;  %v5973_v14 = vsel %vm7524_vm13, 65537, %v7437_v4  ;;  %vm1503_vm2 = vmpackc.low %vm5927_vm3, %vm5927_vm3  ;;  %vm6039_vm12 = vcmp.ne.s16.totalorder %v4238_v61, 0  ;;  %vm6102_vm5 = vcmp.lt.s32.totalorder %v880_v19, 15 }
  0x52   : > { %v6031_v48 = vsel %vm1503_vm2, 65537, %v7437_v4  ;;  %vm6120_vm13 = vcmp.ne.s16.totalorder %v4239_v0, 0 }
  0x54   : > { %4228 = vmatmul.mubr.msk.bf16.gmra.mrb[28].mxu0 %vm409_vm1, %v5292_v29 }
  0x56   : > { %4236 = vmatmul.mubr.msk.bf16.gmra.mrb[28].mxu1 %vm409_vm1, %v5295_v30  ;;  %vm5768_vm1 = vcmp.gt.s32.totalorder %v901_v17, 0  ;;  %v915_v30 = vand.u32 15, %v759_v18  ;;  %v5984_v17 = vsel %vm1262_vm0, 65537, %v7437_v4  ;;  %v753_v18 = vadd.s32 112, %v5667_v47 }
  0x57   : > { %vm7520_vm4 = vmpackc.low %vm5768_vm1, %vm5768_vm1  ;;  %vm6035_vm0 = vcmp.ne.s16.totalorder %v4254_v60, 0 }
  0x58   : > { %vm5819_vm9 = vcmp.gt.s32.totalorder %v915_v30, 0  ;;  %v5937_v9 = vsel %vm7520_vm4, 65537, %v7437_v4  ;;  %vm7525_vm1 = vmpackc.low %vm5851_vm6, %vm5851_vm6  ;;  %v873_v40 = vand.u32 15, %v753_v18  ;;  %v760_v18 = vadd.s32 168, %v5667_v47 }
  0x59   : > { %vm1511_vm14 = vmpackc.low %vm5819_vm9, %vm5819_vm9  ;;  %v5981_v16 = vsel %vm7525_vm1, 65537, %v7437_v4  ;;  %vm1635_vm9 = vsmask.f32 256 }
  0x5a   : > { %v5965_v13 = vsel %vm1511_vm14, 65537, %v7437_v4  ;;  %vm1264_vm6 = vmpackc.low %vm5955_vm11, %vm5955_vm11  ;;  %vm6066_vm3 = vcmp.gt.s32.totalorder %v873_v40, 0  ;;  %vm6113_vm11 = vcmp.ne.s16.totalorder %v4255_v62, 0 }
  0x5b   : > { %vm1513_vm14 = vmpackc.low %vm5987_vm7, %vm5987_vm7  ;;  %v6050_v63 = vsel %vm1264_vm6, 65537, %v7437_v4  ;;  %vm6203_vm6 = vcmp.ne.s16.totalorder %v4240_v2, 0  ;;  %v5338_v2 = vld [vmem:[%s7432_s3 + $0x58] sm:$0xff]  }
  0x5c   : > { %v6058_v60 = vsel %vm1513_vm14, 65537, %v7437_v4  ;;  %vm6097_vm4 = vmand %vm1779_vm8, %vm1635_vm9  ;;  %vm6196_vm8 = vcmp.ne.s16.totalorder %v4256_v1, 0 }
  0x5d   : > { %vm1266_vm7 = vmpackc.low %vm6102_vm5, %vm6102_vm5 }
  0xef   : > { %v499_v15 = vpop.f32.mrb[0].mxu0 }
  0xf0   : > { %v500_v20 = vadd.f32 %v499_v15, %v5878_v57  ;;  %v501_v21 = vpop.f32.mrb[1].mxu0 }
  0xf1   : > { %v502_v25 = vadd.f32 %v501_v21, %v5880_v58  ;;  %v503_v26 = vpop.f32.mrb[2].mxu0  ;;  %v579_v33 = vpop.f32.mrb[0].mxu1 }
  0xf2   : > { %v504_v31 = vadd.f32 %v503_v26, %v5878_v57  ;;  %v505_v32 = vpop.f32.mrb[3].mxu0  ;;  %v580_v38 = vadd.f32 %v579_v33, %v5878_v57  ;;  %v581_v39 = vpop.f32.mrb[1].mxu1  ;;  %v690_v42 = vmax.f32 %v500_v20, 0.0 }
  0xf3   : > { %v506_v37 = vadd.f32 %v505_v32, %v5880_v58  ;;  %v582_v44 = vadd.f32 %v581_v39, %v5880_v58  ;;  %v583_v46 = vpop.f32.mrb[2].mxu1 }
  0xf4   : > { %v691_v43 = vmax.f32 %v504_v31, 0.0  ;;  %v584_v56 = vadd.f32 %v583_v46, %v5878_v57  ;;  %v585_v59 = vpop.f32.mrb[3].mxu1  ;;  %v706_v8 = vmax.f32 %v580_v38, 0.0 }
  0xf5   : > { %v6033_v49 = vpack.c.bf16 %v506_v37, %v502_v25  ;;  %v586_v15 = vadd.f32 %v585_v59, %v5880_v58 }
  0xf6   : > { %v6060_v61 = vpack.c.bf16 %v691_v43, %v690_v42  ;;  %v707_v12 = vmax.f32 %v584_v56, 0.0 }
  0xf7   : > { %7528 = vst [vmem:[#allocation7_spill] sm:$0xff] %v6033_v49  ;;  %v509_v20 = vpop.f32.mrb[4].mxu0  ;;  %v6078_v37 = vpack.c.bf16 %v586_v15, %v582_v44  ;;  %v922_v44 = vand.u32 15, %v760_v18 }
  0xf8   : > { %v510_v26 = vadd.f32 %v509_v20, %v5878_v57  ;;  %v511_v31 = vpop.f32.mrb[5].mxu0  ;;  %2307 = vmatprep.mubr.bf16.mxu1 %v6060_v61  ;;  %v1379_v32 = vsel %vm5911_vm10, %v6060_v61, 0  ;;  %v1619_v33 = vsel %vm5915_vm15, %v6060_v61, 0  ;;  %vm1782_vm10 = vsmask.f32 7424  ;;  %vm1505_vm15 = vmpackc.low %vm6066_vm3, %vm6066_vm3 }
  0xf9   : > { %7535 = vst [vmem:[#allocation8_spill] sm:$0xff] %v6078_v37  ;;  %v512_v38 = vadd.f32 %v511_v31, %v5880_v58  ;;  %v513_v39 = vpop.f32.mrb[6].mxu0  ;;  %v1637_v40 = vshrl.u32 %v1379_v32, 16  ;;  %v1786_v46 = vshll.u32 %v1619_v33, 16  ;;  %v6086_v56 = vpack.c.bf16 %v707_v12, %v706_v8  ;;  %v589_v6 = vpop.f32.mrb[4].mxu1 }
  0xfa   : > { %v514_v43 = vadd.f32 %v513_v39, %v5878_v57  ;;  %v515_v5 = vpop.f32.mrb[7].mxu0  ;;  %v1640_v20 = vshll.u32 %v1379_v32, 16  ;;  %v590_v31 = vadd.f32 %v589_v6, %v5878_v57  ;;  %v591_v30 = vpop.f32.mrb[5].mxu1  ;;  %v692_v39 = vmax.f32 %v510_v26, 0.0 }
  0xfb   : > { %v516_v59 = vadd.f32 %v515_v5, %v5880_v58  ;;  %v6092_v15 = vrot.slane %v1637_v40, 7  ;;  %v592_v12 = vadd.f32 %v591_v30, %v5880_v58  ;;  %v593_v36 = vpop.f32.mrb[6].mxu1  ;;  %v1788_v51 = vrot.slane %v1786_v46, 1  ;;  %v5332_v5 = vld [vmem:[%s7432_s3 + $0x48] sm:$0xff]  }
  0xfc   : > { %v693_v42 = vmax.f32 %v514_v43, 0.0  ;;  %v594_v26 = vadd.f32 %v593_v36, %v5878_v57  ;;  %v595_v19 = vpop.f32.mrb[7].mxu1  ;;  %v6130_v36 = vsel %vm1505_vm15, 65537, %v7437_v4  ;;  %v708_v0 = vmax.f32 %v590_v31, 0.0  ;;  %v5339_v43 = vld [vmem:[%s7432_s3 + $0x18] sm:$0xff]  }
  0xfd   : > { %v6106_v40 = vpack.c.bf16 %v516_v59, %v512_v38  ;;  %v1642_v32 = vor.u32 %v1640_v20, %v6092_v15  ;;  %v596_v38 = vadd.f32 %v595_v19, %v5880_v58  ;;  %v1784_v59 = vshrl.u32 %v1619_v33, 16 }
  0xfe   : > { %v6135_v62 = vpack.c.bf16 %v693_v42, %v692_v39  ;;  %v709_v20 = vmax.f32 %v594_v26, 0.0  ;;  %vm6145_vm1 = vcmp.lt.s32.totalorder %v922_v44, 15  ;;  %v763_v19 = vadd.s32 192, %v5667_v47 }
  0xff   : > { %7540 = vst [vmem:[#allocation9_spill] sm:$0xff] %v6106_v40  ;;  %v519_v6 = vpop.f32.mrb[8].mxu0  ;;  %v6143_v25 = vsel %vm6097_vm4, 0, %v1642_v32  ;;  %v6159_v33 = vpack.c.bf16 %v596_v38, %v592_v12  ;;  %v1789_v12 = vor.u32 %v1788_v51, %v1784_v59  ;;  %vm1272_vm2 = vmpackc.low %vm6145_vm1, %vm6145_vm1 }
 0x100   : > { %v520_v42 = vadd.f32 %v519_v6, %v5878_v57  ;;  %v521_v46 = vpop.f32.mrb[9].mxu0  ;;  %2308 = vmatmul.mubr.bf16.vlgmr.msra.gmra.mrb[32].mxu1 %v6143_v25  ;;  %v6154_v31 = vsel %vm6035_vm0, %v6135_v62, 0  ;;  %v1380_v39 = vsel %vm6039_vm12, %v6135_v62, 0  ;;  %v6169_v23 = vpack.c.bf16 %v709_v20, %v708_v0 }
 0x101   : > { %7547 = vst [vmem:[#allocation10_spill] sm:$0xff] %v6159_v33  ;;  %v522_v44 = vadd.f32 %v521_v46, %v5880_v58  ;;  %v523_v8 = vpop.f32.mrb[10].mxu0  ;;  %2315 = vmatprep.mubr.bf16.mxu1 %v6135_v62  ;;  %v1791_v32 = vshll.u32 %v6154_v31, 16  ;;  %v1644_v26 = vshrl.u32 %v1380_v39, 16  ;;  %4588 = vmatpush3.bf16.msra.mxu1 %v5329_v50  ;;  %v1647_v38 = vshll.u32 %v1380_v39, 16  ;;  %v599_v46 = vpop.f32.mrb[8].mxu1 }
 0x102   : > { %v524_v55 = vadd.f32 %v523_v8, %v5878_v57  ;;  %v525_v6 = vpop.f32.mrb[11].mxu0  ;;  %4589 = vmatprep.subr.bf16.mxu1 %v5332_v5  ;;  %v600_v35 = vadd.f32 %v599_v46, %v5878_v57  ;;  %v601_v34 = vpop.f32.mrb[9].mxu1  ;;  %v694_v51 = vmax.f32 %v520_v42, 0.0 }
 0x103   : > { %v526_v21 = vadd.f32 %v525_v6, %v5880_v58  ;;  %v1793_v50 = vrot.slane %v1791_v32, 1  ;;  %v6175_v22 = vrot.slane %v1644_v26, 7  ;;  %v602_v5 = vadd.f32 %v601_v34, %v5880_v58  ;;  %v603_v59 = vpop.f32.mrb[10].mxu1  ;;  %v5337_v26 = vld [vmem:[%s7432_s3 + $0x10] sm:$0xff]  }
 0x104   : > { %v695_v0 = vmax.f32 %v524_v55, 0.0  ;;  %v710_v53 = vmax.f32 %v600_v35, 0.0  ;;  %v604_v1 = vadd.f32 %v603_v59, %v5878_v57  ;;  %v6229_v35 = vsel %vm1266_vm7, 65537, %v7437_v4  ;;  %v5347_v59 = vld [vmem:[%s7432_s3 + $0x70] sm:$0xff]  }
 0x105   : > { %v6187_v39 = vpack.c.bf16 %v526_v21, %v522_v44  ;;  %v6190_v8 = vsel %vm1782_vm10, %v1789_v12, %v1793_v50  ;;  %v1649_v32 = vor.u32 %v1647_v38, %v6175_v22  ;;  %v605_v21 = vpop.f32.mrb[11].mxu1  ;;  %v943_v44 = vand.u32 15, %v763_v19  ;;  %4590 = vmatpush3.bf16.msra.mxu1 %v5333_v52 }
 0x106   : > { %v6210_v55 = vpack.c.bf16 %v695_v0, %v694_v51  ;;  %4899 = vmatprep.mubr.bf16.mxu0 %v6190_v8  ;;  %v606_v54 = vadd.f32 %v605_v21, %v5880_v58  ;;  %4591 = vmatprep.subr.bf16.mxu1 %v5335_v41  ;;  %v1795_v19 = vshrl.u32 %v6154_v31, 16  ;;  %v6237_v41 = vsel %vm1272_vm2, 65537, %v7437_v4 }
 0x107   : > { %7548 = vst [vmem:[#allocation11_spill] sm:$0xff] %v6187_v39  ;;  %v529_v52 = vpop.f32.mrb[12].mxu0  ;;  %v6221_v6 = vsel %vm1635_vm9, %v6092_v15, %v1649_v32  ;;  %v711_v38 = vmax.f32 %v604_v1, 0.0  ;;  %vm6252_vm14 = vcmp.gt.s32.totalorder %v943_v44, 0  ;;  %v5341_v44 = vld [vmem:[%s7432_s3 + $0x60] sm:$0xff]  }
 0x108   : > { %7553 = vst [vmem:[#allocation12_spill] sm:$0xff] %v6210_v55  ;;  %7554 = vst [vmem:[#allocation13_spill] sm:$0xff] %v6221_v6  ;;  %v530_v31 = vadd.f32 %v529_v52, %v5878_v57  ;;  %v531_v15 = vpop.f32.mrb[13].mxu0  ;;  %2316 = vmatmul.mubr.bf16.gmra.mrb[36].mxu1 %v6221_v6  ;;  %v6244_v18 = vsel %vm6113_vm11, %v6210_v55, 0  ;;  %v1381_v12 = vsel %vm6120_vm13, %v6210_v55, 0  ;;  %v1797_v30 = vor.u32 %v1795_v19, %v1793_v50 }
 0x109   : > { %v532_v24 = vadd.f32 %v531_v15, %v5880_v58  ;;  %v533_v46 = vpop.f32.mrb[14].mxu0  ;;  %2323 = vmatprep.mubr.bf16.mxu1 %v6210_v55  ;;  %v1799_v51 = vshll.u32 %v6244_v18, 16  ;;  %v1652_v0 = vshrl.u32 %v1381_v12, 16  ;;  %4592 = vmatpush3.bf16.msra.mxu1 %v5337_v26  ;;  %v1655_v1 = vshll.u32 %v1381_v12, 16  ;;  %v609_v15 = vpop.f32.mrb[12].mxu1  ;;  %vm1515_vm3 = vmpackc.low %vm6252_vm14, %vm6252_vm14 }
 0x10a   : > { %v534_v32 = vadd.f32 %v533_v46, %v5878_v57  ;;  %v535_v21 = vpop.f32.mrb[15].mxu0  ;;  %v6260_v52 = vpack.c.bf16 %v711_v38, %v710_v53  ;;  %4593 = vmatprep.subr.bf16.mxu1 %v5338_v2  ;;  %v6268_v29 = vpack.c.bf16 %v606_v54, %v602_v5  ;;  %v611_v50 = vpop.f32.mrb[13].mxu1  ;;  %v696_v19 = vmax.f32 %v530_v31, 0.0  ;;  %v5321_v2 = vld [vmem:[%s7432_s3 + $0x88] sm:$0xff]  }
 0x10b   : > { %v536_v20 = vadd.f32 %v535_v21, %v5880_v58  ;;  %v1801_v26 = vrot.slane %v1799_v51, 1  ;;  %v6266_v4 = vrot.slane %v1652_v0, 7  ;;  %v610_v12 = vadd.f32 %v609_v15, %v5878_v57  ;;  %v613_v38 = vpop.f32.mrb[14].mxu1 }
 0x10c   : > { %7557 = vst [vmem:[#allocation14_spill] sm:$0xff] %v6268_v29  ;;  %v697_v46 = vmax.f32 %v534_v32, 0.0  ;;  %v612_v53 = vadd.f32 %v611_v50, %v5880_v58  ;;  %v7559_v54 = vcombine.low %v5925_v7, %v5757_v27  ;;  %v7562_v0 = vcombine.low %v5757_v27, %v5953_v11  ;;  %v5343_v7 = vld [vmem:[%s7432_s3 + $0x20] sm:$0xff]   ;;  %v5351_v32 = vld [vmem:[%s7432_s3 + $0x38] sm:$0xff]  }
 0x10d   : > { %v6275_v28 = vpack.c.bf16 %v536_v20, %v532_v24  ;;  %v6278_v51 = vsel %vm1782_vm10, %v1797_v30, %v1801_v26  ;;  %v1657_v5 = vor.u32 %v1655_v1, %v6266_v4  ;;  %v615_v20 = vpop.f32.mrb[15].mxu1  ;;  %4594 = vmatpush3.bf16.msra.mxu1 %v5339_v43  ;;  %v712_v21 = vmax.f32 %v610_v12, 0.0  ;;  %v5344_v43 = vld [vmem:[%s7432_s3 + $0x68] sm:$0xff]  }
 0x10e   : > { %vm6284_vm0 = vcmp.ne.s16.totalorder %v7559_v54, 0  ;;  %vm6291_vm12 = vcmp.ne.s16.totalorder %v7562_v0, 0  ;;  %v6300_v30 = vpack.c.bf16 %v697_v46, %v696_v19  ;;  %4900 = vmatmul.mubr.bf16.vlgmr.msra.gmra.mrb[32].mxu0 %v6278_v51  ;;  %v614_v11 = vadd.f32 %v613_v38, %v5878_v57  ;;  %4595 = vmatprep.subr.bf16.mxu1 %v5341_v44 }
 0x10f   : > { %7558 = vst [vmem:[#allocation15_spill] sm:$0xff] %v6275_v28  ;;  %v616_v1 = vadd.f32 %v615_v20, %v5880_v58  ;;  %v539_v15 = vpop.f32.mrb[16].mxu0  ;;  %v6313_v50 = vsel %vm1635_vm9, %v6175_v22, %v1657_v5  ;;  %v1803_v19 = vshrl.u32 %v6244_v18, 16  ;;  %4932 = vmatpush3.bf16.msra.mxu0 %v5664_v45  ;;  %v6320_v12 = vadd.s32 184, %v5667_v47  ;;  %v5322_v5 = vld [vmem:[%s7432_s3 + $0x90] sm:$0xff]  }
 0x110   : > { %7565 = vst [vmem:[#allocation16_spill] sm:$0xff] %v6300_v30  ;;  %7566 = vst [vmem:[#allocation17_spill] sm:$0xff] %v6313_v50  ;;  %v540_v44 = vadd.f32 %v539_v15, %v5878_v57  ;;  %v541_v38 = vpop.f32.mrb[17].mxu0  ;;  %2324 = vmatmul.mubr.bf16.gmra.mrb[40].mxu1 %v6313_v50  ;;  %v6327_v22 = vsel %vm6196_vm8, %v6300_v30, 0  ;;  %v1382_v45 = vsel %vm6203_vm6, %v6300_v30, 0  ;;  %v713_v18 = vmax.f32 %v614_v11, 0.0  ;;  %4933 = vmatprep.subr.bf16.mxu0 %v5321_v2 }
 0x111   : > { %v542_v54 = vadd.f32 %v541_v38, %v5880_v58  ;;  %v543_v0 = vpop.f32.mrb[18].mxu0  ;;  %2331 = vmatprep.mubr.bf16.mxu1 %v6300_v30  ;;  %v1807_v20 = vshll.u32 %v6327_v22, 16  ;;  %v1660_v34 = vshrl.u32 %v1382_v45, 16  ;;  %v7567_v15 = vmov 0   ;;  %4596 = vmatpush3.bf16.msra.mxu1 %v5343_v7  ;;  %v5345_v11 = vld [vmem:[%s7432_s3 + $0x28] sm:$0xff]   ;;  %v619_v33 = vpop.f32.mrb[16].mxu1 }
 0x112   : > { %v6344_v42 = vsel %vm1515_vm3, 65537, %v7567_v15  ;;  %v544_v38 = vadd.f32 %v543_v0, %v5878_v57  ;;  %v545_v46 = vpop.f32.mrb[19].mxu0  ;;  %v1805_v24 = vor.u32 %v1803_v19, %v1801_v26  ;;  %v1663_v29 = vshll.u32 %v1382_v45, 16  ;;  %4597 = vmatprep.subr.bf16.mxu1 %v5344_v43  ;;  %v621_v40 = vpop.f32.mrb[17].mxu1  ;;  %v5323_v45 = vld [vmem:[%s7432_s3 + $0x98] sm:$0xff]  }
 0x113   : > { %v6350_v37 = vpack.c.bf16 %v713_v18, %v712_v21  ;;  %v546_v39 = vadd.f32 %v545_v46, %v5880_v58  ;;  %v1809_v7 = vrot.slane %v1807_v20, 1  ;;  %v6356_v28 = vrot.slane %v1660_v34, 7  ;;  %4934 = vmatpush3.bf16.msra.mxu0 %v5321_v2  ;;  %v623_v43 = vpop.f32.mrb[18].mxu1 }
 0x114   : > { %v6358_v49 = vpack.c.bf16 %v616_v1, %v612_v53  ;;  %v698_v0 = vmax.f32 %v540_v44, 0.0  ;;  %v699_v26 = vmax.f32 %v544_v38, 0.0  ;;  %v620_v21 = vadd.f32 %v619_v33, %v5878_v57  ;;  %4935 = vmatprep.subr.bf16.mxu0 %v5322_v5 }
 0x115   : > { %v622_v19 = vadd.f32 %v621_v40, %v5880_v58  ;;  %v6365_v46 = vpack.c.bf16 %v546_v39, %v542_v54  ;;  %v6368_v18 = vsel %vm1782_vm10, %v1805_v24, %v1809_v7  ;;  %v1665_v53 = vor.u32 %v1663_v29, %v6356_v28  ;;  %v625_v39 = vpop.f32.mrb[19].mxu1  ;;  %4598 = vmatpush3.bf16.msra.mxu1 %v5345_v11  ;;  %v5349_v29 = vld [vmem:[%s7432_s3 + $0x30] sm:$0xff]   ;;  %v5350_v11 = vld [vmem:[%s7432_s3 + $0x78] sm:$0xff]  }
 0x116   : > { %7568 = vst [vmem:[#allocation18_spill] sm:$0xff] %v6358_v49  ;;  %v7570_v2 = vcombine.low %v5981_v16, %v5757_v27  ;;  %v7573_v40 = vcombine.low %v5757_v27, %v5984_v17  ;;  %v6389_v16 = vpack.c.bf16 %v699_v26, %v698_v0  ;;  %4903 = vmatprep.mubr.bf16.mxu0 %v6368_v18  ;;  %v714_v44 = vmax.f32 %v620_v21, 0.0 }
 0x117   : > { %7569 = vst [vmem:[#allocation19_spill] sm:$0xff] %v6365_v46  ;;  %v624_v54 = vadd.f32 %v623_v43, %v5878_v57  ;;  %v626_v17 = vadd.f32 %v625_v39, %v5880_v58  ;;  %v7577_v20 = vcombine.low %v5909_v3, %v5757_v27  ;;  %4599 = vmatprep.subr.bf16.mxu1 %v5347_v59  ;;  %v549_v38 = vpop.f32.mrb[20].mxu0  ;;  %v1811_v26 = vshrl.u32 %v6327_v22, 16 }
 0x118   : > { %vm6374_vm15 = vcmp.ne.s16.totalorder %v7570_v2, 0  ;;  %vm6381_vm4 = vcmp.ne.s16.totalorder %v7573_v40, 0  ;;  %7576 = vst [vmem:[#allocation20_spill] sm:$0xff] %v6389_v16  ;;  %v6406_v0 = vsel %vm1635_vm9, %v6266_v4, %v1665_v53  ;;  %4936 = vmatpush3.bf16.msra.mxu0 %v5322_v5  ;;  %v6412_v21 = vadd.s32 200, %v5667_v47  ;;  %v551_v43 = vpop.f32.mrb[21].mxu0  ;;  %v5324_v5 = vld [vmem:[%s7432_s3 + $0xa0] sm:$0xff]  }
 0x119   : > { %vm6397_vm5 = vcmp.ne.s16.totalorder %v7577_v20, 0  ;;  %7580 = vst [vmem:[#allocation21_spill] sm:$0xff] %v6406_v0  ;;  %v550_v59 = vadd.f32 %v549_v38, %v5878_v57  ;;  %2332 = vmatmul.mubr.bf16.gmra.mrb[44].mxu1 %v6406_v0  ;;  %v6419_v2 = vsel %vm6284_vm0, %v6389_v16, 0  ;;  %v1383_v4 = vsel %vm6291_vm12, %v6389_v16, 0  ;;  %4937 = vmatprep.subr.bf16.mxu0 %v5323_v45  ;;  %v553_v40 = vpop.f32.mrb[22].mxu0  ;;  %v629_v49 = vpop.f32.mrb[20].mxu1 }
 0x11a   : > { %v715_v22 = vmax.f32 %v624_v54, 0.0  ;;  %v552_v53 = vadd.f32 %v551_v43, %v5880_v58  ;;  %2339 = vmatprep.mubr.bf16.mxu1 %v6389_v16  ;;  %v1815_v39 = vshll.u32 %v6419_v2, 16  ;;  %v1668_v31 = vshrl.u32 %v1383_v4, 16  ;;  %4600 = vmatpush3.bf16.msra.mxu1 %v5349_v29  ;;  %v555_v38 = vpop.f32.mrb[23].mxu0  ;;  %v631_v29 = vpop.f32.mrb[21].mxu1 }
 0x11b   : > { %v6431_v20 = vadd.s32 208, %v5667_v47  ;;  %v554_v54 = vadd.f32 %v553_v40, %v5878_v57  ;;  %v1813_v3 = vor.u32 %v1811_v26, %v1809_v7  ;;  %v1671_v24 = vshll.u32 %v1383_v4, 16  ;;  %4601 = vmatprep.subr.bf16.mxu1 %v5350_v11  ;;  %v633_v26 = vpop.f32.mrb[22].mxu1 }
 0x11c   : > { %v6437_v43 = vpack.c.bf16 %v715_v22, %v714_v44  ;;  %v556_v46 = vadd.f32 %v555_v38, %v5880_v58  ;;  %v1817_v16 = vrot.slane %v1815_v39, 1  ;;  %v6440_v0 = vrot.slane %v1668_v31, 7  ;;  %4938 = vmatpush3.bf16.msra.mxu0 %v5323_v45  ;;  %v5325_v44 = vld [vmem:[%s7432_s3 + $0xa8] sm:$0xff]  }
 0x11d   : > { %v6442_v30 = vpack.c.bf16 %v626_v17, %v622_v19  ;;  %v700_v50 = vmax.f32 %v550_v59, 0.0  ;;  %v701_v55 = vmax.f32 %v554_v54, 0.0  ;;  %v630_v40 = vadd.f32 %v629_v49, %v5878_v57  ;;  %4939 = vmatprep.subr.bf16.mxu0 %v5324_v5 }
 0x11e   : > { %v632_v7 = vadd.f32 %v631_v29, %v5880_v58  ;;  %v6449_v11 = vpack.c.bf16 %v556_v46, %v552_v53  ;;  %v6452_v4 = vsel %vm1782_vm10, %v1813_v3, %v1817_v16  ;;  %v1673_v19 = vor.u32 %v1671_v24, %v6440_v0  ;;  %v635_v46 = vpop.f32.mrb[23].mxu1  ;;  %4602 = vmatpush3.bf16.msra.mxu1 %v5351_v32 }
 0x11f   : > { %7581 = vst [vmem:[#allocation22_spill] sm:$0xff] %v6442_v30  ;;  %v7583_v45 = vcombine.low %v6031_v48, %v5757_v27  ;;  %v7586_v17 = vcombine.low %v5757_v27, %v6050_v63  ;;  %v957_v3 = vand.u32 15, %v6431_v20  ;;  %v6470_v22 = vpack.c.bf16 %v701_v55, %v700_v50  ;;  %4904 = vmatmul.mubr.bf16.gmra.mrb[36].mxu0 %v6452_v4  ;;  %v559_v31 = vpop.f32.mrb[24].mxu0 }
 0x120   : > { %7582 = vst [vmem:[#allocation23_spill] sm:$0xff] %v6449_v11  ;;  %v716_v48 = vmax.f32 %v630_v40, 0.0  ;;  %v634_v24 = vadd.f32 %v633_v26, %v5878_v57  ;;  %v636_v53 = vadd.f32 %v635_v46, %v5880_v58  ;;  %v7590_v63 = vcombine.low %v5937_v9, %v5757_v27  ;;  %4940 = vmatpush3.bf16.msra.mxu0 %v5324_v5  ;;  %v561_v54 = vpop.f32.mrb[25].mxu0  ;;  %v5326_v5 = vld [vmem:[%s7432_s3 + $0xb0] sm:$0xff]  }
 0x121   : > { %vm6458_vm11 = vcmp.ne.s16.totalorder %v7583_v45, 0  ;;  %vm6465_vm13 = vcmp.ne.s16.totalorder %v7586_v17, 0  ;;  %7589 = vst [vmem:[#allocation24_spill] sm:$0xff] %v6470_v22  ;;  %v6484_v20 = vsel %vm1635_vm9, %v6356_v28, %v1673_v19  ;;  %v1819_v55 = vshrl.u32 %v6419_v2, 16  ;;  %4941 = vmatprep.subr.bf16.mxu0 %v5325_v44  ;;  %v563_v40 = vpop.f32.mrb[26].mxu0 }
 0x122   : > { %vm6478_vm1 = vcmp.ne.s16.totalorder %v7590_v63, 0  ;;  %7593 = vst [vmem:[#allocation25_spill] sm:$0xff] %v6484_v20  ;;  %v6488_v50 = vadd.s32 224, %v5667_v47  ;;  %v6491_v32 = vadd.s32 240, %v5667_v47  ;;  %v560_v9 = vadd.f32 %v559_v31, %v5878_v57  ;;  %2340 = vmatmul.mubr.bf16.gmra.mrb[48].mxu1 %v6484_v20  ;;  %v565_v45 = vpop.f32.mrb[27].mxu0  ;;  %v639_v63 = vpop.f32.mrb[24].mxu1 }
 0x123   : > { %v6498_v38 = vsel %vm6374_vm15, %v6470_v22, 0  ;;  %v1384_v28 = vsel %vm6381_vm4, %v6470_v22, 0  ;;  %v717_v2 = vmax.f32 %v634_v24, 0.0  ;;  %v562_v29 = vadd.f32 %v561_v54, %v5880_v58  ;;  %2347 = vmatprep.mubr.bf16.mxu1 %v6470_v22  ;;  %v641_v22 = vpop.f32.mrb[25].mxu1 }
 0x124   : > { %v1823_v26 = vshll.u32 %v6498_v38, 16  ;;  %v1676_v33 = vshrl.u32 %v1384_v28, 16  ;;  %v6512_v19 = vsel %vm6397_vm5, %v6086_v56, 0  ;;  %v564_v1 = vadd.f32 %v563_v40, %v5878_v57  ;;  %4942 = vmatpush3.bf16.msra.mxu0 %v5325_v44 }
 0x125   : > { %v1821_v17 = vor.u32 %v1819_v55, %v1817_v16  ;;  %v1679_v46 = vshll.u32 %v1384_v28, 16  ;;  %v6515_v24 = vpack.c.bf16 %v717_v2, %v716_v48  ;;  %v566_v31 = vadd.f32 %v565_v45, %v5880_v58  ;;  %v643_v16 = vpop.f32.mrb[26].mxu1  ;;  %4943 = vmatprep.subr.bf16.mxu0 %v5326_v5  ;;  %v5327_v55 = vld [vmem:[%s7432_s3 + $0xb8] sm:$0xff]  }
 0x126   : > { %v1825_v54 = vrot.slane %v1823_v26, 1  ;;  %v6518_v30 = vrot.slane %v1676_v33, 7  ;;  %v6520_v11 = vpack.c.bf16 %v636_v53, %v632_v7  ;;  %v702_v34 = vmax.f32 %v560_v9, 0.0  ;;  %v645_v2 = vpop.f32.mrb[27].mxu1 }
 0x127   : > { %v703_v20 = vmax.f32 %v564_v1, 0.0  ;;  %v640_v6 = vadd.f32 %v639_v63, %v5878_v57  ;;  %v642_v40 = vadd.f32 %v641_v22, %v5880_v58  ;;  %vm6524_vm7 = vcmp.gt.s32.totalorder %v957_v3, 0 }
 0x128   : > { %7594 = vst [vmem:[#allocation26_spill] sm:$0xff] %v6520_v11  ;;  %v6531_v7 = vpack.c.bf16 %v566_v31, %v562_v29  ;;  %v6534_v44 = vsel %vm1782_vm10, %v1821_v17, %v1825_v54  ;;  %v1681_v53 = vor.u32 %v1679_v46, %v6518_v30  ;;  %v7598_v22 = vcombine.low %v6130_v36, %v5757_v27  ;;  %v569_v17 = vpop.f32.mrb[28].mxu0  ;;  %vm1517_vm3 = vmpackc.low %vm6524_vm7, %vm6524_vm7 }
 0x129   : > { %v7601_v9 = vcombine.low %v5757_v27, %v6229_v35  ;;  %v6552_v26 = vpack.c.bf16 %v703_v20, %v702_v34  ;;  %4907 = vmatprep.mubr.bf16.mxu0 %v6534_v44  ;;  %v718_v33 = vmax.f32 %v640_v6, 0.0  ;;  %v644_v36 = vadd.f32 %v643_v16, %v5878_v57  ;;  %4944 = vmatpush3.bf16.msra.mxu0 %v5326_v5  ;;  %v571_v16 = vpop.f32.mrb[29].mxu0  ;;  %v5330_v5 = vld [vmem:[%s7432_s3 + $0x1c0] sm:$0xff]  }
 0x12a   : > { %7597 = vst [vmem:[#allocation27_spill] sm:$0xff] %v6531_v7  ;;  %vm6540_vm2 = vcmp.ne.s16.totalorder %v7598_v22, 0  ;;  %v646_v1 = vadd.f32 %v645_v2, %v5880_v58  ;;  %v7605_v45 = vcombine.low %v5757_v27, %v5945_v10  ;;  %v6566_v46 = vsel %vm1635_vm9, %v6440_v0, %v1681_v53  ;;  %4945 = vmatprep.subr.bf16.mxu0 %v5327_v55  ;;  %v573_v22 = vpop.f32.mrb[30].mxu0  ;;  %v649_v10 = vpop.f32.mrb[28].mxu1 }
 0x12b   : > { %vm6547_vm8 = vcmp.ne.s16.totalorder %v7601_v9, 0  ;;  %7604 = vst [vmem:[#allocation28_spill] sm:$0xff] %v6552_v26  ;;  %v1827_v20 = vshrl.u32 %v6498_v38, 16  ;;  %v1847_v6 = vshll.u32 %v6512_v19, 16  ;;  %v7608_v63 = vcombine.low %v5965_v13, %v5757_v27  ;;  %2348 = vmatmul.mubr.bf16.gmra.mrb[52].mxu1 %v6566_v46 }
 0x12c   : > { %vm6560_vm6 = vcmp.ne.s16.totalorder %v7605_v45, 0  ;;  %v570_v34 = vadd.f32 %v569_v17, %v5878_v57  ;;  %v1625_v0 = vsel %vm6458_vm11, %v6552_v26, 0  ;;  %v1385_v13 = vsel %vm6465_vm13, %v6552_v26, 0  ;;  %2355 = vmatprep.mubr.bf16.mxu1 %v6552_v26 }
 0x12d   : > { %vm6573_vm14 = vcmp.ne.s16.totalorder %v7608_v63, 0  ;;  %v719_v38 = vmax.f32 %v644_v36, 0.0  ;;  %v572_v53 = vadd.f32 %v571_v16, %v5880_v58  ;;  %v1831_v9 = vshll.u32 %v1625_v0, 16  ;;  %v575_v36 = vpop.f32.mrb[31].mxu0  ;;  %4946 = vmatpush3.bf16.msra.mxu0 %v5327_v55 }
 0x12e   : > { %v1684_v2 = vshrl.u32 %v1385_v13, 16  ;;  %v6594_v49 = vsel %vm6478_vm1, %v6169_v23, 0  ;;  %v574_v59 = vadd.f32 %v573_v22, %v5878_v57  ;;  %v1829_v45 = vor.u32 %v1827_v20, %v1825_v54  ;;  %v651_v22 = vpop.f32.mrb[29].mxu1  ;;  %4723 = vmatprep.subr.bf16.mxu0 %v5330_v5 }
 0x12f   : > { %v1687_v17 = vshll.u32 %v1385_v13, 16  ;;  %v6597_v63 = vpack.c.bf16 %v719_v38, %v718_v33  ;;  %v7611_v16 = vcombine.low %v6058_v60, %v5757_v27  ;;  %v576_v11 = vadd.f32 %v575_v36, %v5880_v58  ;;  %v653_v38 = vpop.f32.mrb[30].mxu1 }
 0x130   : > { %v1833_v39 = vrot.slane %v1831_v9, 1  ;;  %v1686_v7 = vrot.slane %v1684_v2, 7  ;;  %v6607_v26 = vpack.c.bf16 %v646_v1, %v642_v40  ;;  %v704_v54 = vmax.f32 %v570_v34, 0.0  ;;  %v655_v40 = vpop.f32.mrb[31].mxu1 }
 0x131   : > { %vm6602_vm0 = vcmp.ne.s16.totalorder %v7611_v16, 0  ;;  %v705_v20 = vmax.f32 %v574_v59, 0.0  ;;  %v650_v33 = vadd.f32 %v649_v10, %v5878_v57  ;;  %v652_v13 = vadd.f32 %v651_v22, %v5880_v58 }
 0x132   : > { %v6611_v60 = vpack.c.bf16 %v576_v11, %v572_v53  ;;  %v6614_v16 = vsel %vm1782_vm10, %v1829_v45, %v1833_v39  ;;  %v1689_v36 = vor.u32 %v1687_v17, %v1686_v7  ;;  %v1851_v9 = vshrl.u32 %v6512_v19, 16 }
 0x133   : > { %v7614_v55 = vcombine.low %v5757_v27, %v5973_v14  ;;  %v6624_v10 = vpack.c.bf16 %v705_v20, %v704_v54  ;;  %4908 = vmatmul.mubr.bf16.gmra.mrb[40].mxu0 %v6614_v16  ;;  %v720_v11 = vmax.f32 %v650_v33, 0.0  ;;  %v654_v34 = vadd.f32 %v653_v38, %v5878_v57 }
 0x134   : > { %v656_v5 = vadd.f32 %v655_v40, %v5880_v58  ;;  %v6631_v19 = vsel %vm1635_vm9, %v6518_v30, %v1689_v36  ;;  %v1835_v53 = vshrl.u32 %v1625_v0, 16  ;;  %v1849_v2 = vrot.slane %v1847_v6, 1 }
 0x135   : > { %vm6620_vm12 = vcmp.ne.s16.totalorder %v7614_v55, 0  ;;  %v1855_v14 = vshll.u32 %v6594_v49, 16  ;;  %2356 = vmatmul.mubr.bf16.gmra.mrb[56].mxu1 %v6631_v19  ;;  %v1626_v57 = vsel %vm6540_vm2, %v6624_v10, 0  ;;  %v1386_v58 = vsel %vm6547_vm8, %v6624_v10, 0 }
 0x136   : > { %v721_v30 = vmax.f32 %v654_v34, 0.0  ;;  %v6644_v59 = vpack.c.bf16 %v656_v5, %v652_v13  ;;  %2363 = vmatprep.mubr.bf16.mxu1 %v6624_v10  ;;  %v1839_v6 = vshll.u32 %v1626_v57, 16  ;;  %v1692_v0 = vshrl.u32 %v1386_v58, 16 }
 0x137   : > { %v1387_v48 = vsel %vm6560_vm6, %v6086_v56, 0  ;;  %v7617_v45 = vand.u32 15, %v6488_v50  ;;  %v1837_v17 = vor.u32 %v1835_v53, %v1833_v39  ;;  %v1629_v22 = vsel %vm6573_vm14, %v6260_v52, 0 }
 0x138   : > { %v6656_v28 = vpack.c.bf16 %v721_v30, %v720_v11  ;;  %v1549_v54 = vsel %vm1517_vm3, 65537, %v7567_v15  ;;  %v1841_v20 = vrot.slane %v1839_v6, 1  ;;  %v1694_v33 = vrot.slane %v1692_v0, 7 }
 0x139   : > { %vm6652_vm15 = vcmp.gt.s32.totalorder %v7617_v45, 0  ;;  %v1695_v13 = vshll.u32 %v1386_v58, 16  ;;  %v1843_v35 = vshrl.u32 %v1626_v57, 16  ;;  %v1853_v38 = vor.u32 %v1851_v9, %v1849_v2 }
 0x13a   : > { %v1857_v36 = vrot.slane %v1855_v14, 1  ;;  %v1700_v50 = vshrl.u32 %v1387_v48, 16  ;;  %vm1519_vm4 = vmpackc.low %vm6652_vm15, %vm6652_vm15  ;;  %v7620_v39 = vand.u32 15, %v6491_v32  ;;  %v6672_v31 = vsel %vm1782_vm10, %v1837_v17, %v1841_v20 }
 0x13b   : > { %v1697_v55 = vor.u32 %v1695_v13, %v1694_v33  ;;  %v1845_v11 = vor.u32 %v1843_v35, %v1841_v20  ;;  %v1630_v9 = vsel %vm6602_vm0, %v6350_v37, 0  ;;  %4911 = vmatprep.mubr.bf16.mxu0 %v6672_v31  ;;  %v1859_v34 = vshrl.u32 %v6594_v49, 16 }
 0x13c   : > { %vm6667_vm5 = vcmp.gt.s32.totalorder %v7620_v39, 0  ;;  %v1863_v5 = vshll.u32 %v1629_v22, 16  ;;  %v4266_v32 = vcombine.low %v1549_v54, %v5757_v27  ;;  %v7623_v53 = vand.u32 15, %v6320_v12 }
 0x13d   : > { %v6687_v57 = vsel %vm1635_vm9, %v1686_v7, %v1697_v55  ;;  %v6690_v58 = vsel %vm1782_vm10, %v1845_v11, %v1849_v2  ;;  %v7626_v29 = vcombine.low %v6344_v42, %v5757_v27  ;;  %v1551_v30 = vsel %vm1519_vm4, 65537, %v7567_v15  ;;  %vm1521_vm1 = vmpackc.low %vm6667_vm5, %vm6667_vm5 }
 0x13e   : > { %vm6682_vm11 = vcmp.lt.s32.totalorder %v7623_v53, 15  ;;  %2364 = vmatmul.mubr.bf16.gmra.mrb[60].mxu1 %v6687_v57  ;;  %4912 = vmatmul.mubr.bf16.gmra.mrb[44].mxu0 %v6690_v58  ;;  %v6703_v12 = vsel %vm1782_vm10, %v1853_v38, %v1857_v36  ;;  %v1867_v7 = vshrl.u32 %v1629_v22, 16  ;;  %v1871_v6 = vshll.u32 %v1630_v9, 16 }
 0x13f   : > { %vm6695_vm13 = vcmp.ne.s16.totalorder %v7626_v29, 0  ;;  %v1388_v2 = vsel %vm6620_vm12, %v6169_v23, 0  ;;  %2371 = vmatprep.mubr.bf16.mxu1 %v6086_v56  ;;  %4915 = vmatprep.mubr.bf16.mxu0 %v6703_v12  ;;  %v1702_v42 = vrot.slane %v1700_v50, 7  ;;  %v1703_v0 = vshll.u32 %v1387_v48, 16  ;;  %vm1274_vm7 = vmpackc.low %vm6682_vm11, %vm6682_vm11 }
 0x140   : > { %v950_v45 = vand.u32 15, %v6412_v21  ;;  %v1861_v3 = vor.u32 %v1859_v34, %v1857_v36  ;;  %v1865_v17 = vrot.slane %v1863_v5, 1  ;;  %vm1616_vm2 = vcmp.ne.s16.totalorder %v4266_v32, 0 }
 0x141   : > { %v4267_v1 = vcombine.low %v1551_v30, %v5757_v27  ;;  %v1708_v22 = vshrl.u32 %v1388_v2, 16  ;;  %v1631_v54 = vsel %vm6695_vm13, %v6437_v43, 0  ;;  %v1553_v20 = vsel %vm1521_vm1, 65537, %v7567_v15 }
 0x142   : > { %v1869_v13 = vor.u32 %v1867_v7, %v1865_v17  ;;  %v1873_v48 = vrot.slane %v1871_v6, 1  ;;  %v7629_v35 = vcombine.low %v5757_v27, %v6237_v41  ;;  %v1306_v21 = vsel %vm1274_vm7, 65537, %v7567_v15 }
 0x143   : > { %v1705_v36 = vor.u32 %v1703_v0, %v1702_v42  ;;  %v1632_v50 = vsel %vm1616_vm2, %v6515_v24, 0  ;;  %vm6731_vm6 = vcmp.lt.s32.totalorder %v950_v45, 15  ;;  %v766_v40 = vadd.s32 216, %v5667_v47 }
 0x144   : > { %vm6725_vm8 = vcmp.ne.s16.totalorder %v7629_v35, 0  ;;  %v6737_v55 = vsel %vm1782_vm10, %v1861_v3, %v1865_v17  ;;  %v1879_v11 = vshll.u32 %v1631_v54, 16  ;;  %vm6739_vm14 = vcmp.ne.s16.totalorder %v4267_v1, 0  ;;  %vm1276_vm12 = vmpackc.low %vm6731_vm6, %vm6731_vm6 }
 0x145   : > { %v4268_v34 = vcombine.low %v1553_v20, %v5757_v27  ;;  %v6745_v5 = vsel %vm1635_vm9, %v1694_v33, %v1705_v36  ;;  %v1710_v32 = vrot.slane %v1708_v22, 7  ;;  %v1711_v53 = vshll.u32 %v1388_v2, 16 }
 0x146   : > { %v1875_v14 = vshrl.u32 %v1630_v9, 16  ;;  %2372 = vmatmul.mubr.bf16.gmra.mrb[64].mxu1 %v6745_v5  ;;  %4916 = vmatmul.mubr.bf16.gmra.mrb[48].mxu0 %v6737_v55  ;;  %v6750_v29 = vsel %vm1782_vm10, %v1869_v13, %v1873_v48  ;;  %v1883_v49 = vshrl.u32 %v1631_v54, 16  ;;  %v1887_v30 = vshll.u32 %v1632_v50, 16 }
 0x147   : > { %v1389_v7 = vsel %vm6725_vm8, %v6260_v52, 0  ;;  %2379 = vmatprep.mubr.bf16.mxu1 %v6169_v23  ;;  %4919 = vmatprep.mubr.bf16.mxu0 %v6750_v29  ;;  %v4248_v33 = vcombine.low %v5757_v27, %v1306_v21  ;;  %v1881_v9 = vrot.slane %v1879_v11, 1  ;;  %vm1618_vm0 = vcmp.ne.s16.totalorder %v4268_v34, 0 }
 0x148   : > { %v964_v6 = vand.u32 15, %v766_v40  ;;  %v1713_v2 = vor.u32 %v1711_v53, %v1710_v32  ;;  %v1877_v0 = vor.u32 %v1875_v14, %v1873_v48  ;;  %v1716_v45 = vshrl.u32 %v1389_v7, 16 }
 0x149   : > { %v1633_v3 = vsel %vm6739_vm14, %v6597_v63, 0  ;;  %v1885_v17 = vor.u32 %v1883_v49, %v1881_v9  ;;  %v1889_v1 = vrot.slane %v1887_v30, 1  ;;  %v1634_v22 = vsel %vm1618_vm0, %v6656_v28, 0 }
 0x14a   : > { %vm1374_vm3 = vcmp.ne.s16.totalorder %v4248_v33, 0  ;;  %v1308_v54 = vsel %vm1276_vm12, 65537, %v7567_v15  ;;  %v1719_v20 = vshll.u32 %v1389_v7, 16  ;;  %v1895_v13 = vshll.u32 %v1633_v3, 16 }
 0x14b   : > { %vm6766_vm15 = vcmp.lt.s32.totalorder %v964_v6, 15  ;;  %v768_v48 = vadd.s32 232, %v5667_v47  ;;  %v6772_v38 = vsel %vm1635_vm9, %v1702_v42, %v1713_v2  ;;  %v6775_v21 = vsel %vm1782_vm10, %v1877_v0, %v1881_v9 }
 0x14c   : > { %v1718_v36 = vrot.slane %v1716_v45, 7  ;;  %v1891_v39 = vshrl.u32 %v1632_v50, 16  ;;  %v6780_v40 = vsel %vm1782_vm10, %v1885_v17, %v1889_v1  ;;  %v1899_v11 = vshrl.u32 %v1633_v3, 16  ;;  %vm1278_vm4 = vmpackc.low %vm6766_vm15, %vm6766_vm15 }
 0x14d   : > { %v1903_v41 = vshll.u32 %v1634_v22, 16  ;;  %v1390_v34 = vsel %vm1374_vm3, %v6350_v37, 0  ;;  %v4249_v42 = vcombine.low %v5757_v27, %v1308_v54  ;;  %v1897_v53 = vrot.slane %v1895_v13, 1 }
 0x14e   : > { %2380 = vmatmul.mubr.bf16.gmra.mrb[68].mxu1 %v6772_v38  ;;  %4920 = vmatmul.mubr.bf16.gmra.mrb[52].mxu0 %v6775_v21  ;;  %v1721_v14 = vor.u32 %v1719_v20, %v1718_v36  ;;  %v1893_v50 = vor.u32 %v1891_v39, %v1889_v1  ;;  %v1724_v49 = vshrl.u32 %v1390_v34, 16  ;;  %v978_v33 = vand.u32 15, %v768_v48 }
 0x14f   : > { %2387 = vmatprep.mubr.bf16.mxu1 %v6260_v52  ;;  %4923 = vmatprep.mubr.bf16.mxu0 %v6780_v40  ;;  %v1901_v30 = vor.u32 %v1899_v11, %v1897_v53  ;;  %v1905_v7 = vrot.slane %v1903_v41, 1  ;;  %vm1375_vm5 = vcmp.ne.s16.totalorder %v4249_v42, 0  ;;  %v1727_v9 = vshll.u32 %v1390_v34, 16 }
 0x150   : > { %v1310_v6 = vsel %vm1278_vm4, 65537, %v7567_v15  ;;  %v6791_v2 = vsel %vm1635_vm9, %v1710_v32, %v1721_v14  ;;  %v6794_v0 = vsel %vm1782_vm10, %v1893_v50, %v1897_v53  ;;  %v1726_v45 = vrot.slane %v1724_v49, 7  ;;  %v5331_v14 = vld [vmem:[%s7432_s3 + $0x180] sm:$0xff]   ;;  %v5334_v50 = vld [vmem:[%s7432_s3 + $0x1c8] sm:$0xff]  }
 0x151   : > { %v1907_v3 = vshrl.u32 %v1634_v22, 16  ;;  %v6799_v17 = vsel %vm1782_vm10, %v1901_v30, %v1905_v7  ;;  %v1391_v1 = vsel %vm1375_vm5, %v6437_v43, 0  ;;  %vm1184_vm11 = vcmp.lt.s32.totalorder %v978_v33, 15 }
 0x152   : > { %v770_v54 = vadd.s32 248, %v5667_v47  ;;  %vm1926_vm13 = vcmask 1047552   ;;  %v4250_v32 = vcombine.low %v5757_v27, %v1310_v6  ;;  %v1729_v22 = vor.u32 %v1727_v9, %v1726_v45  ;;  %vm1280_vm1 = vmpackc.low %vm1184_vm11, %vm1184_vm11  ;;  %v5336_v6 = vld [vmem:[%s7432_s3 + $0x188] sm:$0xff]  }
 0x153   : > { %v1909_v20 = vor.u32 %v1907_v3, %v1905_v7  ;;  %v1732_v13 = vshrl.u32 %v1391_v1, 16  ;;  %vm1927_vm7 = vmand %vm1926_vm13, %vm1782_vm10  ;;  %v1312_v48 = vsel %vm1280_vm1, 65537, %v7567_v15  ;;  %v1735_v41 = vshll.u32 %v1391_v1, 16 }
 0x154   : > { %v992_v35 = vand.u32 15, %v770_v54  ;;  %vm1376_vm2 = vcmp.ne.s16.totalorder %v4250_v32, 0  ;;  %v6809_v39 = vsel %vm1635_vm9, %v1718_v36, %v1729_v22  ;;  %v4251_v42 = vcombine.low %v5757_v27, %v1312_v48  ;;  %v5342_v54 = vld [vmem:[%s7432_s3 + $0x190] sm:$0xff]  }
 0x155   : > { %v6811_v47 = vsel %vm1927_vm7, %v1909_v20, 0  ;;  %v1734_v11 = vrot.slane %v1732_v13, 7  ;;  %v1392_v34 = vsel %vm1376_vm2, %v6515_v24, 0  ;;  %v5346_v20 = vld [vmem:[%s7432_s3 + $0x1d8] sm:$0xff]  }
 0x156   : > { %2388 = vmatmul.mubr.bf16.gmra.mrb[72].mxu1 %v6791_v2  ;;  %4924 = vmatmul.mubr.bf16.gmra.mrb[56].mxu0 %v6794_v0  ;;  %vm1186_vm8 = vcmp.lt.s32.totalorder %v992_v35, 15  ;;  %v1740_v36 = vshrl.u32 %v1392_v34, 16  ;;  %vm1377_vm6 = vcmp.ne.s16.totalorder %v4251_v42, 0  ;;  %v1743_v33 = vshll.u32 %v1392_v34, 16  ;;  %v5348_v35 = vld [vmem:[%s7432_s3 + $0x198] sm:$0xff]   ;;  %v5353_v34 = vld [vmem:[%s7432_s3 + $0x1a0] sm:$0xff]  }
 0x157   : > { %2395 = vmatprep.mubr.bf16.mxu1 %v6350_v37  ;;  %4927 = vmatprep.mubr.bf16.mxu0 %v6799_v17  ;;  %v1737_v53 = vor.u32 %v1735_v41, %v1734_v11  ;;  %vm1282_vm10 = vmpackc.low %vm1186_vm8, %vm1186_vm8  ;;  %v1393_v9 = vsel %vm1377_vm6, %v6597_v63, 0  ;;  %v5352_v41 = vld [vmem:[%s7432_s3 + $0x1e0] sm:$0xff]  }
 0x158   : > { %v1314_v49 = vsel %vm1282_vm10, 65537, %v7567_v15  ;;  %v1742_v7 = vrot.slane %v1740_v36, 7  ;;  %v1751_v22 = vshll.u32 %v1393_v9, 16 }
 0x159   : > { %v6827_v30 = vsel %vm1635_vm9, %v1726_v45, %v1737_v53  ;;  %v4252_v3 = vcombine.low %v5757_v27, %v1314_v49  ;;  %v5340_v45 = vld [vmem:[%s7432_s3 + $0x1d0] sm:$0xff]  }
 0x15a   : > { %v1745_v1 = vor.u32 %v1743_v33, %v1742_v7  ;;  %v5357_v33 = vld [vmem:[%s7432_s3 + $0x1b0] sm:$0xff]  }
 0x15b   : > { %vm1378_vm14 = vcmp.ne.s16.totalorder %v4252_v3, 0  ;;  %v5359_v3 = vld [vmem:[%s7432_s3 + $0x1b8] sm:$0xff]  }
 0x15c   : > { %v6845_v32 = vsel %vm1635_vm9, %v1734_v11, %v1745_v1  ;;  %v1394_v13 = vsel %vm1378_vm14, %v6656_v28, 0  ;;  %v7638_v1 = vld [vmem:[#allocation13_spill] sm:$0xff] }
 0x15d   : > { %v1756_v11 = vshrl.u32 %v1394_v13, 16  ;;  %v1759_v36 = vshll.u32 %v1394_v13, 16  ;;  %v7644_v13 = vld [vmem:[#allocation25_spill] sm:$0xff] }
 0x15e   : > { %2396 = vmatmul.mubr.bf16.gmra.mrb[76].mxu1 %v6809_v39  ;;  %4928 = vmatmul.mubr.bf16.gmra.mrb[60].mxu0 %v6811_v47 }
 0x15f   : > { %2403 = vmatprep.mubr.bf16.mxu1 %v6437_v43  ;;  %4947 = vmatprep.mubr.bf16.mxu0 %v7567_v15  ;;  %v1758_v53 = vrot.slane %v1756_v11, 7  ;;  %v5365_v11 = vld [vmem:[%s7432_s3 + $0x228] sm:$0xff]  }
 0x161   : > { %v1761_v49 = vor.u32 %v1759_v36, %v1758_v53  ;;  %v5367_v53 = vld [vmem:[%s7432_s3 + $0x238] sm:$0xff]  }
 0x166   : > { %2404 = vmatmul.mubr.bf16.gmra.mrb[80].mxu1 %v6827_v30  ;;  %4948 = vmatmul.mubr.bf16.vlgmr.msra.gmra.mrb[32].mxu0 %v6190_v8  ;;  %v1748_v8 = vshrl.u32 %v1393_v9, 16 }
 0x167   : > { %4724 = vmatpush3.bf16.msra.mxu0 %v5331_v14  ;;  %2411 = vmatprep.mubr.bf16.mxu1 %v6515_v24  ;;  %v5354_v14 = vld [vmem:[%s7432_s3 + $0x1e8] sm:$0xff]  }
 0x168   : > { %4951 = vmatprep.mubr.bf16.mxu0 %v6278_v51  ;;  %4725 = vmatprep.subr.bf16.mxu0 %v5334_v50  ;;  %v1750_v27 = vrot.slane %v1748_v8, 7  ;;  %v5355_v50 = vld [vmem:[%s7432_s3 + $0x1a8] sm:$0xff]  }
 0x169   : > { %v7639_v8 = vld [vmem:[#allocation12_spill] sm:$0xff] }
 0x16a   : > { %v1753_v48 = vor.u32 %v1751_v22, %v1750_v27  ;;  %v6884_v9 = vsel %vm1635_vm9, %v1750_v27, %v1761_v49  ;;  %v7642_v27 = vld [vmem:[#allocation21_spill] sm:$0xff]  ;;  %v7643_v22 = vld [vmem:[#allocation20_spill] sm:$0xff] }
 0x16b   : > { %4726 = vmatpush3.bf16.msra.mxu0 %v5336_v6  ;;  %v5358_v6 = vld [vmem:[%s7432_s3 + $0x1f8] sm:$0xff]  }
 0x16c   : > { %4727 = vmatprep.subr.bf16.mxu0 %v5340_v45  ;;  %v6865_v42 = vsel %vm1635_vm9, %v1742_v7, %v1753_v48  ;;  %v5356_v7 = vld [vmem:[%s7432_s3 + $0x1f0] sm:$0xff]   ;;  %v5360_v45 = vld [vmem:[%s7432_s3 + $0x200] sm:$0xff]  }
 0x16d   : > { %v5364_v48 = vld [vmem:[%s7432_s3 + $0x220] sm:$0xff]  }
 0x16e   : > { %2412 = vmatmul.mubr.bf16.gmra.mrb[84].mxu1 %v6845_v32  ;;  %4952 = vmatmul.mubr.bf16.gmra.mrb[36].mxu0 %v6368_v18 }
 0x16f   : > { %2419 = vmatprep.mubr.bf16.mxu1 %v6597_v63  ;;  %4955 = vmatprep.mubr.bf16.mxu0 %v6452_v4 }
 0x170   : > { %4728 = vmatpush3.bf16.msra.mxu0 %v5342_v54  ;;  %v7640_v54 = vld [vmem:[#allocation17_spill] sm:$0xff] }
 0x171   : > { %4729 = vmatprep.subr.bf16.mxu0 %v5346_v20  ;;  %v5362_v20 = vld [vmem:[%s7432_s3 + $0x210] sm:$0xff]  }
 0x174   : > { %4730 = vmatpush3.bf16.msra.mxu0 %v5348_v35  ;;  %v7645_v35 = vld [vmem:[#allocation24_spill] sm:$0xff] }
 0x175   : > { %4731 = vmatprep.subr.bf16.mxu0 %v5352_v41  ;;  %v7646_v41 = vld [vmem:[#allocation28_spill] sm:$0xff] }
 0x176   : > { %2420 = vmatmul.mubr.bf16.gmra.mrb[88].mxu1 %v6865_v42  ;;  %4956 = vmatmul.mubr.bf16.gmra.mrb[40].mxu0 %v6534_v44 }
 0x177   : > { %2427 = vmatprep.mubr.bf16.mxu1 %v6656_v28  ;;  %4959 = vmatprep.mubr.bf16.mxu0 %v6614_v16 }
 0x178   : > { %4732 = vmatpush3.bf16.msra.mxu0 %v5353_v34  ;;  %v5366_v34 = vld [vmem:[%s7432_s3 + $0x230] sm:$0xff]  }
 0x179   : > { %4733 = vmatprep.subr.bf16.mxu0 %v5354_v14 }
 0x17c   : > { %4734 = vmatpush3.bf16.msra.mxu0 %v5355_v50 }
 0x17d   : > { %4735 = vmatprep.subr.bf16.mxu0 %v5356_v7 }
 0x17e   : > { %2428 = vmatmul.mubr.bf16.gmra.mrb[92].mxu1 %v6884_v9  ;;  %4960 = vmatmul.mubr.bf16.gmra.mrb[44].mxu0 %v6672_v31 }
 0x17f   : > { %4963 = vmatprep.mubr.bf16.mxu0 %v6690_v58  ;;  %2773 = vmatprep.mubr.bf16.mxu1 %v7567_v15 }
 0x180   : > { %4736 = vmatpush3.bf16.msra.mxu0 %v5357_v33 }
 0x181   : > { %4737 = vmatprep.subr.bf16.mxu0 %v5358_v6 }
 0x184   : > { %4738 = vmatpush3.bf16.msra.mxu0 %v5359_v3 }
 0x185   : > { %4979 = vmatprep.subr.bf16.mxu0 %v5360_v45 }
 0x186   : > { %2774 = vmatmul.mubr.bf16.vlgmr.msra.gmra.mrb[96].mxu1 %v7567_v15  ;;  %4964 = vmatmul.mubr.bf16.gmra.mrb[48].mxu0 %v6703_v12 }
 0x187   : > { %2781 = vmatprep.mubr.bf16.mxu1 %v6060_v61  ;;  %4967 = vmatprep.mubr.bf16.mxu0 %v6737_v55  ;;  %v7641_v61 = vld [vmem:[#allocation16_spill] sm:$0xff] }
 0x18e   : > { %2782 = vmatmul.mubr.bf16.gmra.mrb[100].mxu1 %v6143_v25  ;;  %4968 = vmatmul.mubr.bf16.gmra.mrb[52].mxu0 %v6750_v29  ;;  %v5361_v25 = vld [vmem:[%s7432_s3 + $0x208] sm:$0xff]  }
 0x18f   : > { %2789 = vmatprep.mubr.bf16.mxu1 %v6135_v62  ;;  %4971 = vmatprep.mubr.bf16.mxu0 %v6775_v21 }
 0x196   : > { %2790 = vmatmul.mubr.bf16.gmra.mrb[104].mxu1 %v7638_v1  ;;  %4972 = vmatmul.mubr.bf16.gmra.mrb[56].mxu0 %v6780_v40 }
 0x197   : > { %2797 = vmatprep.mubr.bf16.mxu1 %v7639_v8  ;;  %4975 = vmatprep.mubr.bf16.mxu0 %v6794_v0 }
 0x19e   : > { %2798 = vmatmul.mubr.bf16.gmra.mrb[108].mxu1 %v7640_v54  ;;  %4976 = vmatmul.mubr.bf16.gmra.mrb[60].mxu0 %v6799_v17 }
 0x19f   : > { %2805 = vmatprep.mubr.bf16.mxu1 %v7641_v61  ;;  %3336 = vmatprep.mubr.bf16.mxu0 %v6135_v62  ;;  %v5363_v62 = vld [vmem:[%s7432_s3 + $0x218] sm:$0xff]  }
 0x1a6   : > { %2806 = vmatmul.mubr.bf16.gmra.mrb[112].mxu1 %v7642_v27  ;;  %3337 = vmatmul.mubr.bf16.vlgmr.msra.gmra.mrb[64].mxu0 %v7638_v1 }
 0x1a7   : > { %4980 = vmatpush3.bf16.msra.mxu0 %v5360_v45  ;;  %2813 = vmatprep.mubr.bf16.mxu1 %v7643_v22 }
 0x1a8   : > { %3344 = vmatprep.mubr.bf16.mxu0 %v7639_v8  ;;  %4981 = vmatprep.subr.bf16.mxu0 %v5361_v25 }
 0x1ab   : > { %4982 = vmatpush3.bf16.msra.mxu0 %v5361_v25 }
 0x1ac   : > { %4983 = vmatprep.subr.bf16.mxu0 %v5362_v20 }
 0x1ae   : > { %2814 = vmatmul.mubr.bf16.gmra.mrb[116].mxu1 %v7644_v13  ;;  %3345 = vmatmul.mubr.bf16.gmra.mrb[68].mxu0 %v7640_v54 }
 0x1af   : > { %2821 = vmatprep.mubr.bf16.mxu1 %v7645_v35  ;;  %3352 = vmatprep.mubr.bf16.mxu0 %v7641_v61 }
 0x1b0   : > { %4984 = vmatpush3.bf16.msra.mxu0 %v5362_v20 }
 0x1b1   : > { %4985 = vmatprep.subr.bf16.mxu0 %v5363_v62 }
 0x1b4   : > { %4986 = vmatpush3.bf16.msra.mxu0 %v5363_v62 }
 0x1b5   : > { %4987 = vmatprep.subr.bf16.mxu0 %v5364_v48 }
 0x1b6   : > { %2822 = vmatmul.mubr.bf16.gmra.mrb[120].mxu1 %v6566_v46  ;;  %3353 = vmatmul.mubr.bf16.gmra.mrb[72].mxu0 %v7642_v27 }
 0x1b7   : > { %2829 = vmatprep.mubr.bf16.mxu1 %v7646_v41  ;;  %3360 = vmatprep.mubr.bf16.mxu0 %v7643_v22 }
 0x1b8   : > { %4988 = vmatpush3.bf16.msra.mxu0 %v5364_v48 }
 0x1b9   : > { %4989 = vmatprep.subr.bf16.mxu0 %v5365_v11 }
 0x1bc   : > { %4990 = vmatpush3.bf16.msra.mxu0 %v5365_v11 }
 0x1bd   : > { %4991 = vmatprep.subr.bf16.mxu0 %v5366_v34 }
 0x1be   : > { %2830 = vmatmul.mubr.bf16.gmra.mrb[124].mxu1 %v6631_v19  ;;  %3361 = vmatmul.mubr.bf16.gmra.mrb[76].mxu0 %v7644_v13 }
 0x1bf   : > { %2837 = vmatprep.mubr.bf16.mxu1 %v6624_v10  ;;  %3368 = vmatprep.mubr.bf16.mxu0 %v7645_v35 }
 0x1c0   : > { %4992 = vmatpush3.bf16.msra.mxu0 %v5366_v34  ;;  %v5368_v34 = vld [vmem:[%s7434_s5] sm:$0xff]  }
 0x1c1   : > { %4993 = vmatprep.subr.bf16.mxu0 %v5367_v53  ;;  %5027 = vmatprep.subr.bf16.mxu1 %v5368_v34 }
 0x1c2   : > { %5028 = vmatpush3.bf16.msra.mxu1 %v5368_v34 }
 0x1c4   : > { %4994 = vmatpush3.bf16.msra.mxu0 %v5367_v53 }
 0x1c6   : > { %2838 = vmatmul.mubr.bf16.gmra.mrb[128].mxu1 %v6687_v57  ;;  %3369 = vmatmul.mubr.bf16.gmra.mrb[80].mxu0 %v6566_v46 }
 0x1c7   : > { %2845 = vmatprep.mubr.bf16.mxu1 %v6086_v56  ;;  %3376 = vmatprep.mubr.bf16.mxu0 %v7646_v41 }
 0x1ce   : > { %2846 = vmatmul.mubr.bf16.gmra.mrb[132].mxu1 %v6745_v5  ;;  %3377 = vmatmul.mubr.bf16.gmra.mrb[84].mxu0 %v6631_v19 }
 0x1cf   : > { %2853 = vmatprep.mubr.bf16.mxu1 %v6169_v23  ;;  %3384 = vmatprep.mubr.bf16.mxu0 %v6624_v10 }
 0x1d3   : > { %v4467_v46 = vpop.f32.mrb[32].mxu1 }
 0x1d4   : > { %v4468_v36 = vpop.f32.mrb[33].mxu1 }
 0x1d5   : > { %v6964_v14 = vadd.f32 %v4468_v36, %v4467_v46  ;;  %v4470_v50 = vpop.f32.mrb[34].mxu1 }
 0x1d6   : > { %2854 = vmatmul.mubr.bf16.gmra.mrb[136].mxu1 %v6772_v38  ;;  %3385 = vmatmul.mubr.bf16.gmra.mrb[88].mxu0 %v6687_v57  ;;  %v4471_v49 = vpop.f32.mrb[35].mxu1 }
 0x1d7   : > { %2861 = vmatprep.mubr.bf16.mxu1 %v6260_v52  ;;  %3392 = vmatprep.mubr.bf16.mxu0 %v6086_v56  ;;  %v6966_v7 = vadd.f32 %v4471_v49, %v4470_v50 }
 0x1db   : > { %v4473_v10 = vpop.f32.mrb[36].mxu1 }
 0x1dc   : > { %v4474_v19 = vpop.f32.mrb[37].mxu1 }
 0x1dd   : > { %v6972_v57 = vadd.f32 %v4474_v19, %v4473_v10  ;;  %v4476_v56 = vpop.f32.mrb[38].mxu1 }
 0x1de   : > { %2862 = vmatmul.mubr.bf16.gmra.mrb[140].mxu1 %v6791_v2  ;;  %3393 = vmatmul.mubr.bf16.gmra.mrb[92].mxu0 %v6745_v5  ;;  %v4477_v33 = vpop.f32.mrb[39].mxu1 }
 0x1df   : > { %2869 = vmatprep.mubr.bf16.mxu1 %v6350_v37  ;;  %3400 = vmatprep.mubr.bf16.mxu0 %v6169_v23  ;;  %v6974_v6 = vadd.f32 %v4477_v33, %v4476_v56  ;;  %v5369_v33 = vld [vmem:[%s7434_s5 + $0x8] sm:$0xff]  }
 0x1e0   : > { %5029 = vmatprep.subr.bf16.mxu1 %v5369_v33 }
 0x1e1   : > { %5030 = vmatpush3.bf16.msra.mxu1 %v5369_v33 }
 0x1e3   : > { %v4479_v5 = vpop.f32.mrb[40].mxu1 }
 0x1e4   : > { %v4480_v3 = vpop.f32.mrb[41].mxu1 }
 0x1e5   : > { %v6980_v45 = vadd.f32 %v4480_v3, %v4479_v5  ;;  %v4482_v23 = vpop.f32.mrb[42].mxu1 }
 0x1e6   : > { %2870 = vmatmul.mubr.bf16.gmra.mrb[144].mxu1 %v6809_v39  ;;  %3401 = vmatmul.mubr.bf16.gmra.mrb[96].mxu0 %v6772_v38  ;;  %v4483_v1 = vpop.f32.mrb[43].mxu1 }
 0x1e7   : > { %2877 = vmatprep.mubr.bf16.mxu1 %v6437_v43  ;;  %3408 = vmatprep.mubr.bf16.mxu0 %v6260_v52  ;;  %v6982_v8 = vadd.f32 %v4483_v1, %v4482_v23 }
 0x1ec   : > { %v4485_v38 = vpop.f32.mrb[44].mxu1 }
 0x1ed   : > { %v4486_v54 = vpop.f32.mrb[45].mxu1 }
 0x1ee   : > { %2878 = vmatmul.mubr.bf16.gmra.mrb[148].mxu1 %v6827_v30  ;;  %3409 = vmatmul.mubr.bf16.gmra.mrb[100].mxu0 %v6791_v2  ;;  %v6988_v61 = vadd.f32 %v4486_v54, %v4485_v38  ;;  %v4488_v52 = vpop.f32.mrb[46].mxu1 }
 0x1ef   : > { %2885 = vmatprep.mubr.bf16.mxu1 %v6515_v24  ;;  %3416 = vmatprep.mubr.bf16.mxu0 %v6350_v37  ;;  %v4489_v25 = vpop.f32.mrb[47].mxu1 }
 0x1f0   : > { %v6990_v27 = vadd.f32 %v4489_v25, %v4488_v52 }
 0x1f5   : > { %v4491_v2 = vpop.f32.mrb[48].mxu1 }
 0x1f6   : > { %2886 = vmatmul.mubr.bf16.gmra.mrb[152].mxu1 %v6845_v32  ;;  %3417 = vmatmul.mubr.bf16.gmra.mrb[104].mxu0 %v6809_v39  ;;  %v4492_v22 = vpop.f32.mrb[49].mxu1 }
 0x1f7   : > { %2893 = vmatprep.mubr.bf16.mxu1 %v6597_v63  ;;  %3424 = vmatprep.mubr.bf16.mxu0 %v6437_v43  ;;  %v6996_v20 = vadd.f32 %v4492_v22, %v4491_v2  ;;  %v4494_v37 = vpop.f32.mrb[50].mxu1  ;;  %v5370_v22 = vld [vmem:[%s7434_s5 + $0x10] sm:$0xff]  }
 0x1f8   : > { %v4495_v62 = vpop.f32.mrb[51].mxu1  ;;  %5031 = vmatprep.subr.bf16.mxu1 %v5370_v22 }
 0x1f9   : > { %v6998_v13 = vadd.f32 %v4495_v62, %v4494_v37  ;;  %5032 = vmatpush3.bf16.msra.mxu1 %v5370_v22 }
 0x1fe   : > { %2894 = vmatmul.mubr.bf16.gmra.mrb[156].mxu1 %v6865_v42  ;;  %3425 = vmatmul.mubr.bf16.gmra.mrb[108].mxu0 %v6827_v30  ;;  %v4497_v35 = vpop.f32.mrb[52].mxu1 }
 0x1ff   : > { %3432 = vmatprep.mubr.bf16.mxu0 %v6515_v24  ;;  %v4498_v39 = vpop.f32.mrb[53].mxu1 }
 0x200   : > { %v7003_v48 = vadd.f32 %v4498_v39, %v4497_v35  ;;  %v4500_v11 = vpop.f32.mrb[54].mxu1 }
 0x201   : > { %v4501_v43 = vpop.f32.mrb[55].mxu1 }
 0x202   : > { %v7005_v41 = vadd.f32 %v4501_v43, %v4500_v11 }
 0x206   : > { %3433 = vmatmul.mubr.bf16.gmra.mrb[112].mxu0 %v6845_v32 }
 0x207   : > { %3440 = vmatprep.mubr.bf16.mxu0 %v6597_v63 }
 0x208   : > { %v4503_v53 = vpop.f32.mrb[56].mxu1 }
 0x209   : > { %v4504_v30 = vpop.f32.mrb[57].mxu1 }
 0x20a   : > { %v7012_v24 = vadd.f32 %v4504_v30, %v4503_v53  ;;  %v4506_v46 = vpop.f32.mrb[58].mxu1 }
 0x20b   : > { %v4507_v36 = vpop.f32.mrb[59].mxu1 }
 0x20c   : > { %v7014_v50 = vadd.f32 %v4507_v36, %v4506_v46  ;;  %v5371_v46 = vld [vmem:[%s7434_s5 + $0x18] sm:$0xff]  }
 0x20d   : > { %5033 = vmatprep.subr.bf16.mxu1 %v5371_v46 }
 0x20e   : > { %3441 = vmatmul.mubr.bf16.gmra.mrb[116].mxu0 %v6865_v42  ;;  %5034 = vmatpush3.bf16.msra.mxu1 %v5371_v46 }
 0x20f   : > { %3448 = vmatprep.mubr.bf16.mxu0 %v6656_v28 }
 0x211   : > { %v4509_v32 = vpop.f32.mrb[60].mxu1 }
 0x212   : > { %v4510_v63 = vpop.f32.mrb[61].mxu1 }
 0x213   : > { %v7018_v49 = vadd.f32 %v4510_v63, %v4509_v32  ;;  %v4512_v10 = vpop.f32.mrb[62].mxu1 }
 0x214   : > { %v4513_v19 = vpop.f32.mrb[63].mxu1 }
 0x215   : > { %v7020_v56 = vadd.f32 %v4513_v19, %v4512_v10 }
 0x216   : > { %3449 = vmatmul.mubr.bf16.gmra.mrb[120].mxu0 %v6884_v9 }
 0x217   : > { %3456 = vmatprep.mubr.bf16.mxu0 %v7567_v15 }
 0x219   : > { %v4515_v5 = vpop.f32.mrb[64].mxu1 }
 0x21a   : > { %v4516_v42 = vpop.f32.mrb[65].mxu1 }
 0x21b   : > { %v7027_v28 = vadd.f32 %v4516_v42, %v4515_v5  ;;  %v4518_v3 = vpop.f32.mrb[66].mxu1 }
 0x21c   : > { %v4519_v23 = vpop.f32.mrb[67].mxu1 }
 0x21d   : > { %v7029_v1 = vadd.f32 %v4519_v23, %v4518_v3  ;;  %v5372_v3 = vld [vmem:[%s7434_s5 + $0x20] sm:$0xff]  }
 0x21e   : > { %3457 = vmatmul.mubr.bf16.gmra.mrb[124].mxu0 %v7567_v15  ;;  %5035 = vmatprep.subr.bf16.mxu1 %v5372_v3 }
 0x21f   : > { %4995 = vmatprep.mubr.bf16.mxu0 %v6278_v51  ;;  %5036 = vmatpush3.bf16.msra.mxu1 %v5372_v3 }
 0x221   : > { %v4521_v9 = vpop.f32.mrb[68].mxu1 }
 0x222   : > { %v4522_v38 = vpop.f32.mrb[69].mxu1 }
 0x223   : > { %v7033_v54 = vadd.f32 %v4522_v38, %v4521_v9  ;;  %v4524_v52 = vpop.f32.mrb[70].mxu1 }
 0x224   : > { %v4525_v25 = vpop.f32.mrb[71].mxu1 }
 0x225   : > { %v7035_v2 = vadd.f32 %v4525_v25, %v4524_v52 }
 0x226   : > { %4996 = vmatmul.mubr.bf16.vlgmr.msra.gmra.mrb[32].mxu0 %v6368_v18 }
 0x227   : > { %4999 = vmatprep.mubr.bf16.mxu0 %v6452_v4 }
 0x229   : > { %v4527_v37 = vpop.f32.mrb[72].mxu1 }
 0x22a   : > { %v4528_v62 = vpop.f32.mrb[73].mxu1 }
 0x22b   : > { %v7042_v51 = vadd.f32 %v4528_v62, %v4527_v37  ;;  %v4530_v35 = vpop.f32.mrb[74].mxu1 }
 0x22c   : > { %v4531_v39 = vpop.f32.mrb[75].mxu1 }
 0x22d   : > { %v7044_v11 = vadd.f32 %v4531_v39, %v4530_v35  ;;  %v5373_v35 = vld [vmem:[%s7434_s5 + $0x28] sm:$0xff]  }
 0x22e   : > { %5000 = vmatmul.mubr.bf16.gmra.mrb[36].mxu0 %v6534_v44  ;;  %5037 = vmatprep.subr.bf16.mxu1 %v5373_v35 }
 0x22f   : > { %5003 = vmatprep.mubr.bf16.mxu0 %v6614_v16  ;;  %5038 = vmatpush3.bf16.msra.mxu1 %v5373_v35  ;;  %v5375_v35 = vld [vmem:[%s7434_s5 + $0x38] sm:$0xff]  }
 0x231   : > { %v4533_v18 = vpop.f32.mrb[76].mxu1 }
 0x232   : > { %v4534_v4 = vpop.f32.mrb[77].mxu1 }
 0x233   : > { %v7048_v43 = vadd.f32 %v4534_v4, %v4533_v18  ;;  %v4536_v34 = vpop.f32.mrb[78].mxu1 }
 0x234   : > { %v4537_v53 = vpop.f32.mrb[79].mxu1 }
 0x235   : > { %v7050_v30 = vadd.f32 %v4537_v53, %v4536_v34 }
 0x236   : > { %5004 = vmatmul.mubr.bf16.gmra.mrb[40].mxu0 %v6672_v31 }
 0x237   : > { %5007 = vmatprep.mubr.bf16.mxu0 %v6690_v58 }
 0x239   : > { %v4539_v36 = vpop.f32.mrb[80].mxu1 }
 0x23a   : > { %v4540_v44 = vpop.f32.mrb[81].mxu1 }
 0x23b   : > { %v7057_v16 = vadd.f32 %v4540_v44, %v4539_v36  ;;  %v4542_v32 = vpop.f32.mrb[82].mxu1 }
 0x23c   : > { %v4543_v63 = vpop.f32.mrb[83].mxu1 }
 0x23d   : > { %v7059_v10 = vadd.f32 %v4543_v63, %v4542_v32 }
 0x23e   : > { %5008 = vmatmul.mubr.bf16.gmra.mrb[44].mxu0 %v6703_v12 }
 0x23f   : > { %5011 = vmatprep.mubr.bf16.mxu0 %v6737_v55 }
 0x241   : > { %v4545_v31 = vpop.f32.mrb[84].mxu1 }
 0x242   : > { %v4546_v58 = vpop.f32.mrb[85].mxu1 }
 0x243   : > { %v7063_v19 = vadd.f32 %v4546_v58, %v4545_v31  ;;  %v4548_v33 = vpop.f32.mrb[86].mxu1  ;;  %v5374_v58 = vld [vmem:[%s7434_s5 + $0x30] sm:$0xff]  }
 0x244   : > { %v4549_v5 = vpop.f32.mrb[87].mxu1  ;;  %5039 = vmatprep.subr.bf16.mxu1 %v5374_v58 }
 0x245   : > { %v7065_v42 = vadd.f32 %v4549_v5, %v4548_v33  ;;  %5040 = vmatpush3.bf16.msra.mxu1 %v5374_v58 }
 0x246   : > { %5012 = vmatmul.mubr.bf16.gmra.mrb[48].mxu0 %v6750_v29  ;;  %5041 = vmatprep.subr.bf16.mxu1 %v5375_v35 }
 0x247   : > { %5015 = vmatprep.mubr.bf16.mxu0 %v6775_v21 }
 0x249   : > { %v4551_v23 = vpop.f32.mrb[88].mxu1  ;;  %5042 = vmatpush3.bf16.msra.mxu1 %v5375_v35 }
 0x24a   : > { %v4552_v12 = vpop.f32.mrb[89].mxu1 }
 0x24b   : > { %v7072_v55 = vadd.f32 %v4552_v12, %v4551_v23  ;;  %v4554_v9 = vpop.f32.mrb[90].mxu1 }
 0x24c   : > { %v4555_v38 = vpop.f32.mrb[91].mxu1 }
 0x24d   : > { %v7074_v52 = vadd.f32 %v4555_v38, %v4554_v9 }
 0x24e   : > { %5016 = vmatmul.mubr.bf16.gmra.mrb[52].mxu0 %v6780_v40 }
 0x24f   : > { %5019 = vmatprep.mubr.bf16.mxu0 %v6794_v0 }
 0x251   : > { %v4557_v29 = vpop.f32.mrb[92].mxu1 }
 0x252   : > { %v4558_v21 = vpop.f32.mrb[93].mxu1 }
 0x253   : > { %v7078_v25 = vadd.f32 %v4558_v21, %v4557_v29  ;;  %v4560_v22 = vpop.f32.mrb[94].mxu1 }
 0x254   : > { %v4561_v37 = vpop.f32.mrb[95].mxu1 }
 0x255   : > { %v7080_v62 = vadd.f32 %v4561_v37, %v4560_v22 }
 0x256   : > { %5020 = vmatmul.mubr.bf16.gmra.mrb[56].mxu0 %v6799_v17 }
 0x257   : > { %5023 = vmatprep.mubr.bf16.mxu0 %v6811_v47 }
 0x259   : > { %v4603_v39 = vpop.f32.mrb[96].mxu1 }
 0x25a   : > { %v4604_v40 = vpop.f32.mrb[97].mxu1 }
 0x25b   : > { %v4605_v0 = vadd.f32 %v4604_v40, %v4603_v39  ;;  %v4606_v18 = vpop.f32.mrb[98].mxu1 }
 0x25c   : > { %v4607_v4 = vpop.f32.mrb[99].mxu1 }
 0x25d   : > { %v5080_v34 = vadd.f32 %v4605_v0, %v6964_v14  ;;  %v4608_v53 = vadd.f32 %v4607_v4, %v4606_v18 }
 0x25e   : > { %5024 = vmatmul.mubr.bf16.gmra.mrb[60].mxu0 %v7567_v15 }
 0x25f   : > { %v5086_v17 = vadd.f32 %v4608_v53, %v6966_v7 }
 0x261   : > { %v4609_v46 = vpop.f32.mrb[100].mxu1 }
 0x262   : > { %v4610_v47 = vpop.f32.mrb[101].mxu1 }
 0x263   : > { %v4611_v36 = vadd.f32 %v4610_v47, %v4609_v46  ;;  %v4612_v44 = vpop.f32.mrb[102].mxu1 }
 0x264   : > { %v4613_v32 = vpop.f32.mrb[103].mxu1 }
 0x265   : > { %v5077_v63 = vadd.f32 %v4611_v36, %v6972_v57  ;;  %v4614_v31 = vadd.f32 %v4613_v32, %v4612_v44 }
 0x267   : > { %v5083_v33 = vadd.f32 %v4614_v31, %v6974_v6 }
 0x269   : > { %v4615_v14 = vpop.f32.mrb[104].mxu1 }
 0x26a   : > { %v4616_v15 = vpop.f32.mrb[105].mxu1 }
 0x26b   : > { %v4617_v5 = vadd.f32 %v4616_v15, %v4615_v14  ;;  %v4618_v7 = vpop.f32.mrb[106].mxu1 }
 0x26c   : > { %v4619_v3 = vpop.f32.mrb[107].mxu1 }
 0x26d   : > { %v5092_v23 = vadd.f32 %v4617_v5, %v6980_v45  ;;  %v4620_v12 = vadd.f32 %v4619_v3, %v4618_v7 }
 0x26f   : > { %v5098_v9 = vadd.f32 %v4620_v12, %v6982_v8 }
 0x271   : > { %v4621_v57 = vpop.f32.mrb[108].mxu1 }
 0x272   : > { %v4622_v38 = vpop.f32.mrb[109].mxu1 }
 0x273   : > { %v4623_v29 = vadd.f32 %v4622_v38, %v4621_v57  ;;  %v4624_v21 = vpop.f32.mrb[110].mxu1 }
 0x274   : > { %v4625_v22 = vpop.f32.mrb[111].mxu1 }
 0x275   : > { %v7098_v37 = vadd.f32 %v4623_v29, %v6988_v61  ;;  %v4626_v6 = vadd.f32 %v4625_v22, %v4624_v21 }
 0x277   : > { %v7104_v39 = vadd.f32 %v4626_v6, %v6990_v27 }
 0x279   : > { %v4627_v45 = vpop.f32.mrb[112].mxu1  ;;  %v4739_v8 = vpop.f32.mrb[64].mxu0 }
 0x27a   : > { %v4628_v40 = vpop.f32.mrb[113].mxu1  ;;  %v4740_v0 = vpop.f32.mrb[65].mxu0 }
 0x27b   : > { %v4629_v18 = vadd.f32 %v4628_v40, %v4627_v45  ;;  %v4741_v4 = vadd.f32 %v4740_v0, %v4739_v8  ;;  %v4630_v53 = vpop.f32.mrb[114].mxu1  ;;  %v4742_v46 = vpop.f32.mrb[66].mxu0 }
 0x27c   : > { %v4631_v61 = vpop.f32.mrb[115].mxu1  ;;  %v4743_v47 = vpop.f32.mrb[67].mxu0 }
 0x27d   : > { %v7107_v36 = vadd.f32 %v4629_v18, %v6996_v20  ;;  %v4632_v44 = vadd.f32 %v4631_v61, %v4630_v53  ;;  %v4744_v32 = vadd.f32 %v4743_v47, %v4742_v46  ;;  %v7109_v31 = vadd.f32 %v5080_v34, %v4741_v4 }
 0x27f   : > { %v7112_v27 = vadd.f32 %v4632_v44, %v6998_v13  ;;  %v7114_v58 = vadd.f32 %v5086_v17, %v4744_v32 }
 0x281   : > { %v4633_v14 = vpop.f32.mrb[116].mxu1  ;;  %v4745_v15 = vpop.f32.mrb[68].mxu0 }
 0x282   : > { %v4634_v5 = vpop.f32.mrb[117].mxu1  ;;  %v4746_v7 = vpop.f32.mrb[69].mxu0 }
 0x283   : > { %v4635_v3 = vadd.f32 %v4634_v5, %v4633_v14  ;;  %v4747_v12 = vadd.f32 %v4746_v7, %v4745_v15  ;;  %v4636_v57 = vpop.f32.mrb[118].mxu1  ;;  %v4748_v38 = vpop.f32.mrb[70].mxu0 }
 0x284   : > { %v4637_v29 = vpop.f32.mrb[119].mxu1  ;;  %v4749_v20 = vpop.f32.mrb[71].mxu0 }
 0x285   : > { %v7117_v21 = vadd.f32 %v4635_v3, %v7003_v48  ;;  %v4638_v34 = vadd.f32 %v4637_v29, %v4636_v57  ;;  %v4750_v22 = vadd.f32 %v4749_v20, %v4748_v38  ;;  %v7119_v6 = vadd.f32 %v5077_v63, %v4747_v12 }
 0x287   : > { %v7122_v13 = vadd.f32 %v4638_v34, %v7005_v41  ;;  %v7124_v17 = vadd.f32 %v5083_v33, %v4750_v22 }
 0x289   : > { %v4639_v35 = vpop.f32.mrb[120].mxu1  ;;  %v4751_v45 = vpop.f32.mrb[72].mxu0 }
 0x28a   : > { %v4640_v8 = vpop.f32.mrb[121].mxu1  ;;  %v4752_v40 = vpop.f32.mrb[73].mxu0 }
 0x28b   : > { %v4641_v0 = vadd.f32 %v4640_v8, %v4639_v35  ;;  %v4753_v18 = vadd.f32 %v4752_v40, %v4751_v45  ;;  %v4642_v4 = vpop.f32.mrb[122].mxu1  ;;  %v4754_v53 = vpop.f32.mrb[74].mxu0 }
 0x28c   : > { %v4643_v46 = vpop.f32.mrb[123].mxu1  ;;  %v4755_v48 = vpop.f32.mrb[75].mxu0 }
 0x28d   : > { %v7127_v61 = vadd.f32 %v4641_v0, %v7012_v24  ;;  %v4644_v63 = vadd.f32 %v4643_v46, %v4642_v4  ;;  %v4756_v47 = vadd.f32 %v4755_v48, %v4754_v53  ;;  %v7129_v44 = vadd.f32 %v5092_v23, %v4753_v18 }
 0x28f   : > { %v7132_v41 = vadd.f32 %v4644_v63, %v7014_v50  ;;  %v7134_v33 = vadd.f32 %v5098_v9, %v4756_v47 }
 0x291   : > { %v4645_v32 = vpop.f32.mrb[124].mxu1  ;;  %v4757_v14 = vpop.f32.mrb[76].mxu0 }
 0x292   : > { %v4646_v15 = vpop.f32.mrb[125].mxu1  ;;  %v4758_v5 = vpop.f32.mrb[77].mxu0 }
 0x293   : > { %v4647_v7 = vadd.f32 %v4646_v15, %v4645_v32  ;;  %v4759_v3 = vadd.f32 %v4758_v5, %v4757_v14  ;;  %v4648_v12 = vpop.f32.mrb[126].mxu1  ;;  %v4760_v57 = vpop.f32.mrb[78].mxu0 }
 0x294   : > { %v4649_v38 = vpop.f32.mrb[127].mxu1  ;;  %v4761_v24 = vpop.f32.mrb[79].mxu0 }
 0x295   : > { %v7137_v29 = vadd.f32 %v4647_v7, %v7018_v49  ;;  %v4650_v23 = vadd.f32 %v4649_v38, %v4648_v12  ;;  %v4762_v20 = vadd.f32 %v4761_v24, %v4760_v57  ;;  %v7140_v50 = vadd.f32 %v7098_v37, %v4759_v3 }
 0x297   : > { %v7143_v9 = vadd.f32 %v4650_v23, %v7020_v56  ;;  %v7146_v34 = vadd.f32 %v7104_v39, %v4762_v20 }
 0x299   : > { %v4651_v22 = vpop.f32.mrb[128].mxu1  ;;  %v4763_v35 = vpop.f32.mrb[80].mxu0 }
 0x29a   : > { %v4652_v45 = vpop.f32.mrb[129].mxu1  ;;  %v4764_v8 = vpop.f32.mrb[81].mxu0 }
 0x29b   : > { %v4653_v40 = vadd.f32 %v4652_v45, %v4651_v22  ;;  %v4765_v0 = vadd.f32 %v4764_v8, %v4763_v35  ;;  %v4654_v18 = vpop.f32.mrb[130].mxu1  ;;  %v4766_v49 = vpop.f32.mrb[82].mxu0 }
 0x29c   : > { %v4655_v4 = vpop.f32.mrb[131].mxu1  ;;  %v4767_v53 = vpop.f32.mrb[83].mxu0 }
 0x29d   : > { %v7149_v46 = vadd.f32 %v4653_v40, %v7027_v28  ;;  %v4656_v37 = vadd.f32 %v4655_v4, %v4654_v18  ;;  %v4768_v48 = vadd.f32 %v4767_v53, %v4766_v49  ;;  %v7152_v56 = vadd.f32 %v7107_v36, %v4765_v0 }
 0x29f   : > { %v7155_v39 = vadd.f32 %v4656_v37, %v7029_v1  ;;  %v7158_v63 = vadd.f32 %v7112_v27, %v4768_v48 }
 0x2a1   : > { %v4657_v47 = vpop.f32.mrb[132].mxu1  ;;  %v4769_v32 = vpop.f32.mrb[84].mxu0 }
 0x2a2   : > { %v4658_v14 = vpop.f32.mrb[133].mxu1  ;;  %v4770_v15 = vpop.f32.mrb[85].mxu0 }
 0x2a3   : > { %v4659_v5 = vadd.f32 %v4658_v14, %v4657_v47  ;;  %v4771_v7 = vadd.f32 %v4770_v15, %v4769_v32  ;;  %v4660_v3 = vpop.f32.mrb[134].mxu1  ;;  %v4772_v28 = vpop.f32.mrb[86].mxu0 }
 0x2a4   : > { %v4661_v12 = vpop.f32.mrb[135].mxu1  ;;  %v4773_v57 = vpop.f32.mrb[87].mxu0 }
 0x2a5   : > { %v7161_v38 = vadd.f32 %v4659_v5, %v7033_v54  ;;  %v4662_v36 = vadd.f32 %v4661_v12, %v4660_v3  ;;  %v4774_v24 = vadd.f32 %v4773_v57, %v4772_v28  ;;  %v7164_v1 = vadd.f32 %v7117_v21, %v4771_v7 }
 0x2a7   : > { %v7167_v27 = vadd.f32 %v4662_v36, %v7035_v2  ;;  %v7170_v23 = vadd.f32 %v7122_v13, %v4774_v24 }
 0x2a9   : > { %v4663_v20 = vpop.f32.mrb[136].mxu1  ;;  %v4775_v22 = vpop.f32.mrb[88].mxu0 }
 0x2aa   : > { %v4664_v35 = vpop.f32.mrb[137].mxu1  ;;  %v4776_v45 = vpop.f32.mrb[89].mxu0 }
 0x2ab   : > { %v4665_v8 = vadd.f32 %v4664_v35, %v4663_v20  ;;  %v4777_v40 = vadd.f32 %v4776_v45, %v4775_v22  ;;  %v4666_v0 = vpop.f32.mrb[138].mxu1  ;;  %v4778_v54 = vpop.f32.mrb[90].mxu0 }
 0x2ac   : > { %v4667_v18 = vpop.f32.mrb[139].mxu1  ;;  %v4779_v49 = vpop.f32.mrb[91].mxu0 }
 0x2ad   : > { %v7173_v4 = vadd.f32 %v4665_v8, %v7042_v51  ;;  %v4668_v21 = vadd.f32 %v4667_v18, %v4666_v0  ;;  %v4780_v53 = vadd.f32 %v4779_v49, %v4778_v54  ;;  %v7176_v2 = vadd.f32 %v7127_v61, %v4777_v40 }
 0x2af   : > { %v7179_v13 = vadd.f32 %v4668_v21, %v7044_v11  ;;  %v7182_v37 = vadd.f32 %v7132_v41, %v4780_v53 }
 0x2b1   : > { %v4669_v48 = vpop.f32.mrb[140].mxu1  ;;  %v4781_v47 = vpop.f32.mrb[92].mxu0 }
 0x2b2   : > { %v4670_v32 = vpop.f32.mrb[141].mxu1  ;;  %v4782_v14 = vpop.f32.mrb[93].mxu0 }
 0x2b3   : > { %v4671_v15 = vadd.f32 %v4670_v32, %v4669_v48  ;;  %v4783_v5 = vadd.f32 %v4782_v14, %v4781_v47  ;;  %v4672_v7 = vpop.f32.mrb[142].mxu1  ;;  %v4784_v51 = vpop.f32.mrb[94].mxu0 }
 0x2b4   : > { %v4673_v3 = vpop.f32.mrb[143].mxu1  ;;  %v4785_v28 = vpop.f32.mrb[95].mxu0 }
 0x2b5   : > { %v7185_v12 = vadd.f32 %v4671_v15, %v7048_v43  ;;  %v4674_v61 = vadd.f32 %v4673_v3, %v4672_v7  ;;  %v4786_v57 = vadd.f32 %v4785_v28, %v4784_v51  ;;  %v7188_v11 = vadd.f32 %v7137_v29, %v4783_v5 }
 0x2b7   : > { %v7191_v41 = vadd.f32 %v4674_v61, %v7050_v30  ;;  %v7194_v36 = vadd.f32 %v7143_v9, %v4786_v57 }
 0x2b9   : > { %v4675_v24 = vpop.f32.mrb[144].mxu1  ;;  %v4787_v20 = vpop.f32.mrb[96].mxu0 }
 0x2ba   : > { %v4676_v22 = vpop.f32.mrb[145].mxu1  ;;  %v4788_v35 = vpop.f32.mrb[97].mxu0 }
 0x2bb   : > { %v4677_v45 = vadd.f32 %v4676_v22, %v4675_v24  ;;  %v4789_v8 = vadd.f32 %v4788_v35, %v4787_v20  ;;  %v4678_v40 = vpop.f32.mrb[146].mxu1  ;;  %v4790_v43 = vpop.f32.mrb[98].mxu0 }
 0x2bc   : > { %v4679_v0 = vpop.f32.mrb[147].mxu1  ;;  %v4791_v54 = vpop.f32.mrb[99].mxu0 }
 0x2bd   : > { %v5152_v18 = vadd.f32 %v4677_v45, %v7057_v16  ;;  %v4680_v29 = vadd.f32 %v4679_v0, %v4678_v40  ;;  %v4792_v49 = vadd.f32 %v4791_v54, %v4790_v43  ;;  %v7198_v30 = vadd.f32 %v7149_v46, %v4789_v8 }
 0x2bf   : > { %v5158_v9 = vadd.f32 %v4680_v29, %v7059_v10  ;;  %v7202_v21 = vadd.f32 %v7155_v39, %v4792_v49 }
 0x2c1   : > { %v4681_v53 = vpop.f32.mrb[148].mxu1  ;;  %v4793_v48 = vpop.f32.mrb[100].mxu0 }
 0x2c2   : > { %v4682_v47 = vpop.f32.mrb[149].mxu1  ;;  %v4794_v32 = vpop.f32.mrb[101].mxu0 }
 0x2c3   : > { %v4683_v14 = vadd.f32 %v4682_v47, %v4681_v53  ;;  %v4795_v15 = vadd.f32 %v4794_v32, %v4793_v48  ;;  %v4684_v5 = vpop.f32.mrb[150].mxu1  ;;  %v4796_v7 = vpop.f32.mrb[102].mxu0 }
 0x2c4   : > { %v4685_v51 = vpop.f32.mrb[151].mxu1  ;;  %v4797_v16 = vpop.f32.mrb[103].mxu0 }
 0x2c5   : > { %v5149_v3 = vadd.f32 %v4683_v14, %v7063_v19  ;;  %v4686_v28 = vadd.f32 %v4685_v51, %v4684_v5  ;;  %v4798_v46 = vadd.f32 %v4797_v16, %v4796_v7  ;;  %v7206_v61 = vadd.f32 %v7161_v38, %v4795_v15 }
 0x2c7   : > { %v5155_v10 = vadd.f32 %v4686_v28, %v7065_v42  ;;  %v7210_v39 = vadd.f32 %v7167_v27, %v4798_v46 }
 0x2c9   : > { %v4687_v57 = vpop.f32.mrb[152].mxu1  ;;  %v4799_v24 = vpop.f32.mrb[104].mxu0 }
 0x2ca   : > { %v4688_v20 = vpop.f32.mrb[153].mxu1  ;;  %v4800_v22 = vpop.f32.mrb[105].mxu0 }
 0x2cb   : > { %v4689_v35 = vadd.f32 %v4688_v20, %v4687_v57  ;;  %v4801_v45 = vadd.f32 %v4800_v22, %v4799_v24  ;;  %v4690_v8 = vpop.f32.mrb[154].mxu1  ;;  %v4802_v40 = vpop.f32.mrb[106].mxu0 }
 0x2cc   : > { %v4691_v43 = vpop.f32.mrb[155].mxu1  ;;  %v4803_v19 = vpop.f32.mrb[107].mxu0 }
 0x2cd   : > { %v5164_v0 = vadd.f32 %v4689_v35, %v7072_v55  ;;  %v4692_v54 = vadd.f32 %v4691_v43, %v4690_v8  ;;  %v4804_v38 = vadd.f32 %v4803_v19, %v4802_v40  ;;  %v7214_v29 = vadd.f32 %v7173_v4, %v4801_v45 }
 0x2cf   : > { %v5170_v42 = vadd.f32 %v4692_v54, %v7074_v52  ;;  %v7218_v27 = vadd.f32 %v7179_v13, %v4804_v38 }
 0x2d1   : > { %v4693_v49 = vpop.f32.mrb[156].mxu1  ;;  %v4805_v53 = vpop.f32.mrb[108].mxu0 }
 0x2d2   : > { %v4694_v48 = vpop.f32.mrb[157].mxu1  ;;  %v4806_v47 = vpop.f32.mrb[109].mxu0 }
 0x2d3   : > { %v4695_v32 = vadd.f32 %v4694_v48, %v4693_v49  ;;  %v4807_v14 = vadd.f32 %v4806_v47, %v4805_v53  ;;  %v4696_v15 = vpop.f32.mrb[158].mxu1  ;;  %v4808_v5 = vpop.f32.mrb[110].mxu0 }
 0x2d4   : > { %v4697_v7 = vpop.f32.mrb[159].mxu1  ;;  %v4809_v55 = vpop.f32.mrb[111].mxu0 }
 0x2d5   : > { %v5161_v51 = vadd.f32 %v4695_v32, %v7078_v25  ;;  %v4698_v16 = vadd.f32 %v4697_v7, %v4696_v15  ;;  %v4810_v4 = vadd.f32 %v4809_v55, %v4808_v5  ;;  %v7222_v28 = vadd.f32 %v7185_v12, %v4807_v14 }
 0x2d7   : > { %v5167_v52 = vadd.f32 %v4698_v16, %v7080_v62  ;;  %v7226_v13 = vadd.f32 %v7191_v41, %v4810_v4 }
 0x2d9   : > { %v4811_v46 = vpop.f32.mrb[112].mxu0 }
 0x2da   : > { %v4812_v57 = vpop.f32.mrb[113].mxu0 }
 0x2db   : > { %v4813_v24 = vadd.f32 %v4812_v57, %v4811_v46  ;;  %v4814_v20 = vpop.f32.mrb[114].mxu0  ;;  %v7247_v46 = vld [vmem:[%s7433_s4] ss:$0 sm:$0xff] }
 0x2dc   : > { %v4815_v22 = vpop.f32.mrb[115].mxu0 }
 0x2dd   : > { %v4816_v35 = vadd.f32 %v4815_v22, %v4814_v20  ;;  %v7228_v45 = vadd.f32 %v5152_v18, %v4813_v24 }
 0x2df   : > { %v7230_v8 = vadd.f32 %v5158_v9, %v4816_v35 }
 0x2e1   : > { %v4817_v25 = vpop.f32.mrb[116].mxu0 }
 0x2e2   : > { %v4818_v40 = vpop.f32.mrb[117].mxu0 }
 0x2e3   : > { %v4819_v43 = vadd.f32 %v4818_v40, %v4817_v25  ;;  %v4820_v12 = vpop.f32.mrb[118].mxu0 }
 0x2e4   : > { %v4821_v19 = vpop.f32.mrb[119].mxu0 }
 0x2e5   : > { %v4822_v54 = vadd.f32 %v4821_v19, %v4820_v12  ;;  %v7232_v62 = vadd.f32 %v5149_v3, %v4819_v43 }
 0x2e7   : > { %v7234_v41 = vadd.f32 %v5155_v10, %v4822_v54 }
 0x2e9   : > { %v4823_v38 = vpop.f32.mrb[120].mxu0 }
 0x2ea   : > { %v4824_v49 = vpop.f32.mrb[121].mxu0 }
 0x2eb   : > { %v4825_v53 = vadd.f32 %v4824_v49, %v4823_v38  ;;  %v4826_v48 = vpop.f32.mrb[122].mxu0 }
 0x2ec   : > { %v4827_v47 = vpop.f32.mrb[123].mxu0 }
 0x2ed   : > { %v4828_v32 = vadd.f32 %v4827_v47, %v4826_v48  ;;  %v7236_v18 = vadd.f32 %v5164_v0, %v4825_v53 }
 0x2ef   : > { %v7238_v9 = vadd.f32 %v5170_v42, %v4828_v32 }
 0x2f1   : > { %v4829_v14 = vpop.f32.mrb[124].mxu0 }
 0x2f2   : > { %v4830_v15 = vpop.f32.mrb[125].mxu0 }
 0x2f3   : > { %v4831_v5 = vadd.f32 %v4830_v15, %v4829_v14  ;;  %v4832_v7 = vpop.f32.mrb[126].mxu0 }
 0x2f4   : > { %v4833_v55 = vpop.f32.mrb[127].mxu0 }
 0x2f5   : > { %v4834_v16 = vadd.f32 %v4833_v55, %v4832_v7  ;;  %v7240_v3 = vadd.f32 %v5161_v51, %v4831_v5 }
 0x2f7   : > { %v7242_v10 = vadd.f32 %v5167_v52, %v4834_v16 }
 0x2f9   : > { %v4997_v4 = vpop.f32.mrb[32].mxu0 }
 0x2fa   : > { %v5079_v0 = vadd.f32 %v7119_v6, %v4997_v4  ;;  %v3499_v42 = vpop.f32.mrb[33].mxu0 }
 0x2fb   : > { %v5082_v57 = vadd.f32 %v7109_v31, %v3499_v42  ;;  %v4998_v24 = vpop.f32.mrb[34].mxu0 }
 0x2fc   : > { %v3667_v20 = vadd.f32 %v5079_v0, %v7247_v46  ;;  %v5085_v22 = vadd.f32 %v7124_v17, %v4998_v24  ;;  %v3502_v51 = vpop.f32.mrb[35].mxu0 }
 0x2fd   : > { %v3665_v52 = vadd.f32 %v5082_v57, %v7247_v46  ;;  %v5088_v35 = vadd.f32 %v7114_v58, %v3502_v51 }
 0x2fe   : > { %v3668_v25 = vadd.f32 %v5085_v22, %v7247_v46  ;;  %v3699_v43 = vmax.f32 %v3667_v20, 0.0 }
 0x2ff   : > { %v3666_v40 = vadd.f32 %v5088_v35, %v7247_v46  ;;  %v3697_v6 = vmax.f32 %v3665_v52, 0.0 }
 0x300   : > { %v3700_v12 = vmax.f32 %v3668_v25, 0.0 }
 0x301   : > { %v3698_v19 = vmax.f32 %v3666_v40, 0.0  ;;  %v5001_v54 = vpop.f32.mrb[36].mxu0 }
 0x302   : > { %v3730_v31 = vpack.c.bf16 %v3700_v12, %v3699_v43  ;;  %v5091_v38 = vadd.f32 %v7140_v50, %v5001_v54  ;;  %v3515_v49 = vpop.f32.mrb[37].mxu0 }
 0x303   : > { %v5094_v17 = vadd.f32 %v7129_v44, %v3515_v49  ;;  %v5002_v53 = vpop.f32.mrb[38].mxu0  ;;  %v3729_v48 = vpack.c.bf16 %v3698_v19, %v3697_v6 }
 0x304   : > { %v3671_v47 = vadd.f32 %v5091_v38, %v7247_v46  ;;  %v5097_v58 = vadd.f32 %v7146_v34, %v5002_v53  ;;  %v3518_v32 = vpop.f32.mrb[39].mxu0 }
 0x305   : > { %v3669_v14 = vadd.f32 %v5094_v17, %v7247_v46  ;;  %v5100_v15 = vadd.f32 %v7134_v33, %v3518_v32  ;;  %5043 = vmatprep.mubr.bf16.mxu1 %v3729_v48 }
 0x306   : > { %v3672_v5 = vadd.f32 %v5097_v58, %v7247_v46  ;;  %5044 = vmatmul.mubr.bf16.vlgmr.msra.gmra.mrb[160].mxu1 %v3730_v31  ;;  %v3703_v7 = vmax.f32 %v3671_v47, 0.0 }
 0x307   : > { %v3670_v50 = vadd.f32 %v5100_v15, %v7247_v46  ;;  %v3701_v44 = vmax.f32 %v3669_v14, 0.0 }
 0x308   : > { %v3704_v55 = vmax.f32 %v3672_v5, 0.0 }
 0x309   : > { %v3702_v16 = vmax.f32 %v3670_v50, 0.0  ;;  %v5005_v4 = vpop.f32.mrb[40].mxu0 }
 0x30a   : > { %v5103_v0 = vadd.f32 %v7164_v1, %v5005_v4  ;;  %v3531_v42 = vpop.f32.mrb[41].mxu0  ;;  %v3732_v34 = vpack.c.bf16 %v3704_v55, %v3703_v7 }
 0x30b   : > { %v5106_v57 = vadd.f32 %v7152_v56, %v3531_v42  ;;  %v5006_v24 = vpop.f32.mrb[42].mxu0  ;;  %v3731_v20 = vpack.c.bf16 %v3702_v16, %v3701_v44 }
 0x30c   : > { %v3675_v33 = vadd.f32 %v5103_v0, %v7247_v46  ;;  %v5109_v22 = vadd.f32 %v7170_v23, %v5006_v24  ;;  %v3534_v51 = vpop.f32.mrb[43].mxu0 }
 0x30d   : > { %v3673_v52 = vadd.f32 %v5106_v57, %v7247_v46  ;;  %v5112_v35 = vadd.f32 %v7158_v63, %v3534_v51  ;;  %5047 = vmatprep.mubr.bf16.mxu1 %v3731_v20 }
 0x30e   : > { %v3676_v25 = vadd.f32 %v5109_v22, %v7247_v46  ;;  %5048 = vmatmul.mubr.bf16.gmra.mrb[164].mxu1 %v3732_v34  ;;  %v3707_v40 = vmax.f32 %v3675_v33, 0.0 }
 0x30f   : > { %v3674_v1 = vadd.f32 %v5112_v35, %v7247_v46  ;;  %v3705_v56 = vmax.f32 %v3673_v52, 0.0 }
 0x310   : > { %v3708_v43 = vmax.f32 %v3676_v25, 0.0 }
 0x311   : > { %v3706_v12 = vmax.f32 %v3674_v1, 0.0  ;;  %v5009_v6 = vpop.f32.mrb[44].mxu0 }
 0x312   : > { %v5115_v19 = vadd.f32 %v7188_v11, %v5009_v6  ;;  %v3547_v54 = vpop.f32.mrb[45].mxu0  ;;  %v3734_v23 = vpack.c.bf16 %v3708_v43, %v3707_v40 }
 0x313   : > { %v5118_v31 = vadd.f32 %v7176_v2, %v3547_v54  ;;  %v5010_v38 = vpop.f32.mrb[46].mxu0  ;;  %v3733_v49 = vpack.c.bf16 %v3706_v12, %v3705_v56 }
 0x314   : > { %v3679_v63 = vadd.f32 %v5115_v19, %v7247_v46  ;;  %v5121_v17 = vadd.f32 %v7194_v36, %v5010_v38  ;;  %v3550_v53 = vpop.f32.mrb[47].mxu0 }
 0x315   : > { %v3677_v48 = vadd.f32 %v5118_v31, %v7247_v46  ;;  %v5124_v47 = vadd.f32 %v7182_v37, %v3550_v53  ;;  %5051 = vmatprep.mubr.bf16.mxu1 %v3733_v49 }
 0x316   : > { %v3680_v58 = vadd.f32 %v5121_v17, %v7247_v46  ;;  %5052 = vmatmul.mubr.bf16.gmra.mrb[168].mxu1 %v3734_v23  ;;  %v3711_v32 = vmax.f32 %v3679_v63, 0.0 }
 0x317   : > { %v3678_v11 = vadd.f32 %v5124_v47, %v7247_v46  ;;  %v3709_v2 = vmax.f32 %v3677_v48, 0.0 }
 0x318   : > { %v3712_v14 = vmax.f32 %v3680_v58, 0.0 }
 0x319   : > { %v3710_v15 = vmax.f32 %v3678_v11, 0.0  ;;  %v5013_v5 = vpop.f32.mrb[48].mxu0 }
 0x31a   : > { %v5127_v50 = vadd.f32 %v7206_v61, %v5013_v5  ;;  %v3563_v7 = vpop.f32.mrb[49].mxu0  ;;  %v3736_v36 = vpack.c.bf16 %v3712_v14, %v3711_v32 }
 0x31b   : > { %v5130_v55 = vadd.f32 %v7198_v30, %v3563_v7  ;;  %v5014_v44 = vpop.f32.mrb[50].mxu0  ;;  %v3735_v16 = vpack.c.bf16 %v3710_v15, %v3709_v2 }
 0x31c   : > { %v3683_v37 = vadd.f32 %v5127_v50, %v7247_v46  ;;  %v5133_v4 = vadd.f32 %v7210_v39, %v5014_v44  ;;  %v3566_v0 = vpop.f32.mrb[51].mxu0 }
 0x31d   : > { %v3681_v42 = vadd.f32 %v5130_v55, %v7247_v46  ;;  %v5136_v34 = vadd.f32 %v7202_v21, %v3566_v0  ;;  %5055 = vmatprep.mubr.bf16.mxu1 %v3735_v16 }
 0x31e   : > { %v3684_v57 = vadd.f32 %v5133_v4, %v7247_v46  ;;  %5056 = vmatmul.mubr.bf16.gmra.mrb[172].mxu1 %v3736_v36  ;;  %v3715_v24 = vmax.f32 %v3683_v37, 0.0 }
 0x31f   : > { %v3682_v61 = vadd.f32 %v5136_v34, %v7247_v46  ;;  %v3713_v30 = vmax.f32 %v3681_v42, 0.0 }
 0x320   : > { %v3716_v20 = vmax.f32 %v3684_v57, 0.0 }
 0x321   : > { %v3714_v33 = vmax.f32 %v3682_v61, 0.0  ;;  %v5017_v22 = vpop.f32.mrb[52].mxu0 }
 0x322   : > { %v5139_v51 = vadd.f32 %v7222_v28, %v5017_v22  ;;  %v3579_v52 = vpop.f32.mrb[53].mxu0  ;;  %v3738_v39 = vpack.c.bf16 %v3716_v20, %v3715_v24 }
 0x323   : > { %v5142_v35 = vadd.f32 %v7214_v29, %v3579_v52  ;;  %v5018_v25 = vpop.f32.mrb[54].mxu0  ;;  %v3737_v1 = vpack.c.bf16 %v3714_v33, %v3713_v30  ;;  %v7647_v33 = vld [vmem:[#allocation9_spill] sm:$0xff]  ;;  %v7648_v52 = vld [vmem:[#allocation7_spill] sm:$0xff] }
 0x324   : > { %v3687_v21 = vadd.f32 %v5139_v51, %v7247_v46  ;;  %v5145_v40 = vadd.f32 %v7226_v13, %v5018_v25  ;;  %v3582_v43 = vpop.f32.mrb[55].mxu0  ;;  %v3995_v22 = vunpack.c.l.bf16 %v7647_v33 }
 0x325   : > { %v3685_v56 = vadd.f32 %v5142_v35, %v7247_v46  ;;  %v5148_v12 = vadd.f32 %v7218_v27, %v3582_v43  ;;  %5059 = vmatprep.mubr.bf16.mxu1 %v3737_v1 }
 0x326   : > { %v3688_v6 = vadd.f32 %v5145_v40, %v7247_v46  ;;  %5060 = vmatmul.mubr.bf16.gmra.mrb[176].mxu1 %v3738_v39  ;;  %v3719_v19 = vmax.f32 %v3687_v21, 0.0  ;;  %v3993_v39 = vunpack.c.l.bf16 %v7648_v52  ;;  %v3996_v21 = vunpack.c.h.bf16 %v7647_v33 }
 0x327   : > { %v3686_v28 = vadd.f32 %v5148_v12, %v7247_v46  ;;  %v3717_v29 = vmax.f32 %v3685_v56, 0.0  ;;  %v3994_v12 = vunpack.c.h.bf16 %v7648_v52 }
 0x328   : > { %v3720_v54 = vmax.f32 %v3688_v6, 0.0 }
 0x329   : > { %v3718_v23 = vmax.f32 %v3686_v28, 0.0  ;;  %v5021_v31 = vpop.f32.mrb[56].mxu0 }
 0x32a   : > { %v5151_v38 = vadd.f32 %v7232_v62, %v5021_v31  ;;  %v3595_v49 = vpop.f32.mrb[57].mxu0  ;;  %v3740_v13 = vpack.c.bf16 %v3720_v54, %v3719_v19  ;;  %v7649_v31 = vld [vmem:[#allocation15_spill] sm:$0xff] }
 0x32b   : > { %v5154_v63 = vadd.f32 %v7228_v45, %v3595_v49  ;;  %v5022_v17 = vpop.f32.mrb[58].mxu0  ;;  %v3739_v53 = vpack.c.bf16 %v3718_v23, %v3717_v29 }
 0x32c   : > { %v3691_v27 = vadd.f32 %v5151_v38, %v7247_v46  ;;  %v5157_v48 = vadd.f32 %v7234_v41, %v5022_v17  ;;  %v3598_v47 = vpop.f32.mrb[59].mxu0  ;;  %v3999_v38 = vunpack.c.l.bf16 %v7649_v31 }
 0x32d   : > { %v3689_v58 = vadd.f32 %v5154_v63, %v7247_v46  ;;  %v5160_v11 = vadd.f32 %v7230_v8, %v3598_v47  ;;  %5063 = vmatprep.mubr.bf16.mxu1 %v3739_v53  ;;  %v7650_v53 = vld [vmem:[#allocation11_spill] sm:$0xff] }
 0x32e   : > { %v3692_v32 = vadd.f32 %v5157_v48, %v7247_v46  ;;  %5064 = vmatmul.mubr.bf16.gmra.mrb[180].mxu1 %v3740_v13  ;;  %v3723_v14 = vmax.f32 %v3691_v27, 0.0  ;;  %v3997_v27 = vunpack.c.l.bf16 %v7650_v53 }
 0x32f   : > { %v3690_v62 = vadd.f32 %v5160_v11, %v7247_v46  ;;  %v3721_v45 = vmax.f32 %v3689_v58, 0.0  ;;  %v4000_v11 = vunpack.c.h.bf16 %v7649_v31 }
 0x330   : > { %v3724_v2 = vmax.f32 %v3692_v32, 0.0 }
 0x331   : > { %v3722_v15 = vmax.f32 %v3690_v62, 0.0  ;;  %v5025_v5 = vpop.f32.mrb[60].mxu0  ;;  %v3998_v62 = vunpack.c.h.bf16 %v7650_v53 }
 0x332   : > { %v5163_v50 = vadd.f32 %v7240_v3, %v5025_v5  ;;  %v3611_v7 = vpop.f32.mrb[61].mxu0  ;;  %v3742_v41 = vpack.c.bf16 %v3724_v2, %v3723_v14 }
 0x333   : > { %v5166_v36 = vadd.f32 %v7236_v18, %v3611_v7  ;;  %v5026_v55 = vpop.f32.mrb[62].mxu0  ;;  %v3741_v44 = vpack.c.bf16 %v3722_v15, %v3721_v45 }
 0x334   : > { %v3695_v8 = vadd.f32 %v5163_v50, %v7247_v46  ;;  %v5169_v16 = vadd.f32 %v7242_v10, %v5026_v55  ;;  %v3614_v37 = vpop.f32.mrb[63].mxu0  ;;  %v7316_v10 = vld [vmem:[%s7435_s6] ss:$0 sm:$0xff] }
 0x335   : > { %v3693_v4 = vadd.f32 %v5166_v36, %v7247_v46  ;;  %v5172_v0 = vadd.f32 %v7238_v9, %v3614_v37  ;;  %5067 = vmatprep.mubr.bf16.mxu1 %v3741_v44 }
 0x336   : > { %v3696_v42 = vadd.f32 %v5169_v16, %v7247_v46  ;;  %5068 = vmatmul.mubr.bf16.gmra.mrb[184].mxu1 %v3742_v41  ;;  %v3727_v34 = vmax.f32 %v3695_v8, 0.0  ;;  %v7651_v16 = vld [vmem:[#allocation23_spill] sm:$0xff] }
 0x337   : > { %v3694_v3 = vadd.f32 %v5172_v0, %v7247_v46  ;;  %v3725_v18 = vmax.f32 %v3693_v4, 0.0  ;;  %v4003_v37 = vunpack.c.l.bf16 %v7651_v16 }
 0x338   : > { %v3728_v57 = vmax.f32 %v3696_v42, 0.0 }
 0x339   : > { %v3726_v61 = vmax.f32 %v3694_v3, 0.0 }
 0x33a   : > { %v3744_v24 = vpack.c.bf16 %v3728_v57, %v3727_v34  ;;  %v7652_v34 = vld [vmem:[#allocation19_spill] sm:$0xff] }
 0x33b   : > { %v3743_v20 = vpack.c.bf16 %v3726_v61, %v3725_v18  ;;  %v4001_v57 = vunpack.c.l.bf16 %v7652_v34 }
 0x33d   : > { %5071 = vmatprep.mubr.bf16.mxu1 %v3743_v20  ;;  %v4004_v20 = vunpack.c.h.bf16 %v7651_v16 }
 0x33e   : > { %5072 = vmatmul.mubr.bf16.gmra.mrb[188].mxu1 %v3744_v24 }
 0x3d9   : > { %v5045_v9 = vpop.f32.mrb[160].mxu1 }
 0x3da   : > { %v3859_v30 = vadd.f32 %v5045_v9, %v7316_v10  ;;  %v3850_v51 = vpop.f32.mrb[161].mxu1 }
 0x3db   : > { %v3851_v46 = vadd.f32 %v7316_v10, %v3850_v51  ;;  %v5046_v35 = vpop.f32.mrb[162].mxu1 }
 0x3dc   : > { %v4027_v25 = vadd.f32 %v3995_v22, %v3859_v30  ;;  %v3862_v1 = vadd.f32 %v5046_v35, %v7316_v10  ;;  %v3853_v40 = vpop.f32.mrb[163].mxu1  ;;  %v4002_v30 = vunpack.c.h.bf16 %v7652_v34 }
 0x3dd   : > { %v4025_v43 = vadd.f32 %v3993_v39, %v3851_v46  ;;  %v3854_v56 = vadd.f32 %v7316_v10, %v3853_v40 }
 0x3de   : > { %v4028_v6 = vadd.f32 %v3996_v21, %v3862_v1  ;;  %v4059_v13 = vmax.f32 %v4027_v25, 0.0 }
 0x3df   : > { %v4026_v28 = vadd.f32 %v3994_v12, %v3854_v56  ;;  %v4057_v19 = vmax.f32 %v4025_v43, 0.0  ;;  %v4007_v56 = vunpack.c.l.bf16 %v6611_v60 }
 0x3e0   : > { %v4060_v14 = vmax.f32 %v4028_v6, 0.0 }
 0x3e1   : > { %v4058_v54 = vmax.f32 %v4026_v28, 0.0  ;;  %v5049_v29 = vpop.f32.mrb[164].mxu1 }
 0x3e2   : > { %v3875_v23 = vadd.f32 %v5049_v29, %v7316_v10  ;;  %v3866_v49 = vpop.f32.mrb[165].mxu1 }
 0x3e3   : > { %v4089_v63 = vadd.f32 %v4058_v54, %v4057_v19  ;;  %v3867_v17 = vadd.f32 %v7316_v10, %v3866_v49  ;;  %v5050_v48 = vpop.f32.mrb[166].mxu1  ;;  %v7653_v54 = vld [vmem:[#allocation27_spill] sm:$0xff]  ;;  %v4008_v49 = vunpack.c.h.bf16 %v6611_v60 }
 0x3e4   : > { %v4031_v47 = vadd.f32 %v3999_v38, %v3875_v23  ;;  %v3878_v58 = vadd.f32 %v5050_v48, %v7316_v10  ;;  %v3869_v32 = vpop.f32.mrb[167].mxu1  ;;  %v4005_v29 = vunpack.c.l.bf16 %v7653_v54 }
 0x3e5   : > { %v4090_v2 = vadd.f32 %v4089_v63, %v4059_v13  ;;  %v4029_v45 = vadd.f32 %v3997_v27, %v3867_v17  ;;  %v3870_v15 = vadd.f32 %v7316_v10, %v3869_v32  ;;  %v4006_v63 = vunpack.c.h.bf16 %v7653_v54 }
 0x3e6   : > { %v4032_v5 = vadd.f32 %v4000_v11, %v3878_v58  ;;  %v4063_v0 = vmax.f32 %v4031_v47, 0.0 }
 0x3e7   : > { %v4061_v50 = vmax.f32 %v4029_v45, 0.0  ;;  %v4091_v7 = vadd.f32 %v4090_v2, %v4060_v14  ;;  %v4030_v41 = vadd.f32 %v3998_v62, %v3870_v15  ;;  %v7654_v15 = vld [vmem:[#allocation10_spill] sm:$0xff] }
 0x3e8   : > { %v4064_v33 = vmax.f32 %v4032_v5, 0.0  ;;  %v4011_v5 = vunpack.c.l.bf16 %v7654_v15 }
 0x3e9   : > { %v4092_v36 = vadd.f32 %v4091_v7, %v4061_v50  ;;  %v4062_v55 = vmax.f32 %v4030_v41, 0.0  ;;  %v5053_v44 = vpop.f32.mrb[168].mxu1 }
 0x3ea   : > { %v3891_v8 = vadd.f32 %v5053_v44, %v7316_v10  ;;  %v3882_v4 = vpop.f32.mrb[169].mxu1 }
 0x3eb   : > { %v4093_v42 = vadd.f32 %v4092_v36, %v4062_v55  ;;  %v3883_v3 = vadd.f32 %v7316_v10, %v3882_v4  ;;  %v5054_v18 = vpop.f32.mrb[170].mxu1  ;;  %v7655_v36 = vld [vmem:[#allocation8_spill] sm:$0xff] }
 0x3ec   : > { %v4035_v61 = vadd.f32 %v4003_v37, %v3891_v8  ;;  %v3894_v24 = vadd.f32 %v5054_v18, %v7316_v10  ;;  %v3885_v9 = vpop.f32.mrb[171].mxu1  ;;  %v4009_v55 = vunpack.c.l.bf16 %v7655_v36  ;;  %v4012_v37 = vunpack.c.h.bf16 %v7654_v15 }
 0x3ed   : > { %v4094_v22 = vadd.f32 %v4093_v42, %v4063_v0  ;;  %v4033_v51 = vadd.f32 %v4001_v57, %v3883_v3  ;;  %v3886_v46 = vadd.f32 %v7316_v10, %v3885_v9  ;;  %v4010_v0 = vunpack.c.h.bf16 %v7655_v36 }
 0x3ee   : > { %v4036_v52 = vadd.f32 %v4004_v20, %v3894_v24  ;;  %v4067_v6 = vmax.f32 %v4035_v61, 0.0 }
 0x3ef   : > { %v4065_v39 = vmax.f32 %v4033_v51, 0.0  ;;  %v4095_v35 = vadd.f32 %v4094_v22, %v4064_v33  ;;  %v4034_v25 = vadd.f32 %v4002_v30, %v3886_v46  ;;  %v7656_v51 = vld [vmem:[#allocation18_spill] sm:$0xff] }
 0x3f0   : > { %v4068_v17 = vmax.f32 %v4036_v52, 0.0  ;;  %v4015_v46 = vunpack.c.l.bf16 %v7656_v51 }
 0x3f1   : > { %v4096_v1 = vadd.f32 %v4095_v35, %v4065_v39  ;;  %v4066_v21 = vmax.f32 %v4034_v25, 0.0  ;;  %v5057_v40 = vpop.f32.mrb[172].mxu1 }
 0x3f2   : > { %v3907_v43 = vadd.f32 %v5057_v40, %v7316_v10  ;;  %v3898_v12 = vpop.f32.mrb[173].mxu1 }
 0x3f3   : > { %v4097_v28 = vadd.f32 %v4096_v1, %v4066_v21  ;;  %v3899_v19 = vadd.f32 %v7316_v10, %v3898_v12  ;;  %v5058_v23 = vpop.f32.mrb[174].mxu1  ;;  %v7657_v1 = vld [vmem:[#allocation14_spill] sm:$0xff]  ;;  %v4016_v12 = vunpack.c.h.bf16 %v7656_v51  ;;  %v4024_v51 = vunpack.c.h.bf16 %v6644_v59 }
 0x3f4   : > { %v4039_v31 = vadd.f32 %v4007_v56, %v3907_v43  ;;  %v3910_v38 = vadd.f32 %v5058_v23, %v7316_v10  ;;  %v3901_v13 = vpop.f32.mrb[175].mxu1  ;;  %v4013_v21 = vunpack.c.l.bf16 %v7657_v1 }
 0x3f5   : > { %v4098_v53 = vadd.f32 %v4097_v28, %v4067_v6  ;;  %v4037_v27 = vadd.f32 %v4005_v29, %v3899_v19  ;;  %v3902_v48 = vadd.f32 %v7316_v10, %v3901_v13  ;;  %v4014_v28 = vunpack.c.h.bf16 %v7657_v1 }
 0x3f6   : > { %v4040_v47 = vadd.f32 %v4008_v49, %v3910_v38  ;;  %v4071_v50 = vmax.f32 %v4039_v31, 0.0 }
 0x3f7   : > { %v4069_v58 = vmax.f32 %v4037_v27, 0.0  ;;  %v4099_v11 = vadd.f32 %v4098_v53, %v4068_v17  ;;  %v4038_v32 = vadd.f32 %v4006_v63, %v3902_v48  ;;  %v7658_v48 = vld [vmem:[#allocation26_spill] sm:$0xff] }
 0x3f8   : > { %v4072_v42 = vmax.f32 %v4040_v47, 0.0  ;;  %v4019_v47 = vunpack.c.l.bf16 %v7658_v48 }
 0x3f9   : > { %v4100_v62 = vadd.f32 %v4099_v11, %v4069_v58  ;;  %v4070_v14 = vmax.f32 %v4038_v32, 0.0  ;;  %v5061_v2 = vpop.f32.mrb[176].mxu1 }
 0x3fa   : > { %v3923_v45 = vadd.f32 %v5061_v2, %v7316_v10  ;;  %v3914_v60 = vpop.f32.mrb[177].mxu1 }
 0x3fb   : > { %v4101_v7 = vadd.f32 %v4100_v62, %v4070_v14  ;;  %v3915_v41 = vadd.f32 %v7316_v10, %v3914_v60  ;;  %v5062_v44 = vpop.f32.mrb[178].mxu1  ;;  %v7659_v14 = vld [vmem:[#allocation22_spill] sm:$0xff]  ;;  %v4020_v60 = vunpack.c.h.bf16 %v7658_v48 }
 0x3fc   : > { %v4043_v8 = vadd.f32 %v4011_v5, %v3923_v45  ;;  %v3926_v16 = vadd.f32 %v5062_v44, %v7316_v10  ;;  %v3917_v4 = vpop.f32.mrb[179].mxu1  ;;  %v4017_v2 = vunpack.c.l.bf16 %v7659_v14 }
 0x3fd   : > { %v4102_v3 = vadd.f32 %v4101_v7, %v4071_v50  ;;  %v4041_v34 = vadd.f32 %v4009_v55, %v3915_v41  ;;  %v3918_v57 = vadd.f32 %v7316_v10, %v3917_v4  ;;  %v4018_v7 = vunpack.c.h.bf16 %v7659_v14 }
 0x3fe   : > { %v4044_v18 = vadd.f32 %v4012_v37, %v3926_v16  ;;  %v4075_v39 = vmax.f32 %v4043_v8, 0.0 }
 0x3ff   : > { %v4073_v61 = vmax.f32 %v4041_v34, 0.0  ;;  %v4103_v24 = vadd.f32 %v4102_v3, %v4072_v42  ;;  %v4042_v20 = vadd.f32 %v4010_v0, %v3918_v57  ;;  %v4023_v57 = vunpack.c.l.bf16 %v6644_v59 }
 0x400   : > { %v4076_v19 = vmax.f32 %v4044_v18, 0.0 }
 0x401   : > { %v4104_v9 = vadd.f32 %v4103_v24, %v4073_v61  ;;  %v4074_v30 = vmax.f32 %v4042_v20, 0.0  ;;  %v5065_v33 = vpop.f32.mrb[180].mxu1 }
 0x402   : > { %v3939_v22 = vadd.f32 %v5065_v33, %v7316_v10  ;;  %v3930_v52 = vpop.f32.mrb[181].mxu1 }
 0x403   : > { %v4105_v35 = vadd.f32 %v4104_v9, %v4074_v30  ;;  %v3931_v25 = vadd.f32 %v7316_v10, %v3930_v52  ;;  %v5066_v40 = vpop.f32.mrb[182].mxu1  ;;  %v4021_v9 = vunpack.c.l.bf16 %v6607_v26  ;;  %v4022_v52 = vunpack.c.h.bf16 %v6607_v26 }
 0x404   : > { %v4047_v43 = vadd.f32 %v4015_v46, %v3939_v22  ;;  %v3942_v56 = vadd.f32 %v5066_v40, %v7316_v10  ;;  %v3933_v6 = vpop.f32.mrb[183].mxu1 }
 0x405   : > { %v4106_v54 = vadd.f32 %v4105_v35, %v4075_v39  ;;  %v4045_v29 = vadd.f32 %v4013_v21, %v3931_v25  ;;  %v3934_v23 = vadd.f32 %v7316_v10, %v3933_v6 }
 0x406   : > { %v4048_v31 = vadd.f32 %v4016_v12, %v3942_v56  ;;  %v4079_v11 = vmax.f32 %v4047_v43, 0.0 }
 0x407   : > { %v4077_v38 = vmax.f32 %v4045_v29, 0.0  ;;  %v4107_v49 = vadd.f32 %v4106_v54, %v4076_v19  ;;  %v4046_v13 = vadd.f32 %v4014_v28, %v3934_v23 }
 0x408   : > { %v4080_v41 = vmax.f32 %v4048_v31, 0.0 }
 0x409   : > { %v4108_v63 = vadd.f32 %v4107_v49, %v4077_v38  ;;  %v4078_v17 = vmax.f32 %v4046_v13, 0.0  ;;  %v5069_v53 = vpop.f32.mrb[184].mxu1 }
 0x40a   : > { %v3955_v27 = vadd.f32 %v5069_v53, %v7316_v10  ;;  %v3946_v58 = vpop.f32.mrb[185].mxu1 }
 0x40b   : > { %v4109_v32 = vadd.f32 %v4108_v63, %v4078_v17  ;;  %v3947_v62 = vadd.f32 %v7316_v10, %v3946_v58  ;;  %v5070_v45 = vpop.f32.mrb[186].mxu1 }
 0x40c   : > { %v4051_v15 = vadd.f32 %v4019_v47, %v3955_v27  ;;  %v3958_v5 = vadd.f32 %v5070_v45, %v7316_v10  ;;  %v3949_v50 = vpop.f32.mrb[187].mxu1 }
 0x40d   : > { %v4110_v36 = vadd.f32 %v4109_v32, %v4079_v11  ;;  %v4049_v55 = vadd.f32 %v4017_v2, %v3947_v62  ;;  %v3950_v44 = vadd.f32 %v7316_v10, %v3949_v50 }
 0x40e   : > { %v4052_v8 = vadd.f32 %v4020_v60, %v3958_v5  ;;  %v4083_v61 = vmax.f32 %v4051_v15, 0.0 }
 0x40f   : > { %v4081_v16 = vmax.f32 %v4049_v55, 0.0  ;;  %v4111_v37 = vadd.f32 %v4110_v36, %v4080_v41  ;;  %v4050_v4 = vadd.f32 %v4018_v7, %v3950_v44 }
 0x410   : > { %v4084_v39 = vmax.f32 %v4052_v8, 0.0 }
 0x411   : > { %v4112_v0 = vadd.f32 %v4111_v37, %v4081_v16  ;;  %v4082_v42 = vmax.f32 %v4050_v4, 0.0  ;;  %v5073_v3 = vpop.f32.mrb[188].mxu1 }
 0x412   : > { %v3971_v34 = vadd.f32 %v5073_v3, %v7316_v10  ;;  %v3962_v18 = vpop.f32.mrb[189].mxu1 }
 0x413   : > { %v4113_v24 = vadd.f32 %v4112_v0, %v4082_v42  ;;  %v3963_v20 = vadd.f32 %v7316_v10, %v3962_v18  ;;  %v5074_v30 = vpop.f32.mrb[190].mxu1 }
 0x414   : > { %v4055_v33 = vadd.f32 %v4023_v57, %v3971_v34  ;;  %v3974_v22 = vadd.f32 %v5074_v30, %v7316_v10  ;;  %v3965_v46 = vpop.f32.mrb[191].mxu1 }
 0x415   : > { %v4114_v35 = vadd.f32 %v4113_v24, %v4083_v61  ;;  %v4053_v25 = vadd.f32 %v4021_v9, %v3963_v20  ;;  %v3966_v1 = vadd.f32 %v7316_v10, %v3965_v46 }
 0x416   : > { %v4056_v21 = vadd.f32 %v4024_v51, %v3974_v22  ;;  %v4087_v28 = vmax.f32 %v4055_v33, 0.0 }
 0x417   : > { %v4085_v40 = vmax.f32 %v4053_v25, 0.0  ;;  %v4115_v43 = vadd.f32 %v4114_v35, %v4084_v39  ;;  %v4054_v56 = vadd.f32 %v4022_v52, %v3966_v1 }
 0x418   : > { %v4088_v54 = vmax.f32 %v4056_v21, 0.0 }
 0x419   : > { %v4116_v12 = vadd.f32 %v4115_v43, %v4085_v40  ;;  %v4086_v6 = vmax.f32 %v4054_v56, 0.0 }
 0x41b   : > { %v4117_v19 = vadd.f32 %v4116_v12, %v4086_v6 }
 0x41d   : > { %v4118_v59 = vadd.f32 %v4117_v19, %v4087_v28 }
 0x41f   : > { %v4119_v29 = vadd.f32 %v4118_v59, %v4088_v54 }
 0x421   : > { %v4120_v23 = vrot.slane %v4119_v29, 4 }
 0x423   : > { %v4121_v26 = vadd.f32 %v4120_v23, %v4119_v29 }
 0x425   : > { %v4122_v31 = vrot.slane %v4121_v26, 2 }
 0x427   : > { %v4123_v38 = vadd.f32 %v4122_v31, %v4121_v26 }
 0x429   : > { %v4124_v49 = vrot.slane %v4123_v38, 1 }
 0x42b   : > { %v4125_v10 = vadd.f32 %v4124_v49, %v4123_v38 }
 0x42d   : > { %v4126_v13 = vmul.f32 0.00390625, %v4125_v10 }
 0x42f   : > { %4127 = vst [vmem:[%s270_s20] sm:$0x1] %v4126_v13 }
 0x430   : > { %5389 = shalt.err (!%p5386_p3)
}
 0x431   : > { %s5390_s16 = scalar_lea.hbm %s7387_s8, 16  ;;  %s5394_s19 = scalar_lea.hbm %s7436_s7, 32 }
 0x432   : > { %p5391_p4 = scmp.ne.s32.totalorder %s7387_s8, %s5390_s16  ;;  %p5395_p9 = scmp.lt.u32.totalorder %s7387_s8, %s7436_s7 }
 0x433   : > { %p5396_p10 = scmp.lt.u32.totalorder %s5394_s19, %s5390_s16  ;;  %p5398_p12 = scmp.lt.u32.totalorder %s5390_s16, %s7387_s8 }
 0x434   : > { %p5392_p7 = pnand %p5391_p4, %p5521_p5 }
 0x435   : > { %p5397_p11 = por %p5396_p10, %p5395_p9 }
 0x436   : > { %p5393_p8 = pneg %p5392_p7 }
 0x437   : > { %p5399_p13 = por %p5398_p12, %p5397_p11 }
 0x439   : > { %p5400_p0 = pnand %p5399_p13, %p5393_p8 }
 0x43b   : > { %5403 = shalt.err (!%p5400_p0)
}
 0x43c   : > { %5237 = dma.vmem_to_hbm [thread:$0]  (%p5521_p5), %s7389_s21, 16, %s7387_s8, %s4129_s9  }
 0x43d PF: > { %p5243_p1 = scmp.ge.s32.totalorder %s5438_s27, 2  ;;  %s4153_s22 = sand.u32 1, %s5426_s24  }
 0x43e   : > { %s4154_s29 = scalar_lea.sflag [#allocation5], %s4153_s22 }
 0x43f   : > { %p5240_p2 = pnand %p5243_p1, %p5525_p6 }
 0x441   : > { %5421 = dma.done.wait (!%p5240_p2), %s4154_s29, 16  }
 0x442   : > { %5423 = vsyncadd (!%p5240_p2), %s4154_s29, 4294967280  ;;  %p17_p3 = scmp.ge.s32.totalorder %s5508_s30, 4   ;;  %s7660_s24 = smov %s5430_s25 }
 0x443   : > { %s7661_s25 = smov %s5434_s26  ;;  %s7662_s26 = smov %s5519_s10 }
 0x444   : > { %s7663_s27 = smov %s5508_s30  ;;  %19 = sbr.rel (!%p17_p3) target bundleno = 3 (0x3), region = 85 }
 0x44b   :  { %4158 = vsyncpa [#allocation5], 1 }
 0x44c   :  { %4160 = vsyncpa [#allocation5 + $0x1], 1 }

</bundles_post_ra>
